<compile_context>
chip_gen: v7x
topology: tpu7x:2x2x1
jax: 0.10.0
libtpu: 0.0.40
codegen_flags: <defaults>
</compile_context>

<pallas_src>
import jax
import jax.numpy as jnp
from jax.experimental import pallas as pl
from jax.experimental.pallas import tpu as pltpu

DEPTH = 4
WIDTH = 128
IN_CH_XYZ = 63
SIGMA_OUT = 1
SH_OUT = 32
HEAD_FUSED = 2 * WIDTH   # 256: [sigma-head hidden | sh-head hidden]
OUT_PAD = 128            # lane-dense fused output: [sigma | sh | zero-pad]


def nerf_kernel(x_ref, w0_ref, w_enc_ref, b_enc_ref, wh1_ref, bh1_ref,
                wh2_ref, bh2_ref, out_ref):
    # In-kernel bf16 cast of the raw (TILE, 63) f32 input; first matmul runs at K=63.
    x = x_ref[...].astype(jnp.bfloat16)                       # (TILE, 63) bf16

    # Encoder layer 0 (xyz_encoding_1.layer1): (TILE,63)@(63,128) + ReLU.
    y = jnp.dot(x, w0_ref[...], preferred_element_type=jnp.float32)
    y = jnp.maximum(y + b_enc_ref[0:1, :], 0.0)
    h = y.astype(jnp.bfloat16)                                # (TILE, 128) bf16

    # Remaining 7 encoder Linear layers (statically unrolled; even layers get ReLU).
    for l in range(1, 2 * DEPTH):
        y = jnp.dot(h, w_enc_ref[l - 1], preferred_element_type=jnp.float32)
        y = y + b_enc_ref[l:l + 1, :]
        if l % 2 == 0:
            y = jnp.maximum(y, 0.0)
        h = y.astype(jnp.bfloat16)

    # Fused heads: one (128,256) matmul + ReLU, then block-diagonal (256,128) matmul.
    t = jnp.dot(h, wh1_ref[...], preferred_element_type=jnp.float32) + bh1_ref[...]
    t = jnp.maximum(t, 0.0).astype(jnp.bfloat16)              # (TILE, 256)
    o = jnp.dot(t, wh2_ref[...], preferred_element_type=jnp.float32) + bh2_ref[...]
    out_ref[...] = o.astype(out_ref.dtype)                    # (TILE, 128): [sigma|sh|0]


def pack_params(params):
    """Pack the 24 f32 (w, b) arrays into kernel-friendly bf16/f32 slabs (done once)."""
    # TODO(synk): optional int8 (v6e) / fp8 (v7x) encoder-weight path for better MXU
    # fill is not implemented (needs an accuracy gate); kept bf16 here.
    w0 = params[0].astype(jnp.bfloat16)                                   # (63, 128)
    b_enc = jnp.stack(
        [params[2 * l + 1].reshape(-1) for l in range(2 * DEPTH)]
    ).astype(jnp.float32)                                                 # (8, 128)
    w_rest = jnp.stack(
        [params[2 * l] for l in range(1, 2 * DEPTH)]
    ).astype(jnp.bfloat16)                                                # (7, 128, 128)

    ws1, bs1, ws2, bs2 = params[16:20]
    wh1, bh1, wh2, bh2 = params[20:24]

    # Head first layers fused along the output dim -> (128, 256).
    w_h1 = jnp.concatenate([ws1, wh1], axis=1).astype(jnp.bfloat16)
    b_h1 = jnp.concatenate([bs1, bh1], axis=1).astype(jnp.float32)        # (1, 256)

    # Head second layers fused block-diagonally into a lane-dense (256, 128) weight:
    #   rows   0..127 (sigma hidden) -> column 0
    #   rows 128..255 (sh hidden)    -> columns 1..32
    w_h2 = jnp.zeros((HEAD_FUSED, OUT_PAD), jnp.float32)
    w_h2 = w_h2.at[:WIDTH, 0:SIGMA_OUT].set(ws2)
    w_h2 = w_h2.at[WIDTH:, SIGMA_OUT:SIGMA_OUT + SH_OUT].set(wh2)
    w_h2 = w_h2.astype(jnp.bfloat16)

    b_h2 = jnp.zeros((1, OUT_PAD), jnp.float32)
    b_h2 = b_h2.at[:, 0:SIGMA_OUT].set(bs2)
    b_h2 = b_h2.at[:, SIGMA_OUT:SIGMA_OUT + SH_OUT].set(bh2)

    return (w0, w_rest, b_enc, w_h1, b_h1, w_h2, b_h2)


def _choose_tile(n):
    """Largest tile in {1024, 512, 256} that still gives >= 4 grid steps."""
    for t in (1024, 512, 256):
        if n >= 4 * t:
            return t
    return 256


def nerf_forward(x, packed, tile=None):
    """x: (N, 63) f32. packed: output of pack_params. Returns (sigma (N,1), sh (N,32))."""
    N, C = x.shape
    assert C == IN_CH_XYZ
    if tile is None:
        tile = _choose_tile(N)
    n_pad = pl.cdiv(N, tile) * tile
    if n_pad != N:
        # Row-pad only (no channel pad / cast pass); skipped entirely when N % tile == 0.
        x = jnp.pad(x, ((0, n_pad - N), (0, 0)))

    w0, w_rest, b_enc, w_h1, b_h1, w_h2, b_h2 = packed

    def full_block(p):
        nd = p.ndim
        return pl.BlockSpec(p.shape, lambda i, nd=nd: (0,) * nd)   # resident across grid

    out = pl.pallas_call(
        nerf_kernel,
        out_shape=jax.ShapeDtypeStruct((n_pad, OUT_PAD), jnp.bfloat16),
        grid_spec=pltpu.PrefetchScalarGridSpec(
            num_scalar_prefetch=0,
            grid=(n_pad // tile,),
            in_specs=[pl.BlockSpec((tile, IN_CH_XYZ), lambda i: (i, 0)),
                      full_block(w0), full_block(w_rest), full_block(b_enc),
                      full_block(w_h1), full_block(b_h1),
                      full_block(w_h2), full_block(b_h2)],
            out_specs=pl.BlockSpec((tile, OUT_PAD), lambda i: (i, 0)),
        ),
        compiler_params=pltpu.CompilerParams(
            dimension_semantics=("parallel",)),
    )(x, w0, w_rest, b_enc, w_h1, b_h1, w_h2, b_h2)

    sigma = out[:N, 0:SIGMA_OUT].astype(jnp.float32)
    sh = out[:N, SIGMA_OUT:SIGMA_OUT + SH_OUT].astype(jnp.float32)
    return sigma, sh


def init_params(key):
    """Deterministic f32 parameter init, shapes match NeRF(depth=4, width=128)."""
    layer_dims = []
    for i in range(DEPTH):
        in_dim = IN_CH_XYZ if i == 0 else WIDTH
        layer_dims += [(in_dim, WIDTH), (WIDTH, WIDTH)]          # xyz_encoding_{i+1}
    layer_dims += [(WIDTH, WIDTH), (WIDTH, SIGMA_OUT)]           # sigma head
    layer_dims += [(WIDTH, WIDTH), (WIDTH, SH_OUT)]              # sh head

    params = []
    for (fan_in, fan_out) in layer_dims:
        key, kw, kb = jax.random.split(key, 3)
        scale = 1.0 / jnp.sqrt(jnp.float32(fan_in))
        w = jax.random.normal(kw, (fan_in, fan_out), jnp.float32) * scale
        b = jax.random.normal(kb, (1, fan_out), jnp.float32) * 0.01
        params += [w, b]
    return params


def nerf_forward_ref(x, params):
    """Pure-JAX f32 reference matching the PyTorch module semantics."""
    h = x
    idx = 0
    for _ in range(DEPTH):
        w1, b1, w2, b2 = params[idx:idx + 4]
        idx += 4
        h = jnp.maximum(h @ w1 + b1, 0.0)
        h = h @ w2 + b2
    ws1, bs1, ws2, bs2 = params[16:20]
    sigma = jnp.maximum(h @ ws1 + bs1, 0.0) @ ws2 + bs2
    wh1, bh1, wh2, bh2 = params[20:24]
    sh = jnp.maximum(h @ wh1 + bh1, 0.0) @ wh2 + bh2
    return sigma, sh


if __name__ == "__main__":
    key = jax.random.PRNGKey(0)
    key, kx = jax.random.split(key)

    # N chosen so tile=512 gives 4 grid steps (>= 2 per v7x TensorCore, pipelined).
    N = 2048
    x = jax.random.normal(kx, (N, IN_CH_XYZ), jnp.float32)

    params = init_params(key)
    packed = pack_params(params)

    sigma, sh = nerf_forward(x, packed)
    sigma = jax.block_until_ready(sigma)
    sh = jax.block_until_ready(sh)

    sigma_ref, sh_ref = nerf_forward_ref(x, params)
    assert sigma.shape == (N, SIGMA_OUT) and sh.shape == (N, SH_OUT)
    # bf16 MXU inputs / bf16 output with f32 accumulation -> loosened tolerance.
    assert jnp.allclose(sigma, sigma_ref, atol=5e-2, rtol=5e-2), \
        float(jnp.max(jnp.abs(sigma - sigma_ref)))
    assert jnp.allclose(sh, sh_ref, atol=5e-2, rtol=5e-2), \
        float(jnp.max(jnp.abs(sh - sh_ref)))

    # TODO(synk): sh2rgb / sigma2weights / softplus are not part of NeRF.forward; not implemented.
    print("KERNEL_OK")
</pallas_src>

<mosaic_0001>
module attributes {stable_mosaic.version = 11 : i64} {
  func.func @nerf_kernel(%arg0: i32, %arg1: memref<512x63xf32, #tpu.memory_space<vmem>>, %arg2: memref<63x128xbf16, #tpu.memory_space<vmem>>, %arg3: memref<7x128x128xbf16, #tpu.memory_space<vmem>>, %arg4: memref<8x128xf32, #tpu.memory_space<vmem>>, %arg5: memref<128x256xbf16, #tpu.memory_space<vmem>>, %arg6: memref<1x256xf32, #tpu.memory_space<vmem>>, %arg7: memref<256x128xbf16, #tpu.memory_space<vmem>>, %arg8: memref<1x128xf32, #tpu.memory_space<vmem>>, %arg9: memref<512x128xbf16, #tpu.memory_space<vmem>>) attributes {dimension_semantics = [#tpu.dimension_semantics<parallel>], iteration_bounds = array<i64: 4>, scalar_prefetch = 0 : i64, scratch_operands = 0 : i64, tpu.core_type = #tpu.core_type<tc>, window_params = [{transform_indices = @transform_0, window_bounds = array<i64: 512, 63>}, {pipeline_mode = #tpu.pipeline_mode<synchronous>, transform_indices = @transform_1, window_bounds = array<i64: 63, 128>}, {pipeline_mode = #tpu.pipeline_mode<synchronous>, transform_indices = @transform_2, window_bounds = array<i64: 7, 128, 128>}, {pipeline_mode = #tpu.pipeline_mode<synchronous>, transform_indices = @transform_3, window_bounds = array<i64: 8, 128>}, {pipeline_mode = #tpu.pipeline_mode<synchronous>, transform_indices = @transform_4, window_bounds = array<i64: 128, 256>}, {pipeline_mode = #tpu.pipeline_mode<synchronous>, transform_indices = @transform_5, window_bounds = array<i64: 1, 256>}, {pipeline_mode = #tpu.pipeline_mode<synchronous>, transform_indices = @transform_6, window_bounds = array<i64: 256, 128>}, {pipeline_mode = #tpu.pipeline_mode<synchronous>, transform_indices = @transform_7, window_bounds = array<i64: 1, 128>}, {transform_indices = @transform_8, window_bounds = array<i64: 512, 128>}]} {
    %c0 = arith.constant 0 : index
    %c0_0 = arith.constant 0 : index
    %0 = vector.load %arg1[%c0, %c0_0] : memref<512x63xf32, #tpu.memory_space<vmem>>, vector<512x63xf32>
    %1 = arith.truncf %0 : vector<512x63xf32> to vector<512x63xbf16>
    %c0_1 = arith.constant 0 : index
    %c0_2 = arith.constant 0 : index
    %2 = vector.load %arg2[%c0_1, %c0_2] : memref<63x128xbf16, #tpu.memory_space<vmem>>, vector<63x128xbf16>
    %cst = arith.constant dense<0.000000e+00> : vector<512x128xf32>
    %3 = tpu.matmul %1, %2, %cst {dimension_numbers = #tpu.dot_dimension_numbers<[1], [0], [0], [1], [0, 0, 1, 1], [], []>} : vector<512x63xbf16>, vector<63x128xbf16>, vector<512x128xf32> -> vector<512x128xf32>
    %c0_3 = arith.constant 0 : index
    %c0_4 = arith.constant 0 : index
    %4 = vector.load %arg4[%c0_3, %c0_4] : memref<8x128xf32, #tpu.memory_space<vmem>>, vector<1x128xf32>
    %5 = vector.broadcast %4 : vector<1x128xf32> to vector<512x128xf32>
    %6 = arith.addf %3, %5 : vector<512x128xf32>
    %cst_5 = arith.constant 0.000000e+00 : f32
    %7 = vector.broadcast %cst_5 : f32 to vector<512x128xf32>
    %8 = arith.maximumf %6, %7 : vector<512x128xf32>
    %9 = arith.truncf %8 : vector<512x128xf32> to vector<512x128xbf16>
    %c0_6 = arith.constant 0 : index
    %c0_7 = arith.constant 0 : index
    %c0_8 = arith.constant 0 : index
    %10 = vector.load %arg3[%c0_6, %c0_7, %c0_8] : memref<7x128x128xbf16, #tpu.memory_space<vmem>>, vector<1x128x128xbf16>
    %11 = vector.shape_cast %10 : vector<1x128x128xbf16> to vector<128x128xbf16>
    %cst_9 = arith.constant dense<0.000000e+00> : vector<512x128xf32>
    %12 = tpu.matmul %9, %11, %cst_9 {dimension_numbers = #tpu.dot_dimension_numbers<[1], [0], [0], [1], [0, 0, 1, 1], [], []>} : vector<512x128xbf16>, vector<128x128xbf16>, vector<512x128xf32> -> vector<512x128xf32>
    %c1 = arith.constant 1 : index
    %c0_10 = arith.constant 0 : index
    %13 = vector.load %arg4[%c1, %c0_10] : memref<8x128xf32, #tpu.memory_space<vmem>>, vector<1x128xf32>
    %14 = vector.broadcast %13 : vector<1x128xf32> to vector<512x128xf32>
    %15 = arith.addf %12, %14 : vector<512x128xf32>
    %16 = arith.truncf %15 : vector<512x128xf32> to vector<512x128xbf16>
    %c1_11 = arith.constant 1 : index
    %c0_12 = arith.constant 0 : index
    %c0_13 = arith.constant 0 : index
    %17 = vector.load %arg3[%c1_11, %c0_12, %c0_13] : memref<7x128x128xbf16, #tpu.memory_space<vmem>>, vector<1x128x128xbf16>
    %18 = vector.shape_cast %17 : vector<1x128x128xbf16> to vector<128x128xbf16>
    %cst_14 = arith.constant dense<0.000000e+00> : vector<512x128xf32>
    %19 = tpu.matmul %16, %18, %cst_14 {dimension_numbers = #tpu.dot_dimension_numbers<[1], [0], [0], [1], [0, 0, 1, 1], [], []>} : vector<512x128xbf16>, vector<128x128xbf16>, vector<512x128xf32> -> vector<512x128xf32>
    %c2 = arith.constant 2 : index
    %c0_15 = arith.constant 0 : index
    %20 = vector.load %arg4[%c2, %c0_15] : memref<8x128xf32, #tpu.memory_space<vmem>>, vector<1x128xf32>
    %21 = vector.broadcast %20 : vector<1x128xf32> to vector<512x128xf32>
    %22 = arith.addf %19, %21 : vector<512x128xf32>
    %cst_16 = arith.constant 0.000000e+00 : f32
    %23 = vector.broadcast %cst_16 : f32 to vector<512x128xf32>
    %24 = arith.maximumf %22, %23 : vector<512x128xf32>
    %25 = arith.truncf %24 : vector<512x128xf32> to vector<512x128xbf16>
    %c2_17 = arith.constant 2 : index
    %c0_18 = arith.constant 0 : index
    %c0_19 = arith.constant 0 : index
    %26 = vector.load %arg3[%c2_17, %c0_18, %c0_19] : memref<7x128x128xbf16, #tpu.memory_space<vmem>>, vector<1x128x128xbf16>
    %27 = vector.shape_cast %26 : vector<1x128x128xbf16> to vector<128x128xbf16>
    %cst_20 = arith.constant dense<0.000000e+00> : vector<512x128xf32>
    %28 = tpu.matmul %25, %27, %cst_20 {dimension_numbers = #tpu.dot_dimension_numbers<[1], [0], [0], [1], [0, 0, 1, 1], [], []>} : vector<512x128xbf16>, vector<128x128xbf16>, vector<512x128xf32> -> vector<512x128xf32>
    %c3 = arith.constant 3 : index
    %c0_21 = arith.constant 0 : index
    %29 = vector.load %arg4[%c3, %c0_21] : memref<8x128xf32, #tpu.memory_space<vmem>>, vector<1x128xf32>
    %30 = vector.broadcast %29 : vector<1x128xf32> to vector<512x128xf32>
    %31 = arith.addf %28, %30 : vector<512x128xf32>
    %32 = arith.truncf %31 : vector<512x128xf32> to vector<512x128xbf16>
    %c3_22 = arith.constant 3 : index
    %c0_23 = arith.constant 0 : index
    %c0_24 = arith.constant 0 : index
    %33 = vector.load %arg3[%c3_22, %c0_23, %c0_24] : memref<7x128x128xbf16, #tpu.memory_space<vmem>>, vector<1x128x128xbf16>
    %34 = vector.shape_cast %33 : vector<1x128x128xbf16> to vector<128x128xbf16>
    %cst_25 = arith.constant dense<0.000000e+00> : vector<512x128xf32>
    %35 = tpu.matmul %32, %34, %cst_25 {dimension_numbers = #tpu.dot_dimension_numbers<[1], [0], [0], [1], [0, 0, 1, 1], [], []>} : vector<512x128xbf16>, vector<128x128xbf16>, vector<512x128xf32> -> vector<512x128xf32>
    %c4 = arith.constant 4 : index
    %c0_26 = arith.constant 0 : index
    %36 = vector.load %arg4[%c4, %c0_26] : memref<8x128xf32, #tpu.memory_space<vmem>>, vector<1x128xf32>
    %37 = vector.broadcast %36 : vector<1x128xf32> to vector<512x128xf32>
    %38 = arith.addf %35, %37 : vector<512x128xf32>
    %cst_27 = arith.constant 0.000000e+00 : f32
    %39 = vector.broadcast %cst_27 : f32 to vector<512x128xf32>
    %40 = arith.maximumf %38, %39 : vector<512x128xf32>
    %41 = arith.truncf %40 : vector<512x128xf32> to vector<512x128xbf16>
    %c4_28 = arith.constant 4 : index
    %c0_29 = arith.constant 0 : index
    %c0_30 = arith.constant 0 : index
    %42 = vector.load %arg3[%c4_28, %c0_29, %c0_30] : memref<7x128x128xbf16, #tpu.memory_space<vmem>>, vector<1x128x128xbf16>
    %43 = vector.shape_cast %42 : vector<1x128x128xbf16> to vector<128x128xbf16>
    %cst_31 = arith.constant dense<0.000000e+00> : vector<512x128xf32>
    %44 = tpu.matmul %41, %43, %cst_31 {dimension_numbers = #tpu.dot_dimension_numbers<[1], [0], [0], [1], [0, 0, 1, 1], [], []>} : vector<512x128xbf16>, vector<128x128xbf16>, vector<512x128xf32> -> vector<512x128xf32>
    %c5 = arith.constant 5 : index
    %c0_32 = arith.constant 0 : index
    %45 = vector.load %arg4[%c5, %c0_32] : memref<8x128xf32, #tpu.memory_space<vmem>>, vector<1x128xf32>
    %46 = vector.broadcast %45 : vector<1x128xf32> to vector<512x128xf32>
    %47 = arith.addf %44, %46 : vector<512x128xf32>
    %48 = arith.truncf %47 : vector<512x128xf32> to vector<512x128xbf16>
    %c5_33 = arith.constant 5 : index
    %c0_34 = arith.constant 0 : index
    %c0_35 = arith.constant 0 : index
    %49 = vector.load %arg3[%c5_33, %c0_34, %c0_35] : memref<7x128x128xbf16, #tpu.memory_space<vmem>>, vector<1x128x128xbf16>
    %50 = vector.shape_cast %49 : vector<1x128x128xbf16> to vector<128x128xbf16>
    %cst_36 = arith.constant dense<0.000000e+00> : vector<512x128xf32>
    %51 = tpu.matmul %48, %50, %cst_36 {dimension_numbers = #tpu.dot_dimension_numbers<[1], [0], [0], [1], [0, 0, 1, 1], [], []>} : vector<512x128xbf16>, vector<128x128xbf16>, vector<512x128xf32> -> vector<512x128xf32>
    %c6 = arith.constant 6 : index
    %c0_37 = arith.constant 0 : index
    %52 = vector.load %arg4[%c6, %c0_37] : memref<8x128xf32, #tpu.memory_space<vmem>>, vector<1x128xf32>
    %53 = vector.broadcast %52 : vector<1x128xf32> to vector<512x128xf32>
    %54 = arith.addf %51, %53 : vector<512x128xf32>
    %cst_38 = arith.constant 0.000000e+00 : f32
    %55 = vector.broadcast %cst_38 : f32 to vector<512x128xf32>
    %56 = arith.maximumf %54, %55 : vector<512x128xf32>
    %57 = arith.truncf %56 : vector<512x128xf32> to vector<512x128xbf16>
    %c6_39 = arith.constant 6 : index
    %c0_40 = arith.constant 0 : index
    %c0_41 = arith.constant 0 : index
    %58 = vector.load %arg3[%c6_39, %c0_40, %c0_41] : memref<7x128x128xbf16, #tpu.memory_space<vmem>>, vector<1x128x128xbf16>
    %59 = vector.shape_cast %58 : vector<1x128x128xbf16> to vector<128x128xbf16>
    %cst_42 = arith.constant dense<0.000000e+00> : vector<512x128xf32>
    %60 = tpu.matmul %57, %59, %cst_42 {dimension_numbers = #tpu.dot_dimension_numbers<[1], [0], [0], [1], [0, 0, 1, 1], [], []>} : vector<512x128xbf16>, vector<128x128xbf16>, vector<512x128xf32> -> vector<512x128xf32>
    %c7 = arith.constant 7 : index
    %c0_43 = arith.constant 0 : index
    %61 = vector.load %arg4[%c7, %c0_43] : memref<8x128xf32, #tpu.memory_space<vmem>>, vector<1x128xf32>
    %62 = vector.broadcast %61 : vector<1x128xf32> to vector<512x128xf32>
    %63 = arith.addf %60, %62 : vector<512x128xf32>
    %64 = arith.truncf %63 : vector<512x128xf32> to vector<512x128xbf16>
    %c0_44 = arith.constant 0 : index
    %c0_45 = arith.constant 0 : index
    %65 = vector.load %arg5[%c0_44, %c0_45] : memref<128x256xbf16, #tpu.memory_space<vmem>>, vector<128x256xbf16>
    %cst_46 = arith.constant dense<0.000000e+00> : vector<512x256xf32>
    %66 = tpu.matmul %64, %65, %cst_46 {dimension_numbers = #tpu.dot_dimension_numbers<[1], [0], [0], [1], [0, 0, 1, 1], [], []>} : vector<512x128xbf16>, vector<128x256xbf16>, vector<512x256xf32> -> vector<512x256xf32>
    %c0_47 = arith.constant 0 : index
    %c0_48 = arith.constant 0 : index
    %67 = vector.load %arg6[%c0_47, %c0_48] : memref<1x256xf32, #tpu.memory_space<vmem>>, vector<1x256xf32>
    %68 = vector.broadcast %67 : vector<1x256xf32> to vector<512x256xf32>
    %69 = arith.addf %66, %68 : vector<512x256xf32>
    %cst_49 = arith.constant 0.000000e+00 : f32
    %70 = vector.broadcast %cst_49 : f32 to vector<512x256xf32>
    %71 = arith.maximumf %69, %70 : vector<512x256xf32>
    %72 = arith.truncf %71 : vector<512x256xf32> to vector<512x256xbf16>
    %c0_50 = arith.constant 0 : index
    %c0_51 = arith.constant 0 : index
    %73 = vector.load %arg7[%c0_50, %c0_51] : memref<256x128xbf16, #tpu.memory_space<vmem>>, vector<256x128xbf16>
    %cst_52 = arith.constant dense<0.000000e+00> : vector<512x128xf32>
    %74 = tpu.matmul %72, %73, %cst_52 {dimension_numbers = #tpu.dot_dimension_numbers<[1], [0], [0], [1], [0, 0, 1, 1], [], []>} : vector<512x256xbf16>, vector<256x128xbf16>, vector<512x128xf32> -> vector<512x128xf32>
    %c0_53 = arith.constant 0 : index
    %c0_54 = arith.constant 0 : index
    %75 = vector.load %arg8[%c0_53, %c0_54] : memref<1x128xf32, #tpu.memory_space<vmem>>, vector<1x128xf32>
    %76 = vector.broadcast %75 : vector<1x128xf32> to vector<512x128xf32>
    %77 = arith.addf %74, %76 : vector<512x128xf32>
    %78 = arith.truncf %77 : vector<512x128xf32> to vector<512x128xbf16>
    %c0_55 = arith.constant 0 : index
    %c0_56 = arith.constant 0 : index
    %79 = vector.load %arg9[%c0_55, %c0_56] : memref<512x128xbf16, #tpu.memory_space<vmem>>, vector<512x128xbf16>
    tpu.vector_store %arg9[%c0_55, %c0_56], %78 {strides = array<i32>} : memref<512x128xbf16, #tpu.memory_space<vmem>>, vector<512x128xbf16>,
    return
  }
  func.func @transform_0(%arg0: i32) -> (i32, i32) {
    %c0_i32 = arith.constant 0 : i32
    %c0_i32_0 = arith.constant 0 : i32
    return %arg0, %c0_i32 : i32, i32
  }
  func.func @transform_1(%arg0: i32) -> (i32, i32) {
    %c0_i32 = arith.constant 0 : i32
    %c0_i32_0 = arith.constant 0 : i32
    %c0_i32_1 = arith.constant 0 : i32
    return %c0_i32, %c0_i32_0 : i32, i32
  }
  func.func @transform_2(%arg0: i32) -> (i32, i32, i32) {
    %c0_i32 = arith.constant 0 : i32
    %c0_i32_0 = arith.constant 0 : i32
    %c0_i32_1 = arith.constant 0 : i32
    %c0_i32_2 = arith.constant 0 : i32
    return %c0_i32, %c0_i32_0, %c0_i32_1 : i32, i32, i32
  }
  func.func @transform_3(%arg0: i32) -> (i32, i32) {
    %c0_i32 = arith.constant 0 : i32
    %c0_i32_0 = arith.constant 0 : i32
    %c0_i32_1 = arith.constant 0 : i32
    return %c0_i32, %c0_i32_0 : i32, i32
  }
  func.func @transform_4(%arg0: i32) -> (i32, i32) {
    %c0_i32 = arith.constant 0 : i32
    %c0_i32_0 = arith.constant 0 : i32
    %c0_i32_1 = arith.constant 0 : i32
    return %c0_i32, %c0_i32_0 : i32, i32
  }
  func.func @transform_5(%arg0: i32) -> (i32, i32) {
    %c0_i32 = arith.constant 0 : i32
    %c0_i32_0 = arith.constant 0 : i32
    %c0_i32_1 = arith.constant 0 : i32
    return %c0_i32, %c0_i32_0 : i32, i32
  }
  func.func @transform_6(%arg0: i32) -> (i32, i32) {
    %c0_i32 = arith.constant 0 : i32
    %c0_i32_0 = arith.constant 0 : i32
    %c0_i32_1 = arith.constant 0 : i32
    return %c0_i32, %c0_i32_0 : i32, i32
  }
  func.func @transform_7(%arg0: i32) -> (i32, i32) {
    %c0_i32 = arith.constant 0 : i32
    %c0_i32_0 = arith.constant 0 : i32
    %c0_i32_1 = arith.constant 0 : i32
    return %c0_i32, %c0_i32_0 : i32, i32
  }
  func.func @transform_8(%arg0: i32) -> (i32, i32) {
    %c0_i32 = arith.constant 0 : i32
    %c0_i32_0 = arith.constant 0 : i32
    return %arg0, %c0_i32 : i32, i32
  }
}

</mosaic_0001>

<bundles_post_ra>
// kernel: tpu_custom_call.1
= control target key start
LH: loop header
LB: loop body
LE: loop exit
PB: predicated region body
PF: predicated region fallthrough
CT: control target
= control target key end

     0   :  { %13 = vsyncpa [#allocation3], 0  ;;  %s8688_s0 = inlined_call_operand.vmem [shape: f32[2048,63], index: 0, kind: input, shape index: {}]   ;;  %s8689_s1 = inlined_call_operand.vmem [shape: bf16[63,128], index: 1, kind: input, shape index: {}]   ;;  %s8690_s2 = inlined_call_operand.vmem [shape: bf16[7,128,128], index: 2, kind: input, shape index: {}]   ;;  %s8691_s3 = inlined_call_operand.vmem [shape: f32[8,128], index: 3, kind: input, shape index: {}]   ;;  %s8692_s4 = inlined_call_operand.vmem [shape: bf16[128,256], index: 4, kind: input, shape index: {}]   ;;  %s8693_s5 = inlined_call_operand.vmem [shape: f32[1,256], index: 5, kind: input, shape index: {}]   ;;  %s8694_s6 = inlined_call_operand.vmem [shape: bf16[256,128], index: 6, kind: input, shape index: {}]   ;;  %s8695_s7 = inlined_call_operand.vmem [shape: f32[1,128], index: 7, kind: input, shape index: {}]   ;;  %s8696_s8 = inlined_call_operand.hbm [shape: bf16[2048,128], index: 8, kind: output, shape index: {}]  }
   0x1   :  { %15 = vsyncpa [#allocation3 + $0x1], 0  ;;  %s7128_s27 = smov 0   ;;  %s7130_s28 = smov 0  }
   0x2   :  { %s7132_s29 = smov 0   ;;  %s7134_s30 = smov 0  }
   0x3 LB: > { %s7149_s9 = sadd.s32 4294967295, %s7076_s30   ;;  %s5330_s10 = sadd.s32 4294967294, %s7076_s30   ;;  %s7076_s30 = sphi %s7134_s30, %s8702_s30   ;;  %s7072_s29 = sphi %s7132_s29, %s8701_s29   ;;  %s7068_s28 = sphi %s7130_s28, %s8700_s28   ;;  %s7064_s27 = sphi %s7128_s27, %s8699_s27  }
   0x4   : > { %s7153_s11 = sadd.s32 1, %s7076_s30   ;;  %s201_s12 = sadd.s32 1, %s7072_s29 }
   0x5   : > { %s198_s13 = ssub.s32 %s7076_s30, %s7153_s11  ;;  %p211_p0 = scmp.ne.s32.totalorder %s7072_s29, %s7068_s28 }
   0x6   : > { %p199_p1 = scmp.eq.s32.totalorder %s198_s13, 0  ;;  %p212_p2 = scmp.eq.s32.totalorder %s7149_s9, 3 }
   0x7   : > { %p217_p3 = scmp.ne.s32.totalorder %s7068_s28, %s7064_s27  ;;  %p218_p4 = scmp.eq.s32.totalorder %s5330_s10, 3 }
   0x8   : > { %s7164_s14 = scalar_select %p199_p1, %s7072_s29, %s201_s12  }
   0x9   : > { %p7166_p5 = por %p212_p2, %p211_p0  ;;  %p7170_p6 = por %p218_p4, %p217_p3 }
   0xa   : > { %p5333_p7 = scmp.ge.s32.totalorder %s7076_s30, 1  ;;  %p266_p8 = scmp.lt.s32.totalorder %s7076_s30, 5 }
   0xc   : > { %p267_p9 = pnand %p5333_p7, %p266_p8 }
   0xd   : > { %v6914_v0 = vld [vmem:[%s8689_s1] sm:$0xff] (!%p267_p9)   ;;  %vm537_vm0 = vcmask (!%p267_p9), 1046528   ;;  %v6915_v1 = vld [vmem:[%s8689_s1 + $0x8] sm:$0xff] (!%p267_p9)   ;;  %vm538_vm1 = vcmask (!%p267_p9), 1047552   ;;  %v6916_v2 = vld [vmem:[%s8689_s1 + $0x10] sm:$0xff] (!%p267_p9)   ;;  %v7078_v3 = vmov (!%p267_p9), 65535  }
   0xe   : > { %270 = sbr.rel (%p267_p9) target bundleno = 2500 (0x9c4), region = 52  ;;  %6207 = vmatprep.subr.bf16.mxu0 (!%p267_p9), %v6914_v0  ;;  %v539_v4 = vsel (!%p267_p9), %vm537_vm0, 4294967295, %v7078_v3  ;;  %v6917_v5 = vld [vmem:[%s8689_s1 + $0x18] sm:$0xff] (!%p267_p9)   ;;  %s5335_s25 = sshll.u32 (!%p267_p9), %s7149_s9, 6  ;;  %v6918_v7 = vld [vmem:[%s8690_s2] sm:$0xff] (!%p267_p9)   ;;  %v6919_v8 = vld [vmem:[%s8690_s2 + $0x8] sm:$0xff] (!%p267_p9)  }
   0xf   : > { %6208 = vmatpush3.bf16.msra.mxu0 (!%p267_p9), %v6914_v0  ;;  %v540_v6 = vsel (!%p267_p9), %vm538_vm1, %v539_v4, 0  ;;  %p301_p10 = scmp.lt.s32.totalorder (!%p267_p9), %s5335_s25, 255  ;;  %6279 = vmatprep.subr.bf16.mxu1 (!%p267_p9), %v6918_v7  ;;  %v6920_v10 = vld [vmem:[%s8690_s2 + $0x10] sm:$0xff] (!%p267_p9)   ;;  %v6921_v11 = vld [vmem:[%s8690_s2 + $0x18] sm:$0xff] (!%p267_p9)   ;;  %vm440_vm2 = vcmask (!%p267_p9), 515072   ;;  %v6922_v21 = vld [vmem:[%s8690_s2 + $0x20] sm:$0xff] (!%p267_p9)  }
  0x10   : > { %6209 = vmatprep.subr.bf16.mxu0 (!%p267_p9), %v6915_v1  ;;  %6280 = vmatpush3.bf16.msra.mxu1 (!%p267_p9), %v6918_v7  ;;  %v542_v9 = vand.u32 (!%p267_p9), %v6917_v5, %v540_v6  ;;  %v6923_v26 = vld [vmem:[%s8690_s2 + $0x28] sm:$0xff] (!%p267_p9)   ;;  %s297_s13 = sand.u32 (!%p267_p9), 1, %s7068_s28   ;;  %s5699_s21 = sshll.u32 (!%p267_p9), %s7149_s9, 12 }
  0x11   : > { %6281 = vmatprep.subr.bf16.mxu1 (!%p267_p9), %v6919_v8  ;;  %s8640_s26 = scalar_lea.hbm (!%p267_p9), %s8696_s8, %s5699_s21  ;;  %s8647_s9 = scalar_lea.sflag (!%p267_p9), [#allocation3], %s297_s13 }
  0x12   : > { %s7080_s10 = smov (!%p267_p9), [#allocation2]  }
  0x13   : > { %6210 = vmatpush3.bf16.msra.mxu0 (!%p267_p9), %v6915_v1  ;;  %s7018_s12 = sshll.u32 (!%p267_p9), %s7080_s10, 4  ;;  %s7019_s12 = int_to_ptr.vmem [resolvable:$false] %s7018_s12 }
  0x14   : > { %6211 = vmatprep.subr.bf16.mxu0 (!%p267_p9), %v6916_v2  ;;  %6282 = vmatpush3.bf16.msra.mxu1 (!%p267_p9), %v6919_v8  ;;  %s7020_s17 = scalar_lea.vmem (!%p267_p9), %s7019_s12, 8192 }
  0x15   : > { %s8704_s25 = smov (!%p301_p10, %s5335_s25), 255  ;;  %6283 = vmatprep.subr.bf16.mxu1 %v6920_v10 }
  0x16   : > { %s5336_s19 = sshll.u32 %s8704_s25, 3 }
  0x17   : > { %s7201_s22 = scalar_lea.vmem %s8688_s0, %s5336_s19  ;;  %6212 = vmatpush3.bf16.msra.mxu0 %v6916_v2  ;;  %s5334_s19 = sshll.u32 %s297_s13, 8 }
  0x18   : > { %v308_v12 = vld [vmem:[%s7201_s22] sm:$0xff]  ;;  %v309_v13 = vld [vmem:[%s7201_s22 + $0x8] sm:$0xff]  ;;  %v310_v14 = vld [vmem:[%s7201_s22 + $0x10] sm:$0xff]  ;;  %6213 = vmatprep.subr.bf16.mxu0 %v542_v9  ;;  %6284 = vmatpush3.bf16.msra.mxu1 %v6920_v10  ;;  %s8532_s20 = scalar_lea.vmem [#allocation2], %s5334_s19 }
  0x19   : > { %v372_v15 = vpack.c.bf16 %v309_v13, %v308_v12  ;;  %v311_v16 = vld [vmem:[%s7201_s22 + $0x18] sm:$0xff]  ;;  %v312_v17 = vld [vmem:[%s7201_s22 + $0x20] sm:$0xff]  ;;  %v313_v18 = vld [vmem:[%s7201_s22 + $0x28] sm:$0xff]  ;;  %6285 = vmatprep.subr.bf16.mxu1 %v6921_v11  ;;  %s5268_s23 = sshll.u32 %s8532_s20, 4  ;;  %s8642_s23 = int_to_ptr.vmem [resolvable:$true] %s5268_s23 }
  0x1a   : > { %v373_v19 = vpack.c.bf16 %v311_v16, %v310_v14  ;;  %v374_v20 = vpack.c.bf16 %v313_v18, %v312_v17  ;;  %v314_v22 = vld [vmem:[%s7201_s22 + $0x30] sm:$0xff]  ;;  %v315_v23 = vld [vmem:[%s7201_s22 + $0x38] sm:$0xff]  ;;  %v316_v24 = vld [vmem:[%s7201_s22 + $0x40] sm:$0xff]  ;;  %p7021_p0 = scmp.lt.s32.totalorder %s8642_s23, %s7019_s12 }
  0x1b   : > { %6215 = vmatprep.mubr.msk.bf16.mxu0 %vm440_vm2, %v372_v15  ;;  %6214 = vmatpush3.bf16.msra.mxu0 %v542_v9  ;;  %v317_v25 = vld [vmem:[%s7201_s22 + $0x48] sm:$0xff]  ;;  %v375_v27 = vpack.c.bf16 %v315_v23, %v314_v22  ;;  %v318_v29 = vld [vmem:[%s7201_s22 + $0x50] sm:$0xff]  ;;  %v319_v30 = vld [vmem:[%s7201_s22 + $0x58] sm:$0xff] }
  0x1c   : > { %6286 = vmatpush3.bf16.msra.mxu1 %v6921_v11  ;;  %v376_v28 = vpack.c.bf16 %v317_v25, %v316_v24  ;;  %v320_v31 = vld [vmem:[%s7201_s22 + $0x60] sm:$0xff]  ;;  %v321_v32 = vld [vmem:[%s7201_s22 + $0x68] sm:$0xff]  ;;  %v377_v33 = vpack.c.bf16 %v319_v30, %v318_v29  ;;  %v322_v35 = vld [vmem:[%s7201_s22 + $0x70] sm:$0xff] }
  0x1d   : > { %6287 = vmatprep.subr.bf16.mxu1 %v6922_v21  ;;  %v378_v34 = vpack.c.bf16 %v321_v32, %v320_v31  ;;  %v323_v36 = vld [vmem:[%s7201_s22 + $0x78] sm:$0xff]  ;;  %v324_v37 = vld [vmem:[%s7201_s22 + $0x80] sm:$0xff]  ;;  %v325_v38 = vld [vmem:[%s7201_s22 + $0x88] sm:$0xff] }
  0x1e   : > { %6216 = vmatmul.mubr.msk.bf16.vlgmr.msra.gmra.mrb[0].mxu0 %vm440_vm2, %v373_v19  ;;  %v379_v39 = vpack.c.bf16 %v323_v36, %v322_v35  ;;  %v380_v40 = vpack.c.bf16 %v325_v38, %v324_v37  ;;  %v326_v41 = vld [vmem:[%s7201_s22 + $0x90] sm:$0xff]  ;;  %v327_v42 = vld [vmem:[%s7201_s22 + $0x98] sm:$0xff]  ;;  %v328_v43 = vld [vmem:[%s7201_s22 + $0xa0] sm:$0xff] }
  0x1f   : > { %6219 = vmatprep.mubr.msk.bf16.mxu0 %vm440_vm2, %v374_v20  ;;  %v329_v44 = vld [vmem:[%s7201_s22 + $0xa8] sm:$0xff]  ;;  %v381_v45 = vpack.c.bf16 %v327_v42, %v326_v41  ;;  %v330_v47 = vld [vmem:[%s7201_s22 + $0xb0] sm:$0xff]  ;;  %v331_v48 = vld [vmem:[%s7201_s22 + $0xb8] sm:$0xff] }
  0x20   : > { %6288 = vmatpush3.bf16.msra.mxu1 %v6922_v21  ;;  %v382_v46 = vpack.c.bf16 %v329_v44, %v328_v43  ;;  %v332_v49 = vld [vmem:[%s7201_s22 + $0xc0] sm:$0xff]  ;;  %v333_v50 = vld [vmem:[%s7201_s22 + $0xc8] sm:$0xff]  ;;  %v383_v51 = vpack.c.bf16 %v331_v48, %v330_v47  ;;  %v334_v53 = vld [vmem:[%s7201_s22 + $0xd0] sm:$0xff] }
  0x21   : > { %6289 = vmatprep.subr.bf16.mxu1 %v6923_v26  ;;  %v384_v52 = vpack.c.bf16 %v333_v50, %v332_v49  ;;  %v335_v54 = vld [vmem:[%s7201_s22 + $0xd8] sm:$0xff]  ;;  %v336_v55 = vld [vmem:[%s7201_s22 + $0xe0] sm:$0xff]  ;;  %v337_v56 = vld [vmem:[%s7201_s22 + $0xe8] sm:$0xff] }
  0x22   : > { %v385_v57 = vpack.c.bf16 %v335_v54, %v334_v53  ;;  %v386_v58 = vpack.c.bf16 %v337_v56, %v336_v55  ;;  %v338_v59 = vld [vmem:[%s7201_s22 + $0xf0] sm:$0xff]  ;;  %v339_v60 = vld [vmem:[%s7201_s22 + $0xf8] sm:$0xff]  ;;  %v340_v61 = vld [vmem:[%s7201_s22 + $0x100] sm:$0xff] }
  0x23   : > { %v341_v62 = vld [vmem:[%s7201_s22 + $0x108] sm:$0xff]  ;;  %v387_v63 = vpack.c.bf16 %v339_v60, %v338_v59  ;;  %v342_v1 = vld [vmem:[%s7201_s22 + $0x110] sm:$0xff]  ;;  %v343_v2 = vld [vmem:[%s7201_s22 + $0x118] sm:$0xff] }
  0x24   : > { %6290 = vmatpush3.bf16.msra.mxu1 %v6923_v26  ;;  %v388_v0 = vpack.c.bf16 %v341_v62, %v340_v61  ;;  %v344_v3 = vld [vmem:[%s7201_s22 + $0x120] sm:$0xff]  ;;  %v345_v4 = vld [vmem:[%s7201_s22 + $0x128] sm:$0xff]  ;;  %v389_v5 = vpack.c.bf16 %v343_v2, %v342_v1  ;;  %v346_v7 = vld [vmem:[%s7201_s22 + $0x130] sm:$0xff] }
  0x25   : > { %v390_v6 = vpack.c.bf16 %v345_v4, %v344_v3  ;;  %v347_v8 = vld [vmem:[%s7201_s22 + $0x138] sm:$0xff]  ;;  %v348_v9 = vld [vmem:[%s7201_s22 + $0x140] sm:$0xff]  ;;  %v349_v10 = vld [vmem:[%s7201_s22 + $0x148] sm:$0xff] }
  0x26   : > { %6220 = vmatmul.mubr.msk.bf16.gmra.mrb[4].mxu0 %vm440_vm2, %v375_v27  ;;  %v391_v11 = vpack.c.bf16 %v347_v8, %v346_v7  ;;  %v392_v12 = vpack.c.bf16 %v349_v10, %v348_v9  ;;  %v350_v13 = vld [vmem:[%s7201_s22 + $0x150] sm:$0xff]  ;;  %v351_v14 = vld [vmem:[%s7201_s22 + $0x158] sm:$0xff]  ;;  %v352_v15 = vld [vmem:[%s7201_s22 + $0x160] sm:$0xff] }
  0x27   : > { %6223 = vmatprep.mubr.msk.bf16.mxu0 %vm440_vm2, %v376_v28  ;;  %v353_v16 = vld [vmem:[%s7201_s22 + $0x168] sm:$0xff]  ;;  %v393_v17 = vpack.c.bf16 %v351_v14, %v350_v13  ;;  %v354_v19 = vld [vmem:[%s7201_s22 + $0x170] sm:$0xff]  ;;  %v355_v20 = vld [vmem:[%s7201_s22 + $0x178] sm:$0xff] }
  0x28   : > { %v394_v18 = vpack.c.bf16 %v353_v16, %v352_v15  ;;  %v356_v21 = vld [vmem:[%s7201_s22 + $0x180] sm:$0xff]  ;;  %v357_v22 = vld [vmem:[%s7201_s22 + $0x188] sm:$0xff]  ;;  %v395_v23 = vpack.c.bf16 %v355_v20, %v354_v19  ;;  %v6924_v24 = vld [vmem:[%s8690_s2 + $0x30] sm:$0xff]  }
  0x29   : > { %v396_v25 = vpack.c.bf16 %v357_v22, %v356_v21  ;;  %6291 = vmatprep.subr.bf16.mxu1 %v6924_v24  ;;  %v6925_v26 = vld [vmem:[%s8690_s2 + $0x38] sm:$0xff]   ;;  %v358_v27 = vld [vmem:[%s7201_s22 + $0x190] sm:$0xff]  ;;  %v360_v29 = vld [vmem:[%s7201_s22 + $0x1a0] sm:$0xff] }
  0x2a   : > { %6292 = vmatpush3.bf16.msra.mxu1 %v6924_v24  ;;  %v359_v28 = vld [vmem:[%s7201_s22 + $0x198] sm:$0xff]  ;;  %v361_v30 = vld [vmem:[%s7201_s22 + $0x1a8] sm:$0xff]  ;;  %v364_v35 = vld [vmem:[%s7201_s22 + $0x1c0] sm:$0xff] }
  0x2b   : > { %6293 = vmatprep.subr.bf16.mxu1 %v6925_v26  ;;  %v397_v31 = vpack.c.bf16 %v359_v28, %v358_v27  ;;  %v398_v32 = vpack.c.bf16 %v361_v30, %v360_v29  ;;  %v365_v36 = vld [vmem:[%s7201_s22 + $0x1c8] sm:$0xff]  ;;  %v368_v41 = vld [vmem:[%s7201_s22 + $0x1e0] sm:$0xff]  ;;  %v6928_v50 = vld [vmem:[%s8690_s2 + $0x50] sm:$0xff]  }
  0x2c   : > { %v400_v38 = vpack.c.bf16 %v365_v36, %v364_v35  ;;  %v369_v42 = vld [vmem:[%s7201_s22 + $0x1e8] sm:$0xff]  ;;  %v6926_v48 = vld [vmem:[%s8690_s2 + $0x40] sm:$0xff]   ;;  %v6932_v54 = vld [vmem:[%s8690_s2 + $0x70] sm:$0xff]  }
  0x2d   : > { %v402_v44 = vpack.c.bf16 %v369_v42, %v368_v41  ;;  %6359 = vmatprep.subr.bf16.mxu0 %v6926_v48  ;;  %v6927_v49 = vld [vmem:[%s8690_s2 + $0x48] sm:$0xff]   ;;  %v7338_v55 = vld [vmem:[%s8691_s3] ss:$0 sm:$0xff]  ;;  %v6933_v56 = vld [vmem:[%s8690_s2 + $0x78] sm:$0xff]  }
  0x2e   : > { %6224 = vmatmul.mubr.msk.bf16.gmra.mrb[8].mxu0 %vm440_vm2, %v377_v33  ;;  %6294 = vmatpush3.bf16.msra.mxu1 %v6925_v26  ;;  %v362_v33 = vld [vmem:[%s7201_s22 + $0x1b0] sm:$0xff]  ;;  %v6931_v53 = vld [vmem:[%s8690_s2 + $0x68] sm:$0xff]  }
  0x2f   : > { %6227 = vmatprep.mubr.msk.bf16.mxu0 %vm440_vm2, %v378_v34  ;;  %v363_v34 = vld [vmem:[%s7201_s22 + $0x1b8] sm:$0xff]  ;;  %6360 = vmatpush3.bf16.msra.mxu0 %v6926_v48 }
  0x30   : > { %v399_v37 = vpack.c.bf16 %v363_v34, %v362_v33  ;;  %6361 = vmatprep.subr.bf16.mxu0 %v6927_v49 }
  0x33   : > { %6362 = vmatpush3.bf16.msra.mxu0 %v6927_v49 }
  0x34   : > { %6363 = vmatprep.subr.bf16.mxu0 %v6928_v50 }
  0x36   : > { %6228 = vmatmul.mubr.msk.bf16.gmra.mrb[12].mxu0 %vm440_vm2, %v379_v39  ;;  %v366_v39 = vld [vmem:[%s7201_s22 + $0x1d0] sm:$0xff] }
  0x37   : > { %6231 = vmatprep.mubr.msk.bf16.mxu0 %vm440_vm2, %v380_v40  ;;  %v367_v40 = vld [vmem:[%s7201_s22 + $0x1d8] sm:$0xff]  ;;  %6364 = vmatpush3.bf16.msra.mxu0 %v6928_v50 }
  0x38   : > { %v401_v43 = vpack.c.bf16 %v367_v40, %v366_v39 }
  0x3e   : > { %6232 = vmatmul.mubr.msk.bf16.gmra.mrb[16].mxu0 %vm440_vm2, %v381_v45  ;;  %v370_v45 = vld [vmem:[%s7201_s22 + $0x1f0] sm:$0xff] }
  0x3f   : > { %6235 = vmatprep.mubr.msk.bf16.mxu0 %vm440_vm2, %v382_v46  ;;  %v371_v46 = vld [vmem:[%s7201_s22 + $0x1f8] sm:$0xff]  ;;  %s7014_s22 = scalar_lea.vmem %s8642_s23, 4096 }
  0x40   : > { %v403_v47 = vpack.c.bf16 %v371_v46, %v370_v45  ;;  %p7015_p11 = scmp.ne.s32.totalorder %s8642_s23, %s7014_s22  ;;  %p7022_p1 = scmp.lt.s32.totalorder %s7020_s17, %s7014_s22 }
  0x42   : > { %p7016_p12 = pnand %p7015_p11, %p7166_p5  ;;  %p7023_p2 = por %p7022_p1, %p7021_p0 }
  0x44   : > { %p7017_p13 = pneg %p7016_p12 }
  0x46   : > { %6236 = vmatmul.mubr.msk.bf16.gmra.mrb[20].mxu0 %vm440_vm2, %v383_v51  ;;  %v6929_v51 = vld [vmem:[%s8690_s2 + $0x58] sm:$0xff]   ;;  %p7024_p3 = pnand %p7023_p2, %p7017_p13 }
  0x47   : > { %6239 = vmatprep.mubr.msk.bf16.mxu0 %vm440_vm2, %v384_v52  ;;  %6365 = vmatprep.subr.bf16.mxu0 %v6929_v51  ;;  %v6930_v52 = vld [vmem:[%s8690_s2 + $0x60] sm:$0xff]  }
  0x48   : > { %6366 = vmatpush3.bf16.msra.mxu0 %v6929_v51 }
  0x49   : > { %6367 = vmatprep.subr.bf16.mxu0 %v6930_v52 }
  0x4c   : > { %6368 = vmatpush3.bf16.msra.mxu0 %v6930_v52 }
  0x4d   : > { %6369 = vmatprep.subr.bf16.mxu0 %v6931_v53 }
  0x4e   : > { %6240 = vmatmul.mubr.msk.bf16.gmra.mrb[24].mxu0 %vm440_vm2, %v385_v57 }
  0x4f   : > { %6243 = vmatprep.mubr.msk.bf16.mxu0 %vm440_vm2, %v386_v58 }
  0x50   : > { %6370 = vmatpush3.bf16.msra.mxu0 %v6931_v53 }
  0x51   : > { %6371 = vmatprep.subr.bf16.mxu0 %v6932_v54 }
  0x54   : > { %6372 = vmatpush3.bf16.msra.mxu0 %v6932_v54 }
  0x55   : > { %6373 = vmatprep.subr.bf16.mxu0 %v6933_v56 }
  0x56   : > { %6244 = vmatmul.mubr.msk.bf16.gmra.mrb[28].mxu0 %vm440_vm2, %v387_v63 }
  0x57   : > { %6247 = vmatprep.mubr.msk.bf16.mxu0 %vm440_vm2, %v388_v0 }
  0x58   : > { %6374 = vmatpush3.bf16.msra.mxu0 %v6933_v56 }
  0x5e   : > { %6248 = vmatmul.mubr.msk.bf16.gmra.mrb[32].mxu0 %vm440_vm2, %v389_v5 }
  0x5f   : > { %6251 = vmatprep.mubr.msk.bf16.mxu0 %vm440_vm2, %v390_v6 }
  0x66   : > { %6252 = vmatmul.mubr.msk.bf16.gmra.mrb[36].mxu0 %vm440_vm2, %v391_v11 }
  0x67   : > { %6255 = vmatprep.mubr.msk.bf16.mxu0 %vm440_vm2, %v392_v12 }
  0x6e   : > { %6256 = vmatmul.mubr.msk.bf16.gmra.mrb[40].mxu0 %vm440_vm2, %v393_v17 }
  0x6f   : > { %6259 = vmatprep.mubr.msk.bf16.mxu0 %vm440_vm2, %v394_v18 }
  0x76   : > { %6260 = vmatmul.mubr.msk.bf16.gmra.mrb[44].mxu0 %vm440_vm2, %v395_v23 }
  0x77   : > { %6263 = vmatprep.mubr.msk.bf16.mxu0 %vm440_vm2, %v396_v25 }
  0x7e   : > { %6264 = vmatmul.mubr.msk.bf16.gmra.mrb[48].mxu0 %vm440_vm2, %v397_v31 }
  0x7f   : > { %6267 = vmatprep.mubr.msk.bf16.mxu0 %vm440_vm2, %v398_v32 }
  0x86   : > { %6268 = vmatmul.mubr.msk.bf16.gmra.mrb[52].mxu0 %vm440_vm2, %v399_v37 }
  0x87   : > { %6271 = vmatprep.mubr.msk.bf16.mxu0 %vm440_vm2, %v400_v38 }
  0x8e   : > { %6272 = vmatmul.mubr.msk.bf16.gmra.mrb[56].mxu0 %vm440_vm2, %v401_v43 }
  0x8f   : > { %6275 = vmatprep.mubr.msk.bf16.mxu0 %vm440_vm2, %v402_v44 }
  0x96   : > { %6276 = vmatmul.mubr.msk.bf16.gmra.mrb[60].mxu0 %vm440_vm2, %v403_v47 }
  0xf1   : > { %v6217_v57 = vpop.f32.mrb[0].mxu0 }
  0xf2   : > { %v587_v58 = vadd.f32 %v6217_v57, %v7338_v55  ;;  %v578_v59 = vpop.f32.mrb[1].mxu0 }
  0xf3   : > { %v6218_v60 = vpop.f32.mrb[2].mxu0  ;;  %v579_v61 = vadd.f32 %v7338_v55, %v578_v59 }
  0xf4   : > { %v590_v62 = vadd.f32 %v6218_v60, %v7338_v55  ;;  %v581_v63 = vpop.f32.mrb[3].mxu0  ;;  %v835_v1 = vmax.f32 %v587_v58, 0.0 }
  0xf5   : > { %v582_v0 = vadd.f32 %v7338_v55, %v581_v63  ;;  %v833_v3 = vmax.f32 %v579_v61, 0.0 }
  0xf6   : > { %v836_v2 = vmax.f32 %v590_v62, 0.0 }
  0xf7   : > { %v834_v4 = vmax.f32 %v582_v0, 0.0 }
  0xf8   : > { %v898_v5 = vpack.c.bf16 %v836_v2, %v835_v1 }
  0xf9   : > { %v6221_v6 = vpop.f32.mrb[4].mxu0  ;;  %v897_v7 = vpack.c.bf16 %v834_v4, %v833_v3 }
  0xfa   : > { %v603_v8 = vadd.f32 %v6221_v6, %v7338_v55  ;;  %v594_v9 = vpop.f32.mrb[5].mxu0 }
  0xfb   : > { %v595_v10 = vadd.f32 %v7338_v55, %v594_v9  ;;  %v6222_v11 = vpop.f32.mrb[6].mxu0  ;;  %6295 = vmatprep.mubr.bf16.mxu1 %v897_v7 }
  0xfc   : > { %v839_v12 = vmax.f32 %v603_v8, 0.0  ;;  %v606_v13 = vadd.f32 %v6222_v11, %v7338_v55  ;;  %v597_v14 = vpop.f32.mrb[7].mxu0  ;;  %6296 = vmatmul.mubr.bf16.vlgmr.msra.gmra.mrb[0].mxu1 %v898_v5 }
  0xfd   : > { %v837_v15 = vmax.f32 %v595_v10, 0.0  ;;  %v598_v16 = vadd.f32 %v7338_v55, %v597_v14 }
  0xfe   : > { %v840_v17 = vmax.f32 %v606_v13, 0.0 }
  0xff   : > { %v838_v18 = vmax.f32 %v598_v16, 0.0 }
 0x100   : > { %v900_v19 = vpack.c.bf16 %v840_v17, %v839_v12 }
 0x101   : > { %v6225_v20 = vpop.f32.mrb[8].mxu0  ;;  %v899_v21 = vpack.c.bf16 %v838_v18, %v837_v15 }
 0x102   : > { %v619_v22 = vadd.f32 %v6225_v20, %v7338_v55  ;;  %v610_v23 = vpop.f32.mrb[9].mxu0 }
 0x103   : > { %v611_v24 = vadd.f32 %v7338_v55, %v610_v23  ;;  %v6226_v25 = vpop.f32.mrb[10].mxu0  ;;  %6299 = vmatprep.mubr.bf16.mxu1 %v899_v21 }
 0x104   : > { %v843_v26 = vmax.f32 %v619_v22, 0.0  ;;  %v622_v27 = vadd.f32 %v6226_v25, %v7338_v55  ;;  %v613_v28 = vpop.f32.mrb[11].mxu0  ;;  %6300 = vmatmul.mubr.bf16.gmra.mrb[4].mxu1 %v900_v19 }
 0x105   : > { %v841_v29 = vmax.f32 %v611_v24, 0.0  ;;  %v614_v30 = vadd.f32 %v7338_v55, %v613_v28 }
 0x106   : > { %v844_v31 = vmax.f32 %v622_v27, 0.0 }
 0x107   : > { %v842_v32 = vmax.f32 %v614_v30, 0.0 }
 0x108   : > { %v902_v33 = vpack.c.bf16 %v844_v31, %v843_v26 }
 0x109   : > { %v6229_v34 = vpop.f32.mrb[12].mxu0  ;;  %v901_v35 = vpack.c.bf16 %v842_v32, %v841_v29 }
 0x10a   : > { %v635_v36 = vadd.f32 %v6229_v34, %v7338_v55  ;;  %v626_v37 = vpop.f32.mrb[13].mxu0 }
 0x10b   : > { %v627_v38 = vadd.f32 %v7338_v55, %v626_v37  ;;  %v6230_v39 = vpop.f32.mrb[14].mxu0  ;;  %6303 = vmatprep.mubr.bf16.mxu1 %v901_v35 }
 0x10c   : > { %v847_v40 = vmax.f32 %v635_v36, 0.0  ;;  %v638_v41 = vadd.f32 %v6230_v39, %v7338_v55  ;;  %v629_v42 = vpop.f32.mrb[15].mxu0  ;;  %6304 = vmatmul.mubr.bf16.gmra.mrb[8].mxu1 %v902_v33 }
 0x10d   : > { %v845_v43 = vmax.f32 %v627_v38, 0.0  ;;  %v630_v44 = vadd.f32 %v7338_v55, %v629_v42 }
 0x10e   : > { %v848_v45 = vmax.f32 %v638_v41, 0.0 }
 0x10f   : > { %v846_v46 = vmax.f32 %v630_v44, 0.0 }
 0x110   : > { %v904_v47 = vpack.c.bf16 %v848_v45, %v847_v40 }
 0x111   : > { %v6233_v48 = vpop.f32.mrb[16].mxu0  ;;  %v903_v49 = vpack.c.bf16 %v846_v46, %v845_v43 }
 0x112   : > { %v651_v50 = vadd.f32 %v6233_v48, %v7338_v55  ;;  %v642_v51 = vpop.f32.mrb[17].mxu0 }
 0x113   : > { %v643_v52 = vadd.f32 %v7338_v55, %v642_v51  ;;  %6307 = vmatprep.mubr.bf16.mxu1 %v903_v49  ;;  %v6234_v53 = vpop.f32.mrb[18].mxu0 }
 0x114   : > { %v851_v54 = vmax.f32 %v651_v50, 0.0  ;;  %v654_v56 = vadd.f32 %v6234_v53, %v7338_v55  ;;  %6308 = vmatmul.mubr.bf16.gmra.mrb[12].mxu1 %v904_v47  ;;  %v645_v57 = vpop.f32.mrb[19].mxu0 }
 0x115   : > { %v849_v58 = vmax.f32 %v643_v52, 0.0  ;;  %v646_v59 = vadd.f32 %v7338_v55, %v645_v57 }
 0x116   : > { %v852_v60 = vmax.f32 %v654_v56, 0.0 }
 0x117   : > { %v850_v61 = vmax.f32 %v646_v59, 0.0 }
 0x118   : > { %v906_v62 = vpack.c.bf16 %v852_v60, %v851_v54 }
 0x119   : > { %v905_v63 = vpack.c.bf16 %v850_v61, %v849_v58  ;;  %v6237_v0 = vpop.f32.mrb[20].mxu0 }
 0x11a   : > { %v667_v1 = vadd.f32 %v6237_v0, %v7338_v55  ;;  %v658_v2 = vpop.f32.mrb[21].mxu0 }
 0x11b   : > { %6311 = vmatprep.mubr.bf16.mxu1 %v905_v63  ;;  %v659_v3 = vadd.f32 %v7338_v55, %v658_v2  ;;  %v6238_v4 = vpop.f32.mrb[22].mxu0 }
 0x11c   : > { %6312 = vmatmul.mubr.bf16.gmra.mrb[16].mxu1 %v906_v62  ;;  %v855_v5 = vmax.f32 %v667_v1, 0.0  ;;  %v670_v6 = vadd.f32 %v6238_v4, %v7338_v55  ;;  %v661_v7 = vpop.f32.mrb[23].mxu0 }
 0x11d   : > { %v853_v8 = vmax.f32 %v659_v3, 0.0  ;;  %v662_v9 = vadd.f32 %v7338_v55, %v661_v7 }
 0x11e   : > { %v856_v10 = vmax.f32 %v670_v6, 0.0 }
 0x11f   : > { %v854_v11 = vmax.f32 %v662_v9, 0.0 }
 0x120   : > { %v908_v12 = vpack.c.bf16 %v856_v10, %v855_v5 }
 0x121   : > { %v907_v13 = vpack.c.bf16 %v854_v11, %v853_v8  ;;  %v6241_v14 = vpop.f32.mrb[24].mxu0 }
 0x122   : > { %v683_v15 = vadd.f32 %v6241_v14, %v7338_v55  ;;  %v674_v16 = vpop.f32.mrb[25].mxu0 }
 0x123   : > { %6315 = vmatprep.mubr.bf16.mxu1 %v907_v13  ;;  %v675_v17 = vadd.f32 %v7338_v55, %v674_v16  ;;  %v6242_v18 = vpop.f32.mrb[26].mxu0 }
 0x124   : > { %6316 = vmatmul.mubr.bf16.gmra.mrb[20].mxu1 %v908_v12  ;;  %v859_v19 = vmax.f32 %v683_v15, 0.0  ;;  %v686_v20 = vadd.f32 %v6242_v18, %v7338_v55  ;;  %v677_v21 = vpop.f32.mrb[27].mxu0 }
 0x125   : > { %v857_v22 = vmax.f32 %v675_v17, 0.0  ;;  %v678_v23 = vadd.f32 %v7338_v55, %v677_v21 }
 0x126   : > { %v860_v24 = vmax.f32 %v686_v20, 0.0 }
 0x127   : > { %v858_v25 = vmax.f32 %v678_v23, 0.0 }
 0x128   : > { %v910_v26 = vpack.c.bf16 %v860_v24, %v859_v19 }
 0x129   : > { %v909_v27 = vpack.c.bf16 %v858_v25, %v857_v22  ;;  %v6245_v28 = vpop.f32.mrb[28].mxu0 }
 0x12a   : > { %v699_v29 = vadd.f32 %v6245_v28, %v7338_v55  ;;  %v690_v30 = vpop.f32.mrb[29].mxu0 }
 0x12b   : > { %6319 = vmatprep.mubr.bf16.mxu1 %v909_v27  ;;  %v691_v31 = vadd.f32 %v7338_v55, %v690_v30  ;;  %v6246_v32 = vpop.f32.mrb[30].mxu0 }
 0x12c   : > { %6320 = vmatmul.mubr.bf16.gmra.mrb[24].mxu1 %v910_v26  ;;  %v863_v33 = vmax.f32 %v699_v29, 0.0  ;;  %v702_v34 = vadd.f32 %v6246_v32, %v7338_v55  ;;  %v693_v35 = vpop.f32.mrb[31].mxu0 }
 0x12d   : > { %v861_v36 = vmax.f32 %v691_v31, 0.0  ;;  %v694_v37 = vadd.f32 %v7338_v55, %v693_v35 }
 0x12e   : > { %v864_v38 = vmax.f32 %v702_v34, 0.0 }
 0x12f   : > { %v862_v39 = vmax.f32 %v694_v37, 0.0 }
 0x130   : > { %v912_v40 = vpack.c.bf16 %v864_v38, %v863_v33 }
 0x131   : > { %v911_v41 = vpack.c.bf16 %v862_v39, %v861_v36  ;;  %v6249_v42 = vpop.f32.mrb[32].mxu0 }
 0x132   : > { %v715_v43 = vadd.f32 %v6249_v42, %v7338_v55  ;;  %v706_v44 = vpop.f32.mrb[33].mxu0 }
 0x133   : > { %6323 = vmatprep.mubr.bf16.mxu1 %v911_v41  ;;  %v707_v45 = vadd.f32 %v7338_v55, %v706_v44  ;;  %v6250_v46 = vpop.f32.mrb[34].mxu0 }
 0x134   : > { %6324 = vmatmul.mubr.bf16.gmra.mrb[28].mxu1 %v912_v40  ;;  %v867_v47 = vmax.f32 %v715_v43, 0.0  ;;  %v718_v48 = vadd.f32 %v6250_v46, %v7338_v55  ;;  %v709_v49 = vpop.f32.mrb[35].mxu0 }
 0x135   : > { %v865_v50 = vmax.f32 %v707_v45, 0.0  ;;  %v710_v51 = vadd.f32 %v7338_v55, %v709_v49 }
 0x136   : > { %v868_v52 = vmax.f32 %v718_v48, 0.0 }
 0x137   : > { %v866_v53 = vmax.f32 %v710_v51, 0.0 }
 0x138   : > { %v914_v54 = vpack.c.bf16 %v868_v52, %v867_v47 }
 0x139   : > { %v913_v56 = vpack.c.bf16 %v866_v53, %v865_v50  ;;  %v6253_v57 = vpop.f32.mrb[36].mxu0 }
 0x13a   : > { %v731_v58 = vadd.f32 %v6253_v57, %v7338_v55  ;;  %v722_v59 = vpop.f32.mrb[37].mxu0 }
 0x13b   : > { %6327 = vmatprep.mubr.bf16.mxu1 %v913_v56  ;;  %v723_v60 = vadd.f32 %v7338_v55, %v722_v59  ;;  %v6254_v61 = vpop.f32.mrb[38].mxu0 }
 0x13c   : > { %6328 = vmatmul.mubr.bf16.gmra.mrb[32].mxu1 %v914_v54  ;;  %v871_v62 = vmax.f32 %v731_v58, 0.0  ;;  %v734_v63 = vadd.f32 %v6254_v61, %v7338_v55  ;;  %v725_v0 = vpop.f32.mrb[39].mxu0 }
 0x13d   : > { %v869_v1 = vmax.f32 %v723_v60, 0.0  ;;  %v726_v2 = vadd.f32 %v7338_v55, %v725_v0 }
 0x13e   : > { %v872_v3 = vmax.f32 %v734_v63, 0.0 }
 0x13f   : > { %v870_v4 = vmax.f32 %v726_v2, 0.0 }
 0x140   : > { %v916_v5 = vpack.c.bf16 %v872_v3, %v871_v62 }
 0x141   : > { %v915_v6 = vpack.c.bf16 %v870_v4, %v869_v1  ;;  %v6257_v7 = vpop.f32.mrb[40].mxu0 }
 0x142   : > { %v747_v8 = vadd.f32 %v6257_v7, %v7338_v55  ;;  %v738_v9 = vpop.f32.mrb[41].mxu0 }
 0x143   : > { %6331 = vmatprep.mubr.bf16.mxu1 %v915_v6  ;;  %v739_v10 = vadd.f32 %v7338_v55, %v738_v9  ;;  %v6258_v11 = vpop.f32.mrb[42].mxu0 }
 0x144   : > { %6332 = vmatmul.mubr.bf16.gmra.mrb[36].mxu1 %v916_v5  ;;  %v875_v12 = vmax.f32 %v747_v8, 0.0  ;;  %v750_v13 = vadd.f32 %v6258_v11, %v7338_v55  ;;  %v741_v14 = vpop.f32.mrb[43].mxu0 }
 0x145   : > { %v873_v15 = vmax.f32 %v739_v10, 0.0  ;;  %v742_v16 = vadd.f32 %v7338_v55, %v741_v14 }
 0x146   : > { %v876_v17 = vmax.f32 %v750_v13, 0.0 }
 0x147   : > { %v874_v18 = vmax.f32 %v742_v16, 0.0 }
 0x148   : > { %v918_v19 = vpack.c.bf16 %v876_v17, %v875_v12 }
 0x149   : > { %v917_v20 = vpack.c.bf16 %v874_v18, %v873_v15  ;;  %v6261_v21 = vpop.f32.mrb[44].mxu0 }
 0x14a   : > { %v763_v22 = vadd.f32 %v6261_v21, %v7338_v55  ;;  %v754_v23 = vpop.f32.mrb[45].mxu0 }
 0x14b   : > { %6335 = vmatprep.mubr.bf16.mxu1 %v917_v20  ;;  %v755_v24 = vadd.f32 %v7338_v55, %v754_v23  ;;  %v6262_v25 = vpop.f32.mrb[46].mxu0 }
 0x14c   : > { %6336 = vmatmul.mubr.bf16.gmra.mrb[40].mxu1 %v918_v19  ;;  %v879_v26 = vmax.f32 %v763_v22, 0.0  ;;  %v766_v27 = vadd.f32 %v6262_v25, %v7338_v55  ;;  %v757_v28 = vpop.f32.mrb[47].mxu0 }
 0x14d   : > { %v877_v29 = vmax.f32 %v755_v24, 0.0  ;;  %v758_v30 = vadd.f32 %v7338_v55, %v757_v28  ;;  %v6934_v28 = vld [vmem:[%s8690_s2 + $0x80] sm:$0xff]  }
 0x14e   : > { %v880_v31 = vmax.f32 %v766_v27, 0.0  ;;  %6439 = vmatprep.subr.bf16.mxu1 %v6934_v28 }
 0x14f   : > { %v878_v32 = vmax.f32 %v758_v30, 0.0  ;;  %6440 = vmatpush3.bf16.msra.mxu1 %v6934_v28  ;;  %v6937_v30 = vld [vmem:[%s8690_s2 + $0x98] sm:$0xff]  }
 0x150   : > { %v920_v33 = vpack.c.bf16 %v880_v31, %v879_v26  ;;  %v6938_v31 = vld [vmem:[%s8690_s2 + $0xa0] sm:$0xff]  }
 0x151   : > { %v919_v34 = vpack.c.bf16 %v878_v32, %v877_v29  ;;  %v6265_v35 = vpop.f32.mrb[48].mxu0  ;;  %v6935_v29 = vld [vmem:[%s8690_s2 + $0x88] sm:$0xff]  }
 0x152   : > { %v779_v36 = vadd.f32 %v6265_v35, %v7338_v55  ;;  %v770_v37 = vpop.f32.mrb[49].mxu0  ;;  %6441 = vmatprep.subr.bf16.mxu1 %v6935_v29  ;;  %v6939_v32 = vld [vmem:[%s8690_s2 + $0xa8] sm:$0xff]  }
 0x153   : > { %6339 = vmatprep.mubr.bf16.mxu1 %v919_v34  ;;  %v771_v38 = vadd.f32 %v7338_v55, %v770_v37  ;;  %v6266_v39 = vpop.f32.mrb[50].mxu0  ;;  %6442 = vmatpush3.bf16.msra.mxu1 %v6935_v29  ;;  %v6941_v34 = vld [vmem:[%s8690_s2 + $0xb8] sm:$0xff]  }
 0x154   : > { %6340 = vmatmul.mubr.bf16.gmra.mrb[44].mxu1 %v920_v33  ;;  %v883_v40 = vmax.f32 %v779_v36, 0.0  ;;  %v782_v41 = vadd.f32 %v6266_v39, %v7338_v55  ;;  %v773_v42 = vpop.f32.mrb[51].mxu0  ;;  %v6940_v33 = vld [vmem:[%s8690_s2 + $0xb0] sm:$0xff]   ;;  %v7434_v36 = vld [vmem:[%s8691_s3 + $0x1] ss:$0 sm:$0xff] }
 0x155   : > { %v881_v43 = vmax.f32 %v771_v38, 0.0  ;;  %v774_v44 = vadd.f32 %v7338_v55, %v773_v42 }
 0x156   : > { %v884_v45 = vmax.f32 %v782_v41, 0.0 }
 0x157   : > { %v882_v46 = vmax.f32 %v774_v44, 0.0 }
 0x158   : > { %v922_v47 = vpack.c.bf16 %v884_v45, %v883_v40 }
 0x159   : > { %v921_v48 = vpack.c.bf16 %v882_v46, %v881_v43  ;;  %v6269_v49 = vpop.f32.mrb[52].mxu0 }
 0x15a   : > { %v795_v50 = vadd.f32 %v6269_v49, %v7338_v55  ;;  %v786_v51 = vpop.f32.mrb[53].mxu0 }
 0x15b   : > { %6343 = vmatprep.mubr.bf16.mxu1 %v921_v48  ;;  %v787_v52 = vadd.f32 %v7338_v55, %v786_v51  ;;  %v6270_v53 = vpop.f32.mrb[54].mxu0 }
 0x15c   : > { %6344 = vmatmul.mubr.bf16.gmra.mrb[48].mxu1 %v922_v47  ;;  %v887_v54 = vmax.f32 %v795_v50, 0.0  ;;  %v798_v56 = vadd.f32 %v6270_v53, %v7338_v55  ;;  %v789_v57 = vpop.f32.mrb[55].mxu0 }
 0x15d   : > { %v885_v58 = vmax.f32 %v787_v52, 0.0  ;;  %v790_v59 = vadd.f32 %v7338_v55, %v789_v57 }
 0x15e   : > { %v888_v60 = vmax.f32 %v798_v56, 0.0 }
 0x15f   : > { %v886_v61 = vmax.f32 %v790_v59, 0.0 }
 0x160   : > { %v924_v62 = vpack.c.bf16 %v888_v60, %v887_v54 }
 0x161   : > { %v923_v63 = vpack.c.bf16 %v886_v61, %v885_v58  ;;  %v6273_v0 = vpop.f32.mrb[56].mxu0 }
 0x162   : > { %v811_v1 = vadd.f32 %v6273_v0, %v7338_v55  ;;  %v802_v2 = vpop.f32.mrb[57].mxu0 }
 0x163   : > { %6347 = vmatprep.mubr.bf16.mxu1 %v923_v63  ;;  %v803_v3 = vadd.f32 %v7338_v55, %v802_v2  ;;  %v6274_v4 = vpop.f32.mrb[58].mxu0 }
 0x164   : > { %6348 = vmatmul.mubr.bf16.gmra.mrb[52].mxu1 %v924_v62  ;;  %v891_v5 = vmax.f32 %v811_v1, 0.0  ;;  %v814_v6 = vadd.f32 %v6274_v4, %v7338_v55  ;;  %v805_v7 = vpop.f32.mrb[59].mxu0 }
 0x165   : > { %v889_v8 = vmax.f32 %v803_v3, 0.0  ;;  %v806_v9 = vadd.f32 %v7338_v55, %v805_v7 }
 0x166   : > { %v892_v10 = vmax.f32 %v814_v6, 0.0 }
 0x167   : > { %v890_v11 = vmax.f32 %v806_v9, 0.0 }
 0x168   : > { %v926_v12 = vpack.c.bf16 %v892_v10, %v891_v5 }
 0x169   : > { %v925_v13 = vpack.c.bf16 %v890_v11, %v889_v8  ;;  %v6277_v14 = vpop.f32.mrb[60].mxu0 }
 0x16a   : > { %v827_v15 = vadd.f32 %v6277_v14, %v7338_v55  ;;  %v818_v16 = vpop.f32.mrb[61].mxu0 }
 0x16b   : > { %6351 = vmatprep.mubr.bf16.mxu1 %v925_v13  ;;  %v819_v17 = vadd.f32 %v7338_v55, %v818_v16  ;;  %v6278_v18 = vpop.f32.mrb[62].mxu0 }
 0x16c   : > { %6352 = vmatmul.mubr.bf16.gmra.mrb[56].mxu1 %v926_v12  ;;  %v895_v19 = vmax.f32 %v827_v15, 0.0  ;;  %v830_v20 = vadd.f32 %v6278_v18, %v7338_v55  ;;  %v821_v21 = vpop.f32.mrb[63].mxu0 }
 0x16d   : > { %v893_v22 = vmax.f32 %v819_v17, 0.0  ;;  %v822_v23 = vadd.f32 %v7338_v55, %v821_v21  ;;  %v6936_v55 = vld [vmem:[%s8690_s2 + $0x90] sm:$0xff]  }
 0x16e   : > { %v896_v24 = vmax.f32 %v830_v20, 0.0  ;;  %6443 = vmatprep.subr.bf16.mxu1 %v6936_v55 }
 0x16f   : > { %v894_v25 = vmax.f32 %v822_v23, 0.0  ;;  %6444 = vmatpush3.bf16.msra.mxu1 %v6936_v55 }
 0x170   : > { %v928_v26 = vpack.c.bf16 %v896_v24, %v895_v19  ;;  %6445 = vmatprep.subr.bf16.mxu1 %v6937_v30 }
 0x171   : > { %v927_v27 = vpack.c.bf16 %v894_v25, %v893_v22 }
 0x173   : > { %6355 = vmatprep.mubr.bf16.mxu1 %v927_v27  ;;  %6446 = vmatpush3.bf16.msra.mxu1 %v6937_v30 }
 0x174   : > { %6356 = vmatmul.mubr.bf16.gmra.mrb[60].mxu1 %v928_v26  ;;  %6447 = vmatprep.subr.bf16.mxu1 %v6938_v31 }
 0x177   : > { %6448 = vmatpush3.bf16.msra.mxu1 %v6938_v31 }
 0x178   : > { %6449 = vmatprep.subr.bf16.mxu1 %v6939_v32 }
 0x17b   : > { %6450 = vmatpush3.bf16.msra.mxu1 %v6939_v32 }
 0x17c   : > { %6451 = vmatprep.subr.bf16.mxu1 %v6940_v33 }
 0x17f   : > { %6452 = vmatpush3.bf16.msra.mxu1 %v6940_v33 }
 0x180   : > { %6453 = vmatprep.subr.bf16.mxu1 %v6941_v34 }
 0x183   : > { %6454 = vmatpush3.bf16.msra.mxu1 %v6941_v34 }
 0x1cf   : > { %v6297_v35 = vpop.f32.mrb[0].mxu1 }
 0x1d0   : > { %v1032_v37 = vpop.f32.mrb[1].mxu1  ;;  %v1041_v39 = vadd.f32 %v6297_v35, %v7434_v36 }
 0x1d1   : > { %v6298_v38 = vpop.f32.mrb[2].mxu1  ;;  %v1033_v42 = vadd.f32 %v7434_v36, %v1032_v37 }
 0x1d2   : > { %v1044_v40 = vadd.f32 %v6298_v38, %v7434_v36  ;;  %v1035_v41 = vpop.f32.mrb[3].mxu1 }
 0x1d3   : > { %v1036_v43 = vadd.f32 %v7434_v36, %v1035_v41 }
 0x1d4   : > { %v1288_v44 = vpack.c.bf16 %v1044_v40, %v1041_v39 }
 0x1d5   : > { %v1287_v45 = vpack.c.bf16 %v1036_v43, %v1033_v42 }
 0x1d7   : > { %v6301_v46 = vpop.f32.mrb[4].mxu1  ;;  %6375 = vmatprep.mubr.bf16.mxu0 %v1287_v45 }
 0x1d8   : > { %v1057_v47 = vadd.f32 %v6301_v46, %v7434_v36  ;;  %v1048_v48 = vpop.f32.mrb[5].mxu1  ;;  %6376 = vmatmul.mubr.bf16.vlgmr.msra.gmra.mrb[64].mxu0 %v1288_v44 }
 0x1d9   : > { %v1049_v49 = vadd.f32 %v7434_v36, %v1048_v48  ;;  %v6302_v50 = vpop.f32.mrb[6].mxu1 }
 0x1da   : > { %v1060_v51 = vadd.f32 %v6302_v50, %v7434_v36  ;;  %v1051_v52 = vpop.f32.mrb[7].mxu1 }
 0x1db   : > { %v1052_v53 = vadd.f32 %v7434_v36, %v1051_v52 }
 0x1dc   : > { %v1290_v54 = vpack.c.bf16 %v1060_v51, %v1057_v47 }
 0x1dd   : > { %v1289_v56 = vpack.c.bf16 %v1052_v53, %v1049_v49 }
 0x1df   : > { %v6305_v57 = vpop.f32.mrb[8].mxu1  ;;  %6379 = vmatprep.mubr.bf16.mxu0 %v1289_v56 }
 0x1e0   : > { %v1073_v58 = vadd.f32 %v6305_v57, %v7434_v36  ;;  %v1064_v59 = vpop.f32.mrb[9].mxu1  ;;  %6380 = vmatmul.mubr.bf16.gmra.mrb[68].mxu0 %v1290_v54 }
 0x1e1   : > { %v1065_v60 = vadd.f32 %v7434_v36, %v1064_v59  ;;  %v6306_v61 = vpop.f32.mrb[10].mxu1 }
 0x1e2   : > { %v1076_v62 = vadd.f32 %v6306_v61, %v7434_v36  ;;  %v1067_v63 = vpop.f32.mrb[11].mxu1 }
 0x1e3   : > { %v1068_v0 = vadd.f32 %v7434_v36, %v1067_v63 }
 0x1e4   : > { %v1292_v1 = vpack.c.bf16 %v1076_v62, %v1073_v58 }
 0x1e5   : > { %v1291_v2 = vpack.c.bf16 %v1068_v0, %v1065_v60 }
 0x1e7   : > { %v6309_v3 = vpop.f32.mrb[12].mxu1  ;;  %6383 = vmatprep.mubr.bf16.mxu0 %v1291_v2 }
 0x1e8   : > { %v1089_v4 = vadd.f32 %v6309_v3, %v7434_v36  ;;  %v1080_v5 = vpop.f32.mrb[13].mxu1  ;;  %6384 = vmatmul.mubr.bf16.gmra.mrb[72].mxu0 %v1292_v1 }
 0x1e9   : > { %v1081_v6 = vadd.f32 %v7434_v36, %v1080_v5  ;;  %v6310_v7 = vpop.f32.mrb[14].mxu1 }
 0x1ea   : > { %v1092_v8 = vadd.f32 %v6310_v7, %v7434_v36  ;;  %v1083_v9 = vpop.f32.mrb[15].mxu1 }
 0x1eb   : > { %v1084_v10 = vadd.f32 %v7434_v36, %v1083_v9 }
 0x1ec   : > { %v1294_v11 = vpack.c.bf16 %v1092_v8, %v1089_v4 }
 0x1ed   : > { %v1293_v12 = vpack.c.bf16 %v1084_v10, %v1081_v6 }
 0x1ef   : > { %6387 = vmatprep.mubr.bf16.mxu0 %v1293_v12  ;;  %v6313_v13 = vpop.f32.mrb[16].mxu1 }
 0x1f0   : > { %v1105_v14 = vadd.f32 %v6313_v13, %v7434_v36  ;;  %6388 = vmatmul.mubr.bf16.gmra.mrb[76].mxu0 %v1294_v11  ;;  %v1096_v15 = vpop.f32.mrb[17].mxu1 }
 0x1f1   : > { %v1097_v16 = vadd.f32 %v7434_v36, %v1096_v15  ;;  %v6314_v17 = vpop.f32.mrb[18].mxu1 }
 0x1f2   : > { %v1108_v18 = vadd.f32 %v6314_v17, %v7434_v36  ;;  %v1099_v19 = vpop.f32.mrb[19].mxu1 }
 0x1f3   : > { %v1100_v20 = vadd.f32 %v7434_v36, %v1099_v19 }
 0x1f4   : > { %v1296_v21 = vpack.c.bf16 %v1108_v18, %v1105_v14 }
 0x1f5   : > { %v1295_v22 = vpack.c.bf16 %v1100_v20, %v1097_v16 }
 0x1f7   : > { %6391 = vmatprep.mubr.bf16.mxu0 %v1295_v22  ;;  %v6317_v23 = vpop.f32.mrb[20].mxu1 }
 0x1f8   : > { %6392 = vmatmul.mubr.bf16.gmra.mrb[80].mxu0 %v1296_v21  ;;  %v1121_v24 = vadd.f32 %v6317_v23, %v7434_v36  ;;  %v1112_v25 = vpop.f32.mrb[21].mxu1 }
 0x1f9   : > { %v1113_v26 = vadd.f32 %v7434_v36, %v1112_v25  ;;  %v6318_v27 = vpop.f32.mrb[22].mxu1 }
 0x1fa   : > { %v1124_v28 = vadd.f32 %v6318_v27, %v7434_v36  ;;  %v1115_v29 = vpop.f32.mrb[23].mxu1 }
 0x1fb   : > { %v1116_v55 = vadd.f32 %v7434_v36, %v1115_v29 }
 0x1fc   : > { %v1298_v30 = vpack.c.bf16 %v1124_v28, %v1121_v24 }
 0x1fd   : > { %v1297_v31 = vpack.c.bf16 %v1116_v55, %v1113_v26 }
 0x1ff   : > { %6395 = vmatprep.mubr.bf16.mxu0 %v1297_v31  ;;  %v6321_v32 = vpop.f32.mrb[24].mxu1 }
 0x200   : > { %6396 = vmatmul.mubr.bf16.gmra.mrb[84].mxu0 %v1298_v30  ;;  %v1137_v33 = vadd.f32 %v6321_v32, %v7434_v36  ;;  %v1128_v34 = vpop.f32.mrb[25].mxu1 }
 0x201   : > { %v1129_v35 = vadd.f32 %v7434_v36, %v1128_v34  ;;  %v6322_v37 = vpop.f32.mrb[26].mxu1 }
 0x202   : > { %v1140_v38 = vadd.f32 %v6322_v37, %v7434_v36  ;;  %v1131_v39 = vpop.f32.mrb[27].mxu1 }
 0x203   : > { %v1132_v40 = vadd.f32 %v7434_v36, %v1131_v39 }
 0x204   : > { %v1300_v41 = vpack.c.bf16 %v1140_v38, %v1137_v33 }
 0x205   : > { %v1299_v42 = vpack.c.bf16 %v1132_v40, %v1129_v35 }
 0x207   : > { %6399 = vmatprep.mubr.bf16.mxu0 %v1299_v42  ;;  %v6325_v43 = vpop.f32.mrb[28].mxu1 }
 0x208   : > { %6400 = vmatmul.mubr.bf16.gmra.mrb[88].mxu0 %v1300_v41  ;;  %v1153_v44 = vadd.f32 %v6325_v43, %v7434_v36  ;;  %v1144_v45 = vpop.f32.mrb[29].mxu1 }
 0x209   : > { %v1145_v46 = vadd.f32 %v7434_v36, %v1144_v45  ;;  %v6326_v47 = vpop.f32.mrb[30].mxu1 }
 0x20a   : > { %v1156_v48 = vadd.f32 %v6326_v47, %v7434_v36  ;;  %v1147_v49 = vpop.f32.mrb[31].mxu1 }
 0x20b   : > { %v1148_v50 = vadd.f32 %v7434_v36, %v1147_v49 }
 0x20c   : > { %v1302_v51 = vpack.c.bf16 %v1156_v48, %v1153_v44 }
 0x20d   : > { %v1301_v52 = vpack.c.bf16 %v1148_v50, %v1145_v46 }
 0x20f   : > { %6403 = vmatprep.mubr.bf16.mxu0 %v1301_v52  ;;  %v6329_v53 = vpop.f32.mrb[32].mxu1 }
 0x210   : > { %6404 = vmatmul.mubr.bf16.gmra.mrb[92].mxu0 %v1302_v51  ;;  %v1169_v54 = vadd.f32 %v6329_v53, %v7434_v36  ;;  %v1160_v56 = vpop.f32.mrb[33].mxu1 }
 0x211   : > { %v1161_v57 = vadd.f32 %v7434_v36, %v1160_v56  ;;  %v6330_v58 = vpop.f32.mrb[34].mxu1 }
 0x212   : > { %v1172_v59 = vadd.f32 %v6330_v58, %v7434_v36  ;;  %v1163_v60 = vpop.f32.mrb[35].mxu1 }
 0x213   : > { %v1164_v61 = vadd.f32 %v7434_v36, %v1163_v60 }
 0x214   : > { %v1304_v62 = vpack.c.bf16 %v1172_v59, %v1169_v54 }
 0x215   : > { %v1303_v63 = vpack.c.bf16 %v1164_v61, %v1161_v57 }
 0x217   : > { %6407 = vmatprep.mubr.bf16.mxu0 %v1303_v63  ;;  %v6333_v0 = vpop.f32.mrb[36].mxu1 }
 0x218   : > { %6408 = vmatmul.mubr.bf16.gmra.mrb[96].mxu0 %v1304_v62  ;;  %v1185_v1 = vadd.f32 %v6333_v0, %v7434_v36  ;;  %v1176_v2 = vpop.f32.mrb[37].mxu1 }
 0x219   : > { %v1177_v3 = vadd.f32 %v7434_v36, %v1176_v2  ;;  %v6334_v4 = vpop.f32.mrb[38].mxu1 }
 0x21a   : > { %v1188_v5 = vadd.f32 %v6334_v4, %v7434_v36  ;;  %v1179_v6 = vpop.f32.mrb[39].mxu1 }
 0x21b   : > { %v1180_v7 = vadd.f32 %v7434_v36, %v1179_v6 }
 0x21c   : > { %v1306_v8 = vpack.c.bf16 %v1188_v5, %v1185_v1 }
 0x21d   : > { %v1305_v9 = vpack.c.bf16 %v1180_v7, %v1177_v3  ;;  %v6942_v7 = vld [vmem:[%s8690_s2 + $0xc0] sm:$0xff]  }
 0x21e   : > { %6519 = vmatprep.subr.bf16.mxu0 %v6942_v7 }
 0x21f   : > { %6411 = vmatprep.mubr.bf16.mxu0 %v1305_v9  ;;  %v6337_v10 = vpop.f32.mrb[40].mxu1  ;;  %6520 = vmatpush3.bf16.msra.mxu0 %v6942_v7  ;;  %v6945_v9 = vld [vmem:[%s8690_s2 + $0xd8] sm:$0xff]  }
 0x220   : > { %6412 = vmatmul.mubr.bf16.gmra.mrb[100].mxu0 %v1306_v8  ;;  %v1201_v11 = vadd.f32 %v6337_v10, %v7434_v36  ;;  %v1192_v12 = vpop.f32.mrb[41].mxu1  ;;  %v6943_v8 = vld [vmem:[%s8690_s2 + $0xc8] sm:$0xff]   ;;  %v6946_v10 = vld [vmem:[%s8690_s2 + $0xe0] sm:$0xff]  }
 0x221   : > { %v1193_v13 = vadd.f32 %v7434_v36, %v1192_v12  ;;  %v6338_v14 = vpop.f32.mrb[42].mxu1  ;;  %6521 = vmatprep.subr.bf16.mxu0 %v6943_v8  ;;  %v6948_v12 = vld [vmem:[%s8690_s2 + $0xf0] sm:$0xff]  }
 0x222   : > { %v1204_v15 = vadd.f32 %v6338_v14, %v7434_v36  ;;  %v1195_v16 = vpop.f32.mrb[43].mxu1  ;;  %v6949_v14 = vld [vmem:[%s8690_s2 + $0xf8] sm:$0xff]  }
 0x223   : > { %v1196_v17 = vadd.f32 %v7434_v36, %v1195_v16  ;;  %6522 = vmatpush3.bf16.msra.mxu0 %v6943_v8 }
 0x224   : > { %v1308_v18 = vpack.c.bf16 %v1204_v15, %v1201_v11  ;;  %v6947_v11 = vld [vmem:[%s8690_s2 + $0xe8] sm:$0xff]  }
 0x225   : > { %v1307_v19 = vpack.c.bf16 %v1196_v17, %v1193_v13  ;;  %v7524_v13 = vld [vmem:[%s8691_s3 + $0x2] ss:$0 sm:$0xff] }
 0x227   : > { %6415 = vmatprep.mubr.bf16.mxu0 %v1307_v19  ;;  %v6341_v20 = vpop.f32.mrb[44].mxu1 }
 0x228   : > { %6416 = vmatmul.mubr.bf16.gmra.mrb[104].mxu0 %v1308_v18  ;;  %v1217_v21 = vadd.f32 %v6341_v20, %v7434_v36  ;;  %v1208_v22 = vpop.f32.mrb[45].mxu1 }
 0x229   : > { %v1209_v23 = vadd.f32 %v7434_v36, %v1208_v22  ;;  %v6342_v24 = vpop.f32.mrb[46].mxu1 }
 0x22a   : > { %v1220_v25 = vadd.f32 %v6342_v24, %v7434_v36  ;;  %v1211_v26 = vpop.f32.mrb[47].mxu1 }
 0x22b   : > { %v1212_v27 = vadd.f32 %v7434_v36, %v1211_v26 }
 0x22c   : > { %v1310_v28 = vpack.c.bf16 %v1220_v25, %v1217_v21 }
 0x22d   : > { %v1309_v29 = vpack.c.bf16 %v1212_v27, %v1209_v23 }
 0x22f   : > { %6419 = vmatprep.mubr.bf16.mxu0 %v1309_v29  ;;  %v6345_v55 = vpop.f32.mrb[48].mxu1 }
 0x230   : > { %6420 = vmatmul.mubr.bf16.gmra.mrb[108].mxu0 %v1310_v28  ;;  %v1233_v30 = vadd.f32 %v6345_v55, %v7434_v36  ;;  %v1224_v31 = vpop.f32.mrb[49].mxu1 }
 0x231   : > { %v1225_v32 = vadd.f32 %v7434_v36, %v1224_v31  ;;  %v6346_v33 = vpop.f32.mrb[50].mxu1 }
 0x232   : > { %v1236_v34 = vadd.f32 %v6346_v33, %v7434_v36  ;;  %v1227_v35 = vpop.f32.mrb[51].mxu1 }
 0x233   : > { %v1228_v37 = vadd.f32 %v7434_v36, %v1227_v35 }
 0x234   : > { %v1312_v38 = vpack.c.bf16 %v1236_v34, %v1233_v30 }
 0x235   : > { %v1311_v39 = vpack.c.bf16 %v1228_v37, %v1225_v32 }
 0x237   : > { %6423 = vmatprep.mubr.bf16.mxu0 %v1311_v39  ;;  %v6349_v40 = vpop.f32.mrb[52].mxu1 }
 0x238   : > { %6424 = vmatmul.mubr.bf16.gmra.mrb[112].mxu0 %v1312_v38  ;;  %v1249_v41 = vadd.f32 %v6349_v40, %v7434_v36  ;;  %v1240_v42 = vpop.f32.mrb[53].mxu1 }
 0x239   : > { %v1241_v43 = vadd.f32 %v7434_v36, %v1240_v42  ;;  %v6350_v44 = vpop.f32.mrb[54].mxu1 }
 0x23a   : > { %v1252_v45 = vadd.f32 %v6350_v44, %v7434_v36  ;;  %v1243_v46 = vpop.f32.mrb[55].mxu1 }
 0x23b   : > { %v1244_v47 = vadd.f32 %v7434_v36, %v1243_v46 }
 0x23c   : > { %v1314_v48 = vpack.c.bf16 %v1252_v45, %v1249_v41 }
 0x23d   : > { %v1313_v49 = vpack.c.bf16 %v1244_v47, %v1241_v43 }
 0x23f   : > { %6427 = vmatprep.mubr.bf16.mxu0 %v1313_v49  ;;  %v6353_v50 = vpop.f32.mrb[56].mxu1 }
 0x240   : > { %6428 = vmatmul.mubr.bf16.gmra.mrb[116].mxu0 %v1314_v48  ;;  %v1265_v51 = vadd.f32 %v6353_v50, %v7434_v36  ;;  %v1256_v52 = vpop.f32.mrb[57].mxu1 }
 0x241   : > { %v1257_v53 = vadd.f32 %v7434_v36, %v1256_v52  ;;  %v6354_v54 = vpop.f32.mrb[58].mxu1 }
 0x242   : > { %v1268_v56 = vadd.f32 %v6354_v54, %v7434_v36  ;;  %v1259_v57 = vpop.f32.mrb[59].mxu1 }
 0x243   : > { %v1260_v58 = vadd.f32 %v7434_v36, %v1259_v57 }
 0x244   : > { %v1316_v59 = vpack.c.bf16 %v1268_v56, %v1265_v51 }
 0x245   : > { %v1315_v60 = vpack.c.bf16 %v1260_v58, %v1257_v53 }
 0x247   : > { %6431 = vmatprep.mubr.bf16.mxu0 %v1315_v60  ;;  %v6357_v61 = vpop.f32.mrb[60].mxu1 }
 0x248   : > { %6432 = vmatmul.mubr.bf16.gmra.mrb[120].mxu0 %v1316_v59  ;;  %v1281_v62 = vadd.f32 %v6357_v61, %v7434_v36  ;;  %v1272_v63 = vpop.f32.mrb[61].mxu1 }
 0x249   : > { %v1273_v0 = vadd.f32 %v7434_v36, %v1272_v63  ;;  %v6358_v1 = vpop.f32.mrb[62].mxu1 }
 0x24a   : > { %v1284_v2 = vadd.f32 %v6358_v1, %v7434_v36  ;;  %v1275_v3 = vpop.f32.mrb[63].mxu1 }
 0x24b   : > { %v1276_v4 = vadd.f32 %v7434_v36, %v1275_v3  ;;  %v6944_v36 = vld [vmem:[%s8690_s2 + $0xd0] sm:$0xff]  }
 0x24c   : > { %v1318_v5 = vpack.c.bf16 %v1284_v2, %v1281_v62  ;;  %6523 = vmatprep.subr.bf16.mxu0 %v6944_v36 }
 0x24d   : > { %v1317_v6 = vpack.c.bf16 %v1276_v4, %v1273_v0  ;;  %6524 = vmatpush3.bf16.msra.mxu0 %v6944_v36 }
 0x24e   : > { %6525 = vmatprep.subr.bf16.mxu0 %v6945_v9 }
 0x24f   : > { %6435 = vmatprep.mubr.bf16.mxu0 %v1317_v6 }
 0x250   : > { %6436 = vmatmul.mubr.bf16.gmra.mrb[124].mxu0 %v1318_v5 }
 0x251   : > { %6526 = vmatpush3.bf16.msra.mxu0 %v6945_v9 }
 0x252   : > { %6527 = vmatprep.subr.bf16.mxu0 %v6946_v10 }
 0x255   : > { %6528 = vmatpush3.bf16.msra.mxu0 %v6946_v10 }
 0x256   : > { %6529 = vmatprep.subr.bf16.mxu0 %v6947_v11 }
 0x259   : > { %6530 = vmatpush3.bf16.msra.mxu0 %v6947_v11 }
 0x25a   : > { %6531 = vmatprep.subr.bf16.mxu0 %v6948_v12 }
 0x25d   : > { %6532 = vmatpush3.bf16.msra.mxu0 %v6948_v12 }
 0x25e   : > { %6533 = vmatprep.subr.bf16.mxu0 %v6949_v14 }
 0x261   : > { %6534 = vmatpush3.bf16.msra.mxu0 %v6949_v14 }
 0x2ab   : > { %v6377_v15 = vpop.f32.mrb[64].mxu0 }
 0x2ac   : > { %v1432_v16 = vadd.f32 %v6377_v15, %v7524_v13  ;;  %v1423_v17 = vpop.f32.mrb[65].mxu0 }
 0x2ad   : > { %v1424_v18 = vadd.f32 %v7524_v13, %v1423_v17  ;;  %v6378_v19 = vpop.f32.mrb[66].mxu0 }
 0x2ae   : > { %v1435_v20 = vadd.f32 %v6378_v19, %v7524_v13  ;;  %v1426_v21 = vpop.f32.mrb[67].mxu0  ;;  %v1680_v23 = vmax.f32 %v1432_v16, 0.0 }
 0x2af   : > { %v1427_v22 = vadd.f32 %v7524_v13, %v1426_v21  ;;  %v1678_v25 = vmax.f32 %v1424_v18, 0.0 }
 0x2b0   : > { %v1681_v24 = vmax.f32 %v1435_v20, 0.0 }
 0x2b1   : > { %v1679_v26 = vmax.f32 %v1427_v22, 0.0 }
 0x2b2   : > { %v1743_v27 = vpack.c.bf16 %v1681_v24, %v1680_v23 }
 0x2b3   : > { %v6381_v28 = vpop.f32.mrb[68].mxu0  ;;  %v1742_v29 = vpack.c.bf16 %v1679_v26, %v1678_v25 }
 0x2b4   : > { %v1448_v55 = vadd.f32 %v6381_v28, %v7524_v13  ;;  %v1439_v30 = vpop.f32.mrb[69].mxu0 }
 0x2b5   : > { %v1440_v31 = vadd.f32 %v7524_v13, %v1439_v30  ;;  %v6382_v32 = vpop.f32.mrb[70].mxu0  ;;  %6455 = vmatprep.mubr.bf16.mxu1 %v1742_v29 }
 0x2b6   : > { %v1451_v33 = vadd.f32 %v6382_v32, %v7524_v13  ;;  %v1442_v34 = vpop.f32.mrb[71].mxu0  ;;  %6456 = vmatmul.mubr.bf16.vlgmr.msra.gmra.mrb[64].mxu1 %v1743_v27  ;;  %v1684_v37 = vmax.f32 %v1448_v55, 0.0 }
 0x2b7   : > { %v1443_v35 = vadd.f32 %v7524_v13, %v1442_v34  ;;  %v1682_v39 = vmax.f32 %v1440_v31, 0.0 }
 0x2b8   : > { %v1685_v38 = vmax.f32 %v1451_v33, 0.0 }
 0x2b9   : > { %v1683_v40 = vmax.f32 %v1443_v35, 0.0 }
 0x2ba   : > { %v1745_v41 = vpack.c.bf16 %v1685_v38, %v1684_v37 }
 0x2bb   : > { %v6385_v42 = vpop.f32.mrb[72].mxu0  ;;  %v1744_v43 = vpack.c.bf16 %v1683_v40, %v1682_v39 }
 0x2bc   : > { %v1464_v44 = vadd.f32 %v6385_v42, %v7524_v13  ;;  %v1455_v45 = vpop.f32.mrb[73].mxu0 }
 0x2bd   : > { %v1456_v46 = vadd.f32 %v7524_v13, %v1455_v45  ;;  %v6386_v47 = vpop.f32.mrb[74].mxu0  ;;  %6459 = vmatprep.mubr.bf16.mxu1 %v1744_v43 }
 0x2be   : > { %v1688_v48 = vmax.f32 %v1464_v44, 0.0  ;;  %v1467_v49 = vadd.f32 %v6386_v47, %v7524_v13  ;;  %v1458_v50 = vpop.f32.mrb[75].mxu0  ;;  %6460 = vmatmul.mubr.bf16.gmra.mrb[68].mxu1 %v1745_v41 }
 0x2bf   : > { %v1686_v51 = vmax.f32 %v1456_v46, 0.0  ;;  %v1459_v52 = vadd.f32 %v7524_v13, %v1458_v50 }
 0x2c0   : > { %v1689_v53 = vmax.f32 %v1467_v49, 0.0 }
 0x2c1   : > { %v1687_v54 = vmax.f32 %v1459_v52, 0.0 }
 0x2c2   : > { %v1747_v56 = vpack.c.bf16 %v1689_v53, %v1688_v48 }
 0x2c3   : > { %v6389_v57 = vpop.f32.mrb[76].mxu0  ;;  %v1746_v58 = vpack.c.bf16 %v1687_v54, %v1686_v51 }
 0x2c4   : > { %v1480_v59 = vadd.f32 %v6389_v57, %v7524_v13  ;;  %v1471_v60 = vpop.f32.mrb[77].mxu0 }
 0x2c5   : > { %v1472_v61 = vadd.f32 %v7524_v13, %v1471_v60  ;;  %v6390_v62 = vpop.f32.mrb[78].mxu0  ;;  %6463 = vmatprep.mubr.bf16.mxu1 %v1746_v58 }
 0x2c6   : > { %v1692_v63 = vmax.f32 %v1480_v59, 0.0  ;;  %v1483_v0 = vadd.f32 %v6390_v62, %v7524_v13  ;;  %v1474_v1 = vpop.f32.mrb[79].mxu0  ;;  %6464 = vmatmul.mubr.bf16.gmra.mrb[72].mxu1 %v1747_v56 }
 0x2c7   : > { %v1690_v2 = vmax.f32 %v1472_v61, 0.0  ;;  %v1475_v3 = vadd.f32 %v7524_v13, %v1474_v1 }
 0x2c8   : > { %v1693_v4 = vmax.f32 %v1483_v0, 0.0 }
 0x2c9   : > { %v1691_v5 = vmax.f32 %v1475_v3, 0.0 }
 0x2ca   : > { %v1749_v6 = vpack.c.bf16 %v1693_v4, %v1692_v63 }
 0x2cb   : > { %v6393_v7 = vpop.f32.mrb[80].mxu0  ;;  %v1748_v8 = vpack.c.bf16 %v1691_v5, %v1690_v2 }
 0x2cc   : > { %v1496_v36 = vadd.f32 %v6393_v7, %v7524_v13  ;;  %v1487_v9 = vpop.f32.mrb[81].mxu0 }
 0x2cd   : > { %v1488_v10 = vadd.f32 %v7524_v13, %v1487_v9  ;;  %6467 = vmatprep.mubr.bf16.mxu1 %v1748_v8  ;;  %v6394_v11 = vpop.f32.mrb[82].mxu0 }
 0x2ce   : > { %v1696_v12 = vmax.f32 %v1496_v36, 0.0  ;;  %v1499_v14 = vadd.f32 %v6394_v11, %v7524_v13  ;;  %6468 = vmatmul.mubr.bf16.gmra.mrb[76].mxu1 %v1749_v6  ;;  %v1490_v15 = vpop.f32.mrb[83].mxu0 }
 0x2cf   : > { %v1694_v16 = vmax.f32 %v1488_v10, 0.0  ;;  %v1491_v17 = vadd.f32 %v7524_v13, %v1490_v15 }
 0x2d0   : > { %v1697_v18 = vmax.f32 %v1499_v14, 0.0 }
 0x2d1   : > { %v1695_v19 = vmax.f32 %v1491_v17, 0.0 }
 0x2d2   : > { %v1751_v20 = vpack.c.bf16 %v1697_v18, %v1696_v12 }
 0x2d3   : > { %v1750_v21 = vpack.c.bf16 %v1695_v19, %v1694_v16  ;;  %v6397_v22 = vpop.f32.mrb[84].mxu0 }
 0x2d4   : > { %v1512_v23 = vadd.f32 %v6397_v22, %v7524_v13  ;;  %v1503_v24 = vpop.f32.mrb[85].mxu0 }
 0x2d5   : > { %6471 = vmatprep.mubr.bf16.mxu1 %v1750_v21  ;;  %v1504_v25 = vadd.f32 %v7524_v13, %v1503_v24  ;;  %v6398_v26 = vpop.f32.mrb[86].mxu0 }
 0x2d6   : > { %6472 = vmatmul.mubr.bf16.gmra.mrb[80].mxu1 %v1751_v20  ;;  %v1700_v27 = vmax.f32 %v1512_v23, 0.0  ;;  %v1515_v28 = vadd.f32 %v6398_v26, %v7524_v13  ;;  %v1506_v29 = vpop.f32.mrb[87].mxu0 }
 0x2d7   : > { %v1698_v55 = vmax.f32 %v1504_v25, 0.0  ;;  %v1507_v30 = vadd.f32 %v7524_v13, %v1506_v29 }
 0x2d8   : > { %v1701_v31 = vmax.f32 %v1515_v28, 0.0 }
 0x2d9   : > { %v1699_v32 = vmax.f32 %v1507_v30, 0.0 }
 0x2da   : > { %v1753_v33 = vpack.c.bf16 %v1701_v31, %v1700_v27 }
 0x2db   : > { %v1752_v34 = vpack.c.bf16 %v1699_v32, %v1698_v55  ;;  %v6401_v35 = vpop.f32.mrb[88].mxu0 }
 0x2dc   : > { %v1528_v37 = vadd.f32 %v6401_v35, %v7524_v13  ;;  %v1519_v38 = vpop.f32.mrb[89].mxu0 }
 0x2dd   : > { %6475 = vmatprep.mubr.bf16.mxu1 %v1752_v34  ;;  %v1520_v39 = vadd.f32 %v7524_v13, %v1519_v38  ;;  %v6402_v40 = vpop.f32.mrb[90].mxu0 }
 0x2de   : > { %6476 = vmatmul.mubr.bf16.gmra.mrb[84].mxu1 %v1753_v33  ;;  %v1704_v41 = vmax.f32 %v1528_v37, 0.0  ;;  %v1531_v42 = vadd.f32 %v6402_v40, %v7524_v13  ;;  %v1522_v43 = vpop.f32.mrb[91].mxu0 }
 0x2df   : > { %v1702_v44 = vmax.f32 %v1520_v39, 0.0  ;;  %v1523_v45 = vadd.f32 %v7524_v13, %v1522_v43 }
 0x2e0   : > { %v1705_v46 = vmax.f32 %v1531_v42, 0.0 }
 0x2e1   : > { %v1703_v47 = vmax.f32 %v1523_v45, 0.0 }
 0x2e2   : > { %v1755_v48 = vpack.c.bf16 %v1705_v46, %v1704_v41 }
 0x2e3   : > { %v1754_v49 = vpack.c.bf16 %v1703_v47, %v1702_v44  ;;  %v6405_v50 = vpop.f32.mrb[92].mxu0 }
 0x2e4   : > { %v1544_v51 = vadd.f32 %v6405_v50, %v7524_v13  ;;  %v1535_v52 = vpop.f32.mrb[93].mxu0 }
 0x2e5   : > { %6479 = vmatprep.mubr.bf16.mxu1 %v1754_v49  ;;  %v1536_v53 = vadd.f32 %v7524_v13, %v1535_v52  ;;  %v6406_v54 = vpop.f32.mrb[94].mxu0 }
 0x2e6   : > { %6480 = vmatmul.mubr.bf16.gmra.mrb[88].mxu1 %v1755_v48  ;;  %v1708_v56 = vmax.f32 %v1544_v51, 0.0  ;;  %v1547_v57 = vadd.f32 %v6406_v54, %v7524_v13  ;;  %v1538_v58 = vpop.f32.mrb[95].mxu0 }
 0x2e7   : > { %v1706_v59 = vmax.f32 %v1536_v53, 0.0  ;;  %v1539_v60 = vadd.f32 %v7524_v13, %v1538_v58 }
 0x2e8   : > { %v1709_v61 = vmax.f32 %v1547_v57, 0.0 }
 0x2e9   : > { %v1707_v62 = vmax.f32 %v1539_v60, 0.0 }
 0x2ea   : > { %v1757_v63 = vpack.c.bf16 %v1709_v61, %v1708_v56 }
 0x2eb   : > { %v1756_v0 = vpack.c.bf16 %v1707_v62, %v1706_v59  ;;  %v6409_v1 = vpop.f32.mrb[96].mxu0 }
 0x2ec   : > { %v1560_v2 = vadd.f32 %v6409_v1, %v7524_v13  ;;  %v1551_v3 = vpop.f32.mrb[97].mxu0 }
 0x2ed   : > { %6483 = vmatprep.mubr.bf16.mxu1 %v1756_v0  ;;  %v1552_v4 = vadd.f32 %v7524_v13, %v1551_v3  ;;  %v6410_v5 = vpop.f32.mrb[98].mxu0 }
 0x2ee   : > { %6484 = vmatmul.mubr.bf16.gmra.mrb[92].mxu1 %v1757_v63  ;;  %v1712_v6 = vmax.f32 %v1560_v2, 0.0  ;;  %v1563_v7 = vadd.f32 %v6410_v5, %v7524_v13  ;;  %v1554_v8 = vpop.f32.mrb[99].mxu0 }
 0x2ef   : > { %v1710_v36 = vmax.f32 %v1552_v4, 0.0  ;;  %v1555_v9 = vadd.f32 %v7524_v13, %v1554_v8 }
 0x2f0   : > { %v1713_v10 = vmax.f32 %v1563_v7, 0.0 }
 0x2f1   : > { %v1711_v11 = vmax.f32 %v1555_v9, 0.0 }
 0x2f2   : > { %v1759_v12 = vpack.c.bf16 %v1713_v10, %v1712_v6 }
 0x2f3   : > { %v1758_v14 = vpack.c.bf16 %v1711_v11, %v1710_v36  ;;  %v6413_v15 = vpop.f32.mrb[100].mxu0 }
 0x2f4   : > { %v1576_v16 = vadd.f32 %v6413_v15, %v7524_v13  ;;  %v1567_v17 = vpop.f32.mrb[101].mxu0 }
 0x2f5   : > { %6487 = vmatprep.mubr.bf16.mxu1 %v1758_v14  ;;  %v1568_v18 = vadd.f32 %v7524_v13, %v1567_v17  ;;  %v6414_v19 = vpop.f32.mrb[102].mxu0 }
 0x2f6   : > { %6488 = vmatmul.mubr.bf16.gmra.mrb[96].mxu1 %v1759_v12  ;;  %v1716_v20 = vmax.f32 %v1576_v16, 0.0  ;;  %v1579_v21 = vadd.f32 %v6414_v19, %v7524_v13  ;;  %v1570_v22 = vpop.f32.mrb[103].mxu0 }
 0x2f7   : > { %v1714_v23 = vmax.f32 %v1568_v18, 0.0  ;;  %v1571_v24 = vadd.f32 %v7524_v13, %v1570_v22 }
 0x2f8   : > { %v1717_v25 = vmax.f32 %v1579_v21, 0.0 }
 0x2f9   : > { %v1715_v26 = vmax.f32 %v1571_v24, 0.0 }
 0x2fa   : > { %v1761_v27 = vpack.c.bf16 %v1717_v25, %v1716_v20 }
 0x2fb   : > { %v1760_v28 = vpack.c.bf16 %v1715_v26, %v1714_v23  ;;  %v6417_v29 = vpop.f32.mrb[104].mxu0 }
 0x2fc   : > { %v1592_v55 = vadd.f32 %v6417_v29, %v7524_v13  ;;  %v1583_v30 = vpop.f32.mrb[105].mxu0 }
 0x2fd   : > { %6491 = vmatprep.mubr.bf16.mxu1 %v1760_v28  ;;  %v1584_v31 = vadd.f32 %v7524_v13, %v1583_v30  ;;  %v6418_v32 = vpop.f32.mrb[106].mxu0 }
 0x2fe   : > { %6492 = vmatmul.mubr.bf16.gmra.mrb[100].mxu1 %v1761_v27  ;;  %v1720_v33 = vmax.f32 %v1592_v55, 0.0  ;;  %v1595_v34 = vadd.f32 %v6418_v32, %v7524_v13  ;;  %v1586_v35 = vpop.f32.mrb[107].mxu0 }
 0x2ff   : > { %v1718_v37 = vmax.f32 %v1584_v31, 0.0  ;;  %v1587_v38 = vadd.f32 %v7524_v13, %v1586_v35 }
 0x300   : > { %v1721_v39 = vmax.f32 %v1595_v34, 0.0 }
 0x301   : > { %v1719_v40 = vmax.f32 %v1587_v38, 0.0 }
 0x302   : > { %v1763_v41 = vpack.c.bf16 %v1721_v39, %v1720_v33 }
 0x303   : > { %v1762_v42 = vpack.c.bf16 %v1719_v40, %v1718_v37  ;;  %v6421_v43 = vpop.f32.mrb[108].mxu0 }
 0x304   : > { %v1608_v44 = vadd.f32 %v6421_v43, %v7524_v13  ;;  %v1599_v45 = vpop.f32.mrb[109].mxu0 }
 0x305   : > { %6495 = vmatprep.mubr.bf16.mxu1 %v1762_v42  ;;  %v1600_v46 = vadd.f32 %v7524_v13, %v1599_v45  ;;  %v6422_v47 = vpop.f32.mrb[110].mxu0 }
 0x306   : > { %6496 = vmatmul.mubr.bf16.gmra.mrb[104].mxu1 %v1763_v41  ;;  %v1724_v48 = vmax.f32 %v1608_v44, 0.0  ;;  %v1611_v49 = vadd.f32 %v6422_v47, %v7524_v13  ;;  %v1602_v50 = vpop.f32.mrb[111].mxu0 }
 0x307   : > { %v1722_v51 = vmax.f32 %v1600_v46, 0.0  ;;  %v1603_v52 = vadd.f32 %v7524_v13, %v1602_v50  ;;  %v6950_v50 = vld [vmem:[%s8690_s2 + $0x100] sm:$0xff]  }
 0x308   : > { %v1725_v53 = vmax.f32 %v1611_v49, 0.0  ;;  %6599 = vmatprep.subr.bf16.mxu1 %v6950_v50 }
 0x309   : > { %v1723_v54 = vmax.f32 %v1603_v52, 0.0  ;;  %6600 = vmatpush3.bf16.msra.mxu1 %v6950_v50  ;;  %v6953_v52 = vld [vmem:[%s8690_s2 + $0x118] sm:$0xff]  }
 0x30a   : > { %v1765_v56 = vpack.c.bf16 %v1725_v53, %v1724_v48  ;;  %v6954_v53 = vld [vmem:[%s8690_s2 + $0x120] sm:$0xff]  }
 0x30b   : > { %v1764_v57 = vpack.c.bf16 %v1723_v54, %v1722_v51  ;;  %v6425_v58 = vpop.f32.mrb[112].mxu0  ;;  %v6951_v51 = vld [vmem:[%s8690_s2 + $0x108] sm:$0xff]  }
 0x30c   : > { %v1624_v59 = vadd.f32 %v6425_v58, %v7524_v13  ;;  %v1615_v60 = vpop.f32.mrb[113].mxu0  ;;  %6601 = vmatprep.subr.bf16.mxu1 %v6951_v51  ;;  %v6955_v54 = vld [vmem:[%s8690_s2 + $0x128] sm:$0xff]  }
 0x30d   : > { %6499 = vmatprep.mubr.bf16.mxu1 %v1764_v57  ;;  %v1616_v61 = vadd.f32 %v7524_v13, %v1615_v60  ;;  %v6426_v62 = vpop.f32.mrb[114].mxu0  ;;  %6602 = vmatpush3.bf16.msra.mxu1 %v6951_v51  ;;  %v6957_v57 = vld [vmem:[%s8690_s2 + $0x138] sm:$0xff]  }
 0x30e   : > { %6500 = vmatmul.mubr.bf16.gmra.mrb[108].mxu1 %v1765_v56  ;;  %v1728_v63 = vmax.f32 %v1624_v59, 0.0  ;;  %v1627_v0 = vadd.f32 %v6426_v62, %v7524_v13  ;;  %v1618_v1 = vpop.f32.mrb[115].mxu0  ;;  %v6956_v56 = vld [vmem:[%s8690_s2 + $0x130] sm:$0xff]   ;;  %v7620_v59 = vld [vmem:[%s8691_s3 + $0x3] ss:$0 sm:$0xff] }
 0x30f   : > { %v1726_v2 = vmax.f32 %v1616_v61, 0.0  ;;  %v1619_v3 = vadd.f32 %v7524_v13, %v1618_v1 }
 0x310   : > { %v1729_v4 = vmax.f32 %v1627_v0, 0.0 }
 0x311   : > { %v1727_v5 = vmax.f32 %v1619_v3, 0.0 }
 0x312   : > { %v1767_v6 = vpack.c.bf16 %v1729_v4, %v1728_v63 }
 0x313   : > { %v1766_v7 = vpack.c.bf16 %v1727_v5, %v1726_v2  ;;  %v6429_v8 = vpop.f32.mrb[116].mxu0 }
 0x314   : > { %v1640_v36 = vadd.f32 %v6429_v8, %v7524_v13  ;;  %v1631_v9 = vpop.f32.mrb[117].mxu0 }
 0x315   : > { %6503 = vmatprep.mubr.bf16.mxu1 %v1766_v7  ;;  %v1632_v10 = vadd.f32 %v7524_v13, %v1631_v9  ;;  %v6430_v11 = vpop.f32.mrb[118].mxu0 }
 0x316   : > { %6504 = vmatmul.mubr.bf16.gmra.mrb[112].mxu1 %v1767_v6  ;;  %v1732_v12 = vmax.f32 %v1640_v36, 0.0  ;;  %v1643_v14 = vadd.f32 %v6430_v11, %v7524_v13  ;;  %v1634_v15 = vpop.f32.mrb[119].mxu0 }
 0x317   : > { %v1730_v16 = vmax.f32 %v1632_v10, 0.0  ;;  %v1635_v17 = vadd.f32 %v7524_v13, %v1634_v15 }
 0x318   : > { %v1733_v18 = vmax.f32 %v1643_v14, 0.0 }
 0x319   : > { %v1731_v19 = vmax.f32 %v1635_v17, 0.0 }
 0x31a   : > { %v1769_v20 = vpack.c.bf16 %v1733_v18, %v1732_v12 }
 0x31b   : > { %v1768_v21 = vpack.c.bf16 %v1731_v19, %v1730_v16  ;;  %v6433_v22 = vpop.f32.mrb[120].mxu0 }
 0x31c   : > { %v1656_v23 = vadd.f32 %v6433_v22, %v7524_v13  ;;  %v1647_v24 = vpop.f32.mrb[121].mxu0 }
 0x31d   : > { %6507 = vmatprep.mubr.bf16.mxu1 %v1768_v21  ;;  %v1648_v25 = vadd.f32 %v7524_v13, %v1647_v24  ;;  %v6434_v26 = vpop.f32.mrb[122].mxu0 }
 0x31e   : > { %6508 = vmatmul.mubr.bf16.gmra.mrb[116].mxu1 %v1769_v20  ;;  %v1736_v27 = vmax.f32 %v1656_v23, 0.0  ;;  %v1659_v28 = vadd.f32 %v6434_v26, %v7524_v13  ;;  %v1650_v29 = vpop.f32.mrb[123].mxu0 }
 0x31f   : > { %v1734_v55 = vmax.f32 %v1648_v25, 0.0  ;;  %v1651_v30 = vadd.f32 %v7524_v13, %v1650_v29 }
 0x320   : > { %v1737_v31 = vmax.f32 %v1659_v28, 0.0 }
 0x321   : > { %v1735_v32 = vmax.f32 %v1651_v30, 0.0 }
 0x322   : > { %v1771_v33 = vpack.c.bf16 %v1737_v31, %v1736_v27 }
 0x323   : > { %v1770_v34 = vpack.c.bf16 %v1735_v32, %v1734_v55  ;;  %v6437_v35 = vpop.f32.mrb[124].mxu0 }
 0x324   : > { %v1672_v37 = vadd.f32 %v6437_v35, %v7524_v13  ;;  %v1663_v38 = vpop.f32.mrb[125].mxu0 }
 0x325   : > { %6511 = vmatprep.mubr.bf16.mxu1 %v1770_v34  ;;  %v1664_v39 = vadd.f32 %v7524_v13, %v1663_v38  ;;  %v6438_v40 = vpop.f32.mrb[126].mxu0 }
 0x326   : > { %6512 = vmatmul.mubr.bf16.gmra.mrb[120].mxu1 %v1771_v33  ;;  %v1740_v41 = vmax.f32 %v1672_v37, 0.0  ;;  %v1675_v42 = vadd.f32 %v6438_v40, %v7524_v13  ;;  %v1666_v43 = vpop.f32.mrb[127].mxu0 }
 0x327   : > { %v1738_v44 = vmax.f32 %v1664_v39, 0.0  ;;  %v1667_v45 = vadd.f32 %v7524_v13, %v1666_v43  ;;  %v6952_v13 = vld [vmem:[%s8690_s2 + $0x110] sm:$0xff]  }
 0x328   : > { %v1741_v46 = vmax.f32 %v1675_v42, 0.0  ;;  %6603 = vmatprep.subr.bf16.mxu1 %v6952_v13 }
 0x329   : > { %v1739_v47 = vmax.f32 %v1667_v45, 0.0  ;;  %6604 = vmatpush3.bf16.msra.mxu1 %v6952_v13 }
 0x32a   : > { %v1773_v48 = vpack.c.bf16 %v1741_v46, %v1740_v41  ;;  %6605 = vmatprep.subr.bf16.mxu1 %v6953_v52 }
 0x32b   : > { %v1772_v49 = vpack.c.bf16 %v1739_v47, %v1738_v44 }
 0x32d   : > { %6515 = vmatprep.mubr.bf16.mxu1 %v1772_v49  ;;  %6606 = vmatpush3.bf16.msra.mxu1 %v6953_v52 }
 0x32e   : > { %6516 = vmatmul.mubr.bf16.gmra.mrb[124].mxu1 %v1773_v48  ;;  %6607 = vmatprep.subr.bf16.mxu1 %v6954_v53 }
 0x331   : > { %6608 = vmatpush3.bf16.msra.mxu1 %v6954_v53 }
 0x332   : > { %6609 = vmatprep.subr.bf16.mxu1 %v6955_v54 }
 0x335   : > { %6610 = vmatpush3.bf16.msra.mxu1 %v6955_v54 }
 0x336   : > { %6611 = vmatprep.subr.bf16.mxu1 %v6956_v56 }
 0x339   : > { %6612 = vmatpush3.bf16.msra.mxu1 %v6956_v56 }
 0x33a   : > { %6613 = vmatprep.subr.bf16.mxu1 %v6957_v57 }
 0x33d   : > { %6614 = vmatpush3.bf16.msra.mxu1 %v6957_v57 }
 0x389   : > { %v6457_v58 = vpop.f32.mrb[64].mxu1 }
 0x38a   : > { %v1878_v60 = vpop.f32.mrb[65].mxu1  ;;  %v1887_v62 = vadd.f32 %v6457_v58, %v7620_v59 }
 0x38b   : > { %v6458_v61 = vpop.f32.mrb[66].mxu1  ;;  %v1879_v1 = vadd.f32 %v7620_v59, %v1878_v60 }
 0x38c   : > { %v1890_v63 = vadd.f32 %v6458_v61, %v7620_v59  ;;  %v1881_v0 = vpop.f32.mrb[67].mxu1 }
 0x38d   : > { %v1882_v2 = vadd.f32 %v7620_v59, %v1881_v0 }
 0x38e   : > { %v2134_v3 = vpack.c.bf16 %v1890_v63, %v1887_v62 }
 0x38f   : > { %v2133_v4 = vpack.c.bf16 %v1882_v2, %v1879_v1 }
 0x391   : > { %v6461_v5 = vpop.f32.mrb[68].mxu1  ;;  %6535 = vmatprep.mubr.bf16.mxu0 %v2133_v4 }
 0x392   : > { %v1894_v6 = vpop.f32.mrb[69].mxu1  ;;  %6536 = vmatmul.mubr.bf16.vlgmr.msra.gmra.mrb[128].mxu0 %v2134_v3  ;;  %v1903_v8 = vadd.f32 %v6461_v5, %v7620_v59 }
 0x393   : > { %v6462_v7 = vpop.f32.mrb[70].mxu1  ;;  %v1895_v10 = vadd.f32 %v7620_v59, %v1894_v6 }
 0x394   : > { %v1906_v36 = vadd.f32 %v6462_v7, %v7620_v59  ;;  %v1897_v9 = vpop.f32.mrb[71].mxu1 }
 0x395   : > { %v1898_v11 = vadd.f32 %v7620_v59, %v1897_v9 }
 0x396   : > { %v2136_v12 = vpack.c.bf16 %v1906_v36, %v1903_v8 }
 0x397   : > { %v2135_v14 = vpack.c.bf16 %v1898_v11, %v1895_v10 }
 0x399   : > { %v6465_v15 = vpop.f32.mrb[72].mxu1  ;;  %6539 = vmatprep.mubr.bf16.mxu0 %v2135_v14 }
 0x39a   : > { %v1919_v16 = vadd.f32 %v6465_v15, %v7620_v59  ;;  %v1910_v17 = vpop.f32.mrb[73].mxu1  ;;  %6540 = vmatmul.mubr.bf16.gmra.mrb[132].mxu0 %v2136_v12 }
 0x39b   : > { %v1911_v18 = vadd.f32 %v7620_v59, %v1910_v17  ;;  %v6466_v19 = vpop.f32.mrb[74].mxu1 }
 0x39c   : > { %v1922_v20 = vadd.f32 %v6466_v19, %v7620_v59  ;;  %v1913_v21 = vpop.f32.mrb[75].mxu1 }
 0x39d   : > { %v1914_v22 = vadd.f32 %v7620_v59, %v1913_v21 }
 0x39e   : > { %v2138_v23 = vpack.c.bf16 %v1922_v20, %v1919_v16 }
 0x39f   : > { %v2137_v24 = vpack.c.bf16 %v1914_v22, %v1911_v18 }
 0x3a1   : > { %v6469_v25 = vpop.f32.mrb[76].mxu1  ;;  %6543 = vmatprep.mubr.bf16.mxu0 %v2137_v24 }
 0x3a2   : > { %v1935_v26 = vadd.f32 %v6469_v25, %v7620_v59  ;;  %v1926_v27 = vpop.f32.mrb[77].mxu1  ;;  %6544 = vmatmul.mubr.bf16.gmra.mrb[136].mxu0 %v2138_v23 }
 0x3a3   : > { %v1927_v28 = vadd.f32 %v7620_v59, %v1926_v27  ;;  %v6470_v29 = vpop.f32.mrb[78].mxu1 }
 0x3a4   : > { %v1938_v55 = vadd.f32 %v6470_v29, %v7620_v59  ;;  %v1929_v30 = vpop.f32.mrb[79].mxu1 }
 0x3a5   : > { %v1930_v31 = vadd.f32 %v7620_v59, %v1929_v30 }
 0x3a6   : > { %v2140_v32 = vpack.c.bf16 %v1938_v55, %v1935_v26 }
 0x3a7   : > { %v2139_v33 = vpack.c.bf16 %v1930_v31, %v1927_v28 }
 0x3a9   : > { %6547 = vmatprep.mubr.bf16.mxu0 %v2139_v33  ;;  %v6473_v34 = vpop.f32.mrb[80].mxu1 }
 0x3aa   : > { %v1951_v35 = vadd.f32 %v6473_v34, %v7620_v59  ;;  %6548 = vmatmul.mubr.bf16.gmra.mrb[140].mxu0 %v2140_v32  ;;  %v1942_v37 = vpop.f32.mrb[81].mxu1 }
 0x3ab   : > { %v1943_v38 = vadd.f32 %v7620_v59, %v1942_v37  ;;  %v6474_v39 = vpop.f32.mrb[82].mxu1 }
 0x3ac   : > { %v1954_v40 = vadd.f32 %v6474_v39, %v7620_v59  ;;  %v1945_v41 = vpop.f32.mrb[83].mxu1 }
 0x3ad   : > { %v1946_v42 = vadd.f32 %v7620_v59, %v1945_v41 }
 0x3ae   : > { %v2142_v43 = vpack.c.bf16 %v1954_v40, %v1951_v35 }
 0x3af   : > { %v2141_v44 = vpack.c.bf16 %v1946_v42, %v1943_v38 }
 0x3b1   : > { %6551 = vmatprep.mubr.bf16.mxu0 %v2141_v44  ;;  %v6477_v45 = vpop.f32.mrb[84].mxu1 }
 0x3b2   : > { %6552 = vmatmul.mubr.bf16.gmra.mrb[144].mxu0 %v2142_v43  ;;  %v1967_v46 = vadd.f32 %v6477_v45, %v7620_v59  ;;  %v1958_v47 = vpop.f32.mrb[85].mxu1 }
 0x3b3   : > { %v1959_v48 = vadd.f32 %v7620_v59, %v1958_v47  ;;  %v6478_v49 = vpop.f32.mrb[86].mxu1 }
 0x3b4   : > { %v1970_v50 = vadd.f32 %v6478_v49, %v7620_v59  ;;  %v1961_v51 = vpop.f32.mrb[87].mxu1 }
 0x3b5   : > { %v1962_v13 = vadd.f32 %v7620_v59, %v1961_v51 }
 0x3b6   : > { %v2144_v52 = vpack.c.bf16 %v1970_v50, %v1967_v46 }
 0x3b7   : > { %v2143_v53 = vpack.c.bf16 %v1962_v13, %v1959_v48 }
 0x3b9   : > { %6555 = vmatprep.mubr.bf16.mxu0 %v2143_v53  ;;  %v6481_v54 = vpop.f32.mrb[88].mxu1 }
 0x3ba   : > { %6556 = vmatmul.mubr.bf16.gmra.mrb[148].mxu0 %v2144_v52  ;;  %v1983_v56 = vadd.f32 %v6481_v54, %v7620_v59  ;;  %v1974_v57 = vpop.f32.mrb[89].mxu1 }
 0x3bb   : > { %v1975_v58 = vadd.f32 %v7620_v59, %v1974_v57  ;;  %v6482_v60 = vpop.f32.mrb[90].mxu1 }
 0x3bc   : > { %v1986_v61 = vadd.f32 %v6482_v60, %v7620_v59  ;;  %v1977_v62 = vpop.f32.mrb[91].mxu1 }
 0x3bd   : > { %v1978_v63 = vadd.f32 %v7620_v59, %v1977_v62 }
 0x3be   : > { %v2146_v0 = vpack.c.bf16 %v1986_v61, %v1983_v56 }
 0x3bf   : > { %v2145_v1 = vpack.c.bf16 %v1978_v63, %v1975_v58 }
 0x3c1   : > { %6559 = vmatprep.mubr.bf16.mxu0 %v2145_v1  ;;  %v6485_v2 = vpop.f32.mrb[92].mxu1 }
 0x3c2   : > { %6560 = vmatmul.mubr.bf16.gmra.mrb[152].mxu0 %v2146_v0  ;;  %v1999_v3 = vadd.f32 %v6485_v2, %v7620_v59  ;;  %v1990_v4 = vpop.f32.mrb[93].mxu1 }
 0x3c3   : > { %v1991_v5 = vadd.f32 %v7620_v59, %v1990_v4  ;;  %v6486_v6 = vpop.f32.mrb[94].mxu1 }
 0x3c4   : > { %v2002_v7 = vadd.f32 %v6486_v6, %v7620_v59  ;;  %v1993_v8 = vpop.f32.mrb[95].mxu1 }
 0x3c5   : > { %v1994_v36 = vadd.f32 %v7620_v59, %v1993_v8 }
 0x3c6   : > { %v2148_v9 = vpack.c.bf16 %v2002_v7, %v1999_v3 }
 0x3c7   : > { %v2147_v10 = vpack.c.bf16 %v1994_v36, %v1991_v5 }
 0x3c9   : > { %6563 = vmatprep.mubr.bf16.mxu0 %v2147_v10  ;;  %v6489_v11 = vpop.f32.mrb[96].mxu1 }
 0x3ca   : > { %6564 = vmatmul.mubr.bf16.gmra.mrb[156].mxu0 %v2148_v9  ;;  %v2015_v12 = vadd.f32 %v6489_v11, %v7620_v59  ;;  %v2006_v14 = vpop.f32.mrb[97].mxu1 }
 0x3cb   : > { %v2007_v15 = vadd.f32 %v7620_v59, %v2006_v14  ;;  %v6490_v16 = vpop.f32.mrb[98].mxu1 }
 0x3cc   : > { %v2018_v17 = vadd.f32 %v6490_v16, %v7620_v59  ;;  %v2009_v18 = vpop.f32.mrb[99].mxu1 }
 0x3cd   : > { %v2010_v19 = vadd.f32 %v7620_v59, %v2009_v18 }
 0x3ce   : > { %v2150_v20 = vpack.c.bf16 %v2018_v17, %v2015_v12 }
 0x3cf   : > { %v2149_v21 = vpack.c.bf16 %v2010_v19, %v2007_v15 }
 0x3d1   : > { %6567 = vmatprep.mubr.bf16.mxu0 %v2149_v21  ;;  %v6493_v22 = vpop.f32.mrb[100].mxu1 }
 0x3d2   : > { %6568 = vmatmul.mubr.bf16.gmra.mrb[160].mxu0 %v2150_v20  ;;  %v2031_v23 = vadd.f32 %v6493_v22, %v7620_v59  ;;  %v2022_v24 = vpop.f32.mrb[101].mxu1 }
 0x3d3   : > { %v2023_v25 = vadd.f32 %v7620_v59, %v2022_v24  ;;  %v6494_v26 = vpop.f32.mrb[102].mxu1 }
 0x3d4   : > { %v2034_v27 = vadd.f32 %v6494_v26, %v7620_v59  ;;  %v2025_v28 = vpop.f32.mrb[103].mxu1 }
 0x3d5   : > { %v2026_v29 = vadd.f32 %v7620_v59, %v2025_v28 }
 0x3d6   : > { %v2152_v55 = vpack.c.bf16 %v2034_v27, %v2031_v23 }
 0x3d7   : > { %v2151_v30 = vpack.c.bf16 %v2026_v29, %v2023_v25  ;;  %v6958_v29 = vld [vmem:[%s8690_s2 + $0x140] sm:$0xff]  }
 0x3d8   : > { %6679 = vmatprep.subr.bf16.mxu0 %v6958_v29 }
 0x3d9   : > { %6571 = vmatprep.mubr.bf16.mxu0 %v2151_v30  ;;  %v6497_v31 = vpop.f32.mrb[104].mxu1  ;;  %6680 = vmatpush3.bf16.msra.mxu0 %v6958_v29  ;;  %v6961_v30 = vld [vmem:[%s8690_s2 + $0x158] sm:$0xff]  }
 0x3da   : > { %6572 = vmatmul.mubr.bf16.gmra.mrb[164].mxu0 %v2152_v55  ;;  %v2047_v32 = vadd.f32 %v6497_v31, %v7620_v59  ;;  %v2038_v33 = vpop.f32.mrb[105].mxu1  ;;  %v6959_v55 = vld [vmem:[%s8690_s2 + $0x148] sm:$0xff]   ;;  %v6962_v31 = vld [vmem:[%s8690_s2 + $0x160] sm:$0xff]  }
 0x3db   : > { %v2039_v34 = vadd.f32 %v7620_v59, %v2038_v33  ;;  %v6498_v35 = vpop.f32.mrb[106].mxu1  ;;  %6681 = vmatprep.subr.bf16.mxu0 %v6959_v55  ;;  %v6964_v33 = vld [vmem:[%s8690_s2 + $0x170] sm:$0xff]  }
 0x3dc   : > { %v2050_v37 = vadd.f32 %v6498_v35, %v7620_v59  ;;  %v2041_v38 = vpop.f32.mrb[107].mxu1 }
 0x3dd   : > { %v2042_v39 = vadd.f32 %v7620_v59, %v2041_v38  ;;  %6682 = vmatpush3.bf16.msra.mxu0 %v6959_v55 }
 0x3de   : > { %v2154_v40 = vpack.c.bf16 %v2050_v37, %v2047_v32  ;;  %v6963_v32 = vld [vmem:[%s8690_s2 + $0x168] sm:$0xff]   ;;  %v6965_v37 = vld [vmem:[%s8690_s2 + $0x178] sm:$0xff]  }
 0x3df   : > { %v2153_v41 = vpack.c.bf16 %v2042_v39, %v2039_v34  ;;  %v7710_v34 = vld [vmem:[%s8691_s3 + $0x4] ss:$0 sm:$0xff] }
 0x3e1   : > { %6575 = vmatprep.mubr.bf16.mxu0 %v2153_v41  ;;  %v6501_v42 = vpop.f32.mrb[108].mxu1 }
 0x3e2   : > { %6576 = vmatmul.mubr.bf16.gmra.mrb[168].mxu0 %v2154_v40  ;;  %v2063_v43 = vadd.f32 %v6501_v42, %v7620_v59  ;;  %v2054_v44 = vpop.f32.mrb[109].mxu1 }
 0x3e3   : > { %v2055_v45 = vadd.f32 %v7620_v59, %v2054_v44  ;;  %v6502_v46 = vpop.f32.mrb[110].mxu1 }
 0x3e4   : > { %v2066_v47 = vadd.f32 %v6502_v46, %v7620_v59  ;;  %v2057_v48 = vpop.f32.mrb[111].mxu1 }
 0x3e5   : > { %v2058_v49 = vadd.f32 %v7620_v59, %v2057_v48 }
 0x3e6   : > { %v2156_v50 = vpack.c.bf16 %v2066_v47, %v2063_v43 }
 0x3e7   : > { %v2155_v51 = vpack.c.bf16 %v2058_v49, %v2055_v45 }
 0x3e9   : > { %6579 = vmatprep.mubr.bf16.mxu0 %v2155_v51  ;;  %v6505_v13 = vpop.f32.mrb[112].mxu1 }
 0x3ea   : > { %6580 = vmatmul.mubr.bf16.gmra.mrb[172].mxu0 %v2156_v50  ;;  %v2079_v52 = vadd.f32 %v6505_v13, %v7620_v59  ;;  %v2070_v53 = vpop.f32.mrb[113].mxu1 }
 0x3eb   : > { %v2071_v54 = vadd.f32 %v7620_v59, %v2070_v53  ;;  %v6506_v56 = vpop.f32.mrb[114].mxu1 }
 0x3ec   : > { %v2082_v57 = vadd.f32 %v6506_v56, %v7620_v59  ;;  %v2073_v58 = vpop.f32.mrb[115].mxu1 }
 0x3ed   : > { %v2074_v60 = vadd.f32 %v7620_v59, %v2073_v58 }
 0x3ee   : > { %v2158_v61 = vpack.c.bf16 %v2082_v57, %v2079_v52 }
 0x3ef   : > { %v2157_v62 = vpack.c.bf16 %v2074_v60, %v2071_v54 }
 0x3f1   : > { %6583 = vmatprep.mubr.bf16.mxu0 %v2157_v62  ;;  %v6509_v63 = vpop.f32.mrb[116].mxu1 }
 0x3f2   : > { %6584 = vmatmul.mubr.bf16.gmra.mrb[176].mxu0 %v2158_v61  ;;  %v2095_v0 = vadd.f32 %v6509_v63, %v7620_v59  ;;  %v2086_v1 = vpop.f32.mrb[117].mxu1 }
 0x3f3   : > { %v2087_v2 = vadd.f32 %v7620_v59, %v2086_v1  ;;  %v6510_v3 = vpop.f32.mrb[118].mxu1 }
 0x3f4   : > { %v2098_v4 = vadd.f32 %v6510_v3, %v7620_v59  ;;  %v2089_v5 = vpop.f32.mrb[119].mxu1 }
 0x3f5   : > { %v2090_v6 = vadd.f32 %v7620_v59, %v2089_v5 }
 0x3f6   : > { %v2160_v7 = vpack.c.bf16 %v2098_v4, %v2095_v0 }
 0x3f7   : > { %v2159_v8 = vpack.c.bf16 %v2090_v6, %v2087_v2 }
 0x3f9   : > { %6587 = vmatprep.mubr.bf16.mxu0 %v2159_v8  ;;  %v6513_v36 = vpop.f32.mrb[120].mxu1 }
 0x3fa   : > { %6588 = vmatmul.mubr.bf16.gmra.mrb[180].mxu0 %v2160_v7  ;;  %v2111_v9 = vadd.f32 %v6513_v36, %v7620_v59  ;;  %v2102_v10 = vpop.f32.mrb[121].mxu1 }
 0x3fb   : > { %v2103_v11 = vadd.f32 %v7620_v59, %v2102_v10  ;;  %v6514_v12 = vpop.f32.mrb[122].mxu1 }
 0x3fc   : > { %v2114_v14 = vadd.f32 %v6514_v12, %v7620_v59  ;;  %v2105_v15 = vpop.f32.mrb[123].mxu1 }
 0x3fd   : > { %v2106_v16 = vadd.f32 %v7620_v59, %v2105_v15 }
 0x3fe   : > { %v2162_v17 = vpack.c.bf16 %v2114_v14, %v2111_v9 }
 0x3ff   : > { %v2161_v18 = vpack.c.bf16 %v2106_v16, %v2103_v11 }
 0x401   : > { %6591 = vmatprep.mubr.bf16.mxu0 %v2161_v18  ;;  %v6517_v19 = vpop.f32.mrb[124].mxu1 }
 0x402   : > { %6592 = vmatmul.mubr.bf16.gmra.mrb[184].mxu0 %v2162_v17  ;;  %v2127_v20 = vadd.f32 %v6517_v19, %v7620_v59  ;;  %v2118_v21 = vpop.f32.mrb[125].mxu1 }
 0x403   : > { %v2119_v22 = vadd.f32 %v7620_v59, %v2118_v21  ;;  %v6518_v23 = vpop.f32.mrb[126].mxu1 }
 0x404   : > { %v2130_v24 = vadd.f32 %v6518_v23, %v7620_v59  ;;  %v2121_v25 = vpop.f32.mrb[127].mxu1 }
 0x405   : > { %v2122_v26 = vadd.f32 %v7620_v59, %v2121_v25  ;;  %v6960_v59 = vld [vmem:[%s8690_s2 + $0x150] sm:$0xff]  }
 0x406   : > { %v2164_v27 = vpack.c.bf16 %v2130_v24, %v2127_v20  ;;  %6683 = vmatprep.subr.bf16.mxu0 %v6960_v59 }
 0x407   : > { %v2163_v28 = vpack.c.bf16 %v2122_v26, %v2119_v22  ;;  %6684 = vmatpush3.bf16.msra.mxu0 %v6960_v59 }
 0x408   : > { %6685 = vmatprep.subr.bf16.mxu0 %v6961_v30 }
 0x409   : > { %6595 = vmatprep.mubr.bf16.mxu0 %v2163_v28 }
 0x40a   : > { %6596 = vmatmul.mubr.bf16.gmra.mrb[188].mxu0 %v2164_v27 }
 0x40b   : > { %6686 = vmatpush3.bf16.msra.mxu0 %v6961_v30 }
 0x40c   : > { %6687 = vmatprep.subr.bf16.mxu0 %v6962_v31 }
 0x40f   : > { %6688 = vmatpush3.bf16.msra.mxu0 %v6962_v31 }
 0x410   : > { %6689 = vmatprep.subr.bf16.mxu0 %v6963_v32 }
 0x413   : > { %6690 = vmatpush3.bf16.msra.mxu0 %v6963_v32 }
 0x414   : > { %6691 = vmatprep.subr.bf16.mxu0 %v6964_v33 }
 0x417   : > { %6692 = vmatpush3.bf16.msra.mxu0 %v6964_v33 }
 0x418   : > { %6693 = vmatprep.subr.bf16.mxu0 %v6965_v37 }
 0x41b   : > { %6694 = vmatpush3.bf16.msra.mxu0 %v6965_v37 }
 0x465   : > { %v6537_v35 = vpop.f32.mrb[128].mxu0 }
 0x466   : > { %v2278_v38 = vadd.f32 %v6537_v35, %v7710_v34  ;;  %v2269_v39 = vpop.f32.mrb[129].mxu0 }
 0x467   : > { %v2270_v40 = vadd.f32 %v7710_v34, %v2269_v39  ;;  %v6538_v41 = vpop.f32.mrb[130].mxu0 }
 0x468   : > { %v2281_v42 = vadd.f32 %v6538_v41, %v7710_v34  ;;  %v2272_v43 = vpop.f32.mrb[131].mxu0  ;;  %v2526_v45 = vmax.f32 %v2278_v38, 0.0 }
 0x469   : > { %v2273_v44 = vadd.f32 %v7710_v34, %v2272_v43  ;;  %v2524_v47 = vmax.f32 %v2270_v40, 0.0 }
 0x46a   : > { %v2527_v46 = vmax.f32 %v2281_v42, 0.0 }
 0x46b   : > { %v2525_v48 = vmax.f32 %v2273_v44, 0.0 }
 0x46c   : > { %v2589_v49 = vpack.c.bf16 %v2527_v46, %v2526_v45 }
 0x46d   : > { %v6541_v50 = vpop.f32.mrb[132].mxu0  ;;  %v2588_v51 = vpack.c.bf16 %v2525_v48, %v2524_v47 }
 0x46e   : > { %v2294_v13 = vadd.f32 %v6541_v50, %v7710_v34  ;;  %v2285_v52 = vpop.f32.mrb[133].mxu0 }
 0x46f   : > { %v2286_v53 = vadd.f32 %v7710_v34, %v2285_v52  ;;  %v6542_v54 = vpop.f32.mrb[134].mxu0  ;;  %6615 = vmatprep.mubr.bf16.mxu1 %v2588_v51 }
 0x470   : > { %v2297_v56 = vadd.f32 %v6542_v54, %v7710_v34  ;;  %v2288_v57 = vpop.f32.mrb[135].mxu0  ;;  %6616 = vmatmul.mubr.bf16.vlgmr.msra.gmra.mrb[128].mxu1 %v2589_v49  ;;  %v2530_v60 = vmax.f32 %v2294_v13, 0.0 }
 0x471   : > { %v2289_v58 = vadd.f32 %v7710_v34, %v2288_v57  ;;  %v2528_v62 = vmax.f32 %v2286_v53, 0.0 }
 0x472   : > { %v2531_v61 = vmax.f32 %v2297_v56, 0.0 }
 0x473   : > { %v2529_v63 = vmax.f32 %v2289_v58, 0.0 }
 0x474   : > { %v2591_v0 = vpack.c.bf16 %v2531_v61, %v2530_v60 }
 0x475   : > { %v2590_v1 = vpack.c.bf16 %v2529_v63, %v2528_v62  ;;  %v6545_v2 = vpop.f32.mrb[136].mxu0 }
 0x476   : > { %v2310_v3 = vadd.f32 %v6545_v2, %v7710_v34  ;;  %v2301_v4 = vpop.f32.mrb[137].mxu0 }
 0x477   : > { %v2302_v5 = vadd.f32 %v7710_v34, %v2301_v4  ;;  %v6546_v6 = vpop.f32.mrb[138].mxu0  ;;  %6619 = vmatprep.mubr.bf16.mxu1 %v2590_v1 }
 0x478   : > { %v2313_v7 = vadd.f32 %v6546_v6, %v7710_v34  ;;  %v2304_v8 = vpop.f32.mrb[139].mxu0  ;;  %6620 = vmatmul.mubr.bf16.gmra.mrb[132].mxu1 %v2591_v0  ;;  %v2534_v9 = vmax.f32 %v2310_v3, 0.0 }
 0x479   : > { %v2305_v36 = vadd.f32 %v7710_v34, %v2304_v8  ;;  %v2532_v11 = vmax.f32 %v2302_v5, 0.0 }
 0x47a   : > { %v2535_v10 = vmax.f32 %v2313_v7, 0.0 }
 0x47b   : > { %v2533_v12 = vmax.f32 %v2305_v36, 0.0 }
 0x47c   : > { %v2593_v14 = vpack.c.bf16 %v2535_v10, %v2534_v9 }
 0x47d   : > { %v2592_v15 = vpack.c.bf16 %v2533_v12, %v2532_v11  ;;  %v6549_v16 = vpop.f32.mrb[140].mxu0 }
 0x47e   : > { %v2326_v17 = vadd.f32 %v6549_v16, %v7710_v34  ;;  %v2317_v18 = vpop.f32.mrb[141].mxu0 }
 0x47f   : > { %v2318_v19 = vadd.f32 %v7710_v34, %v2317_v18  ;;  %v6550_v20 = vpop.f32.mrb[142].mxu0  ;;  %6623 = vmatprep.mubr.bf16.mxu1 %v2592_v15 }
 0x480   : > { %v2538_v21 = vmax.f32 %v2326_v17, 0.0  ;;  %v2329_v22 = vadd.f32 %v6550_v20, %v7710_v34  ;;  %v2320_v23 = vpop.f32.mrb[143].mxu0  ;;  %6624 = vmatmul.mubr.bf16.gmra.mrb[136].mxu1 %v2593_v14 }
 0x481   : > { %v2536_v24 = vmax.f32 %v2318_v19, 0.0  ;;  %v2321_v25 = vadd.f32 %v7710_v34, %v2320_v23 }
 0x482   : > { %v2539_v26 = vmax.f32 %v2329_v22, 0.0 }
 0x483   : > { %v2537_v27 = vmax.f32 %v2321_v25, 0.0 }
 0x484   : > { %v2595_v28 = vpack.c.bf16 %v2539_v26, %v2538_v21 }
 0x485   : > { %v2594_v29 = vpack.c.bf16 %v2537_v27, %v2536_v24  ;;  %v6553_v55 = vpop.f32.mrb[144].mxu0 }
 0x486   : > { %v2342_v59 = vadd.f32 %v6553_v55, %v7710_v34  ;;  %v2333_v30 = vpop.f32.mrb[145].mxu0 }
 0x487   : > { %v2334_v31 = vadd.f32 %v7710_v34, %v2333_v30  ;;  %6627 = vmatprep.mubr.bf16.mxu1 %v2594_v29  ;;  %v6554_v32 = vpop.f32.mrb[146].mxu0 }
 0x488   : > { %v2542_v33 = vmax.f32 %v2342_v59, 0.0  ;;  %v2345_v35 = vadd.f32 %v6554_v32, %v7710_v34  ;;  %6628 = vmatmul.mubr.bf16.gmra.mrb[140].mxu1 %v2595_v28  ;;  %v2336_v37 = vpop.f32.mrb[147].mxu0 }
 0x489   : > { %v2540_v38 = vmax.f32 %v2334_v31, 0.0  ;;  %v2337_v39 = vadd.f32 %v7710_v34, %v2336_v37 }
 0x48a   : > { %v2543_v40 = vmax.f32 %v2345_v35, 0.0 }
 0x48b   : > { %v2541_v41 = vmax.f32 %v2337_v39, 0.0 }
 0x48c   : > { %v2597_v42 = vpack.c.bf16 %v2543_v40, %v2542_v33 }
 0x48d   : > { %v2596_v43 = vpack.c.bf16 %v2541_v41, %v2540_v38  ;;  %v6557_v44 = vpop.f32.mrb[148].mxu0 }
 0x48e   : > { %v2358_v45 = vadd.f32 %v6557_v44, %v7710_v34  ;;  %v2349_v46 = vpop.f32.mrb[149].mxu0 }
 0x48f   : > { %6631 = vmatprep.mubr.bf16.mxu1 %v2596_v43  ;;  %v2350_v47 = vadd.f32 %v7710_v34, %v2349_v46  ;;  %v6558_v48 = vpop.f32.mrb[150].mxu0 }
 0x490   : > { %6632 = vmatmul.mubr.bf16.gmra.mrb[144].mxu1 %v2597_v42  ;;  %v2546_v49 = vmax.f32 %v2358_v45, 0.0  ;;  %v2361_v50 = vadd.f32 %v6558_v48, %v7710_v34  ;;  %v2352_v51 = vpop.f32.mrb[151].mxu0 }
 0x491   : > { %v2544_v13 = vmax.f32 %v2350_v47, 0.0  ;;  %v2353_v52 = vadd.f32 %v7710_v34, %v2352_v51 }
 0x492   : > { %v2547_v53 = vmax.f32 %v2361_v50, 0.0 }
 0x493   : > { %v2545_v54 = vmax.f32 %v2353_v52, 0.0 }
 0x494   : > { %v2599_v56 = vpack.c.bf16 %v2547_v53, %v2546_v49 }
 0x495   : > { %v2598_v57 = vpack.c.bf16 %v2545_v54, %v2544_v13  ;;  %v6561_v58 = vpop.f32.mrb[152].mxu0 }
 0x496   : > { %v2374_v60 = vadd.f32 %v6561_v58, %v7710_v34  ;;  %v2365_v61 = vpop.f32.mrb[153].mxu0 }
 0x497   : > { %6635 = vmatprep.mubr.bf16.mxu1 %v2598_v57  ;;  %v2366_v62 = vadd.f32 %v7710_v34, %v2365_v61  ;;  %v6562_v63 = vpop.f32.mrb[154].mxu0 }
 0x498   : > { %6636 = vmatmul.mubr.bf16.gmra.mrb[148].mxu1 %v2599_v56  ;;  %v2550_v0 = vmax.f32 %v2374_v60, 0.0  ;;  %v2377_v1 = vadd.f32 %v6562_v63, %v7710_v34  ;;  %v2368_v2 = vpop.f32.mrb[155].mxu0 }
 0x499   : > { %v2548_v3 = vmax.f32 %v2366_v62, 0.0  ;;  %v2369_v4 = vadd.f32 %v7710_v34, %v2368_v2 }
 0x49a   : > { %v2551_v5 = vmax.f32 %v2377_v1, 0.0 }
 0x49b   : > { %v2549_v6 = vmax.f32 %v2369_v4, 0.0 }
 0x49c   : > { %v2601_v7 = vpack.c.bf16 %v2551_v5, %v2550_v0 }
 0x49d   : > { %v2600_v8 = vpack.c.bf16 %v2549_v6, %v2548_v3  ;;  %v6565_v36 = vpop.f32.mrb[156].mxu0 }
 0x49e   : > { %v2390_v9 = vadd.f32 %v6565_v36, %v7710_v34  ;;  %v2381_v10 = vpop.f32.mrb[157].mxu0 }
 0x49f   : > { %6639 = vmatprep.mubr.bf16.mxu1 %v2600_v8  ;;  %v2382_v11 = vadd.f32 %v7710_v34, %v2381_v10  ;;  %v6566_v12 = vpop.f32.mrb[158].mxu0 }
 0x4a0   : > { %6640 = vmatmul.mubr.bf16.gmra.mrb[152].mxu1 %v2601_v7  ;;  %v2554_v14 = vmax.f32 %v2390_v9, 0.0  ;;  %v2393_v15 = vadd.f32 %v6566_v12, %v7710_v34  ;;  %v2384_v16 = vpop.f32.mrb[159].mxu0 }
 0x4a1   : > { %v2552_v17 = vmax.f32 %v2382_v11, 0.0  ;;  %v2385_v18 = vadd.f32 %v7710_v34, %v2384_v16 }
 0x4a2   : > { %v2555_v19 = vmax.f32 %v2393_v15, 0.0 }
 0x4a3   : > { %v2553_v20 = vmax.f32 %v2385_v18, 0.0 }
 0x4a4   : > { %v2603_v21 = vpack.c.bf16 %v2555_v19, %v2554_v14 }
 0x4a5   : > { %v2602_v22 = vpack.c.bf16 %v2553_v20, %v2552_v17  ;;  %v6569_v23 = vpop.f32.mrb[160].mxu0 }
 0x4a6   : > { %v2406_v24 = vadd.f32 %v6569_v23, %v7710_v34  ;;  %v2397_v25 = vpop.f32.mrb[161].mxu0 }
 0x4a7   : > { %6643 = vmatprep.mubr.bf16.mxu1 %v2602_v22  ;;  %v2398_v26 = vadd.f32 %v7710_v34, %v2397_v25  ;;  %v6570_v27 = vpop.f32.mrb[162].mxu0 }
 0x4a8   : > { %6644 = vmatmul.mubr.bf16.gmra.mrb[156].mxu1 %v2603_v21  ;;  %v2558_v28 = vmax.f32 %v2406_v24, 0.0  ;;  %v2409_v29 = vadd.f32 %v6570_v27, %v7710_v34  ;;  %v2400_v55 = vpop.f32.mrb[163].mxu0 }
 0x4a9   : > { %v2556_v59 = vmax.f32 %v2398_v26, 0.0  ;;  %v2401_v30 = vadd.f32 %v7710_v34, %v2400_v55 }
 0x4aa   : > { %v2559_v31 = vmax.f32 %v2409_v29, 0.0 }
 0x4ab   : > { %v2557_v32 = vmax.f32 %v2401_v30, 0.0 }
 0x4ac   : > { %v2605_v33 = vpack.c.bf16 %v2559_v31, %v2558_v28 }
 0x4ad   : > { %v2604_v35 = vpack.c.bf16 %v2557_v32, %v2556_v59  ;;  %v6573_v37 = vpop.f32.mrb[164].mxu0 }
 0x4ae   : > { %v2422_v38 = vadd.f32 %v6573_v37, %v7710_v34  ;;  %v2413_v39 = vpop.f32.mrb[165].mxu0 }
 0x4af   : > { %6647 = vmatprep.mubr.bf16.mxu1 %v2604_v35  ;;  %v2414_v40 = vadd.f32 %v7710_v34, %v2413_v39  ;;  %v6574_v41 = vpop.f32.mrb[166].mxu0 }
 0x4b0   : > { %6648 = vmatmul.mubr.bf16.gmra.mrb[160].mxu1 %v2605_v33  ;;  %v2562_v42 = vmax.f32 %v2422_v38, 0.0  ;;  %v2425_v43 = vadd.f32 %v6574_v41, %v7710_v34  ;;  %v2416_v44 = vpop.f32.mrb[167].mxu0 }
 0x4b1   : > { %v2560_v45 = vmax.f32 %v2414_v40, 0.0  ;;  %v2417_v46 = vadd.f32 %v7710_v34, %v2416_v44 }
 0x4b2   : > { %v2563_v47 = vmax.f32 %v2425_v43, 0.0 }
 0x4b3   : > { %v2561_v48 = vmax.f32 %v2417_v46, 0.0 }
 0x4b4   : > { %v2607_v49 = vpack.c.bf16 %v2563_v47, %v2562_v42 }
 0x4b5   : > { %v2606_v50 = vpack.c.bf16 %v2561_v48, %v2560_v45  ;;  %v6577_v51 = vpop.f32.mrb[168].mxu0 }
 0x4b6   : > { %v2438_v13 = vadd.f32 %v6577_v51, %v7710_v34  ;;  %v2429_v52 = vpop.f32.mrb[169].mxu0 }
 0x4b7   : > { %6651 = vmatprep.mubr.bf16.mxu1 %v2606_v50  ;;  %v2430_v53 = vadd.f32 %v7710_v34, %v2429_v52  ;;  %v6578_v54 = vpop.f32.mrb[170].mxu0 }
 0x4b8   : > { %6652 = vmatmul.mubr.bf16.gmra.mrb[164].mxu1 %v2607_v49  ;;  %v2566_v56 = vmax.f32 %v2438_v13, 0.0  ;;  %v2441_v57 = vadd.f32 %v6578_v54, %v7710_v34  ;;  %v2432_v58 = vpop.f32.mrb[171].mxu0 }
 0x4b9   : > { %v2564_v60 = vmax.f32 %v2430_v53, 0.0  ;;  %v2433_v61 = vadd.f32 %v7710_v34, %v2432_v58 }
 0x4ba   : > { %v2567_v62 = vmax.f32 %v2441_v57, 0.0 }
 0x4bb   : > { %v2565_v63 = vmax.f32 %v2433_v61, 0.0 }
 0x4bc   : > { %v2609_v0 = vpack.c.bf16 %v2567_v62, %v2566_v56 }
 0x4bd   : > { %v2608_v1 = vpack.c.bf16 %v2565_v63, %v2564_v60  ;;  %v6581_v2 = vpop.f32.mrb[172].mxu0 }
 0x4be   : > { %v2454_v3 = vadd.f32 %v6581_v2, %v7710_v34  ;;  %v2445_v4 = vpop.f32.mrb[173].mxu0 }
 0x4bf   : > { %6655 = vmatprep.mubr.bf16.mxu1 %v2608_v1  ;;  %v2446_v5 = vadd.f32 %v7710_v34, %v2445_v4  ;;  %v6582_v6 = vpop.f32.mrb[174].mxu0 }
 0x4c0   : > { %6656 = vmatmul.mubr.bf16.gmra.mrb[168].mxu1 %v2609_v0  ;;  %v2570_v7 = vmax.f32 %v2454_v3, 0.0  ;;  %v2457_v8 = vadd.f32 %v6582_v6, %v7710_v34  ;;  %v2448_v36 = vpop.f32.mrb[175].mxu0 }
 0x4c1   : > { %v2568_v9 = vmax.f32 %v2446_v5, 0.0  ;;  %v2449_v10 = vadd.f32 %v7710_v34, %v2448_v36  ;;  %v6966_v36 = vld [vmem:[%s8690_s2 + $0x180] sm:$0xff]  }
 0x4c2   : > { %v2571_v11 = vmax.f32 %v2457_v8, 0.0  ;;  %6759 = vmatprep.subr.bf16.mxu1 %v6966_v36 }
 0x4c3   : > { %v2569_v12 = vmax.f32 %v2449_v10, 0.0  ;;  %6760 = vmatpush3.bf16.msra.mxu1 %v6966_v36  ;;  %v6969_v10 = vld [vmem:[%s8690_s2 + $0x198] sm:$0xff]  }
 0x4c4   : > { %v2611_v14 = vpack.c.bf16 %v2571_v11, %v2570_v7  ;;  %v6970_v11 = vld [vmem:[%s8690_s2 + $0x1a0] sm:$0xff]  }
 0x4c5   : > { %v2610_v15 = vpack.c.bf16 %v2569_v12, %v2568_v9  ;;  %v6585_v16 = vpop.f32.mrb[176].mxu0  ;;  %v6967_v9 = vld [vmem:[%s8690_s2 + $0x188] sm:$0xff]  }
 0x4c6   : > { %v2470_v17 = vadd.f32 %v6585_v16, %v7710_v34  ;;  %v2461_v18 = vpop.f32.mrb[177].mxu0  ;;  %6761 = vmatprep.subr.bf16.mxu1 %v6967_v9  ;;  %v6971_v12 = vld [vmem:[%s8690_s2 + $0x1a8] sm:$0xff]  }
 0x4c7   : > { %6659 = vmatprep.mubr.bf16.mxu1 %v2610_v15  ;;  %v2462_v19 = vadd.f32 %v7710_v34, %v2461_v18  ;;  %v6586_v20 = vpop.f32.mrb[178].mxu0  ;;  %6762 = vmatpush3.bf16.msra.mxu1 %v6967_v9  ;;  %v6973_v15 = vld [vmem:[%s8690_s2 + $0x1b8] sm:$0xff]  }
 0x4c8   : > { %6660 = vmatmul.mubr.bf16.gmra.mrb[172].mxu1 %v2611_v14  ;;  %v2574_v21 = vmax.f32 %v2470_v17, 0.0  ;;  %v2473_v22 = vadd.f32 %v6586_v20, %v7710_v34  ;;  %v2464_v23 = vpop.f32.mrb[179].mxu0  ;;  %v6972_v14 = vld [vmem:[%s8690_s2 + $0x1b0] sm:$0xff]   ;;  %v7806_v17 = vld [vmem:[%s8691_s3 + $0x5] ss:$0 sm:$0xff] }
 0x4c9   : > { %v2572_v24 = vmax.f32 %v2462_v19, 0.0  ;;  %v2465_v25 = vadd.f32 %v7710_v34, %v2464_v23 }
 0x4ca   : > { %v2575_v26 = vmax.f32 %v2473_v22, 0.0 }
 0x4cb   : > { %v2573_v27 = vmax.f32 %v2465_v25, 0.0 }
 0x4cc   : > { %v2613_v28 = vpack.c.bf16 %v2575_v26, %v2574_v21 }
 0x4cd   : > { %v2612_v29 = vpack.c.bf16 %v2573_v27, %v2572_v24  ;;  %v6589_v55 = vpop.f32.mrb[180].mxu0 }
 0x4ce   : > { %v2486_v59 = vadd.f32 %v6589_v55, %v7710_v34  ;;  %v2477_v30 = vpop.f32.mrb[181].mxu0 }
 0x4cf   : > { %6663 = vmatprep.mubr.bf16.mxu1 %v2612_v29  ;;  %v2478_v31 = vadd.f32 %v7710_v34, %v2477_v30  ;;  %v6590_v32 = vpop.f32.mrb[182].mxu0 }
 0x4d0   : > { %6664 = vmatmul.mubr.bf16.gmra.mrb[176].mxu1 %v2613_v28  ;;  %v2578_v33 = vmax.f32 %v2486_v59, 0.0  ;;  %v2489_v35 = vadd.f32 %v6590_v32, %v7710_v34  ;;  %v2480_v37 = vpop.f32.mrb[183].mxu0 }
 0x4d1   : > { %v2576_v38 = vmax.f32 %v2478_v31, 0.0  ;;  %v2481_v39 = vadd.f32 %v7710_v34, %v2480_v37 }
 0x4d2   : > { %v2579_v40 = vmax.f32 %v2489_v35, 0.0 }
 0x4d3   : > { %v2577_v41 = vmax.f32 %v2481_v39, 0.0 }
 0x4d4   : > { %v2615_v42 = vpack.c.bf16 %v2579_v40, %v2578_v33 }
 0x4d5   : > { %v2614_v43 = vpack.c.bf16 %v2577_v41, %v2576_v38  ;;  %v6593_v44 = vpop.f32.mrb[184].mxu0 }
 0x4d6   : > { %v2502_v45 = vadd.f32 %v6593_v44, %v7710_v34  ;;  %v2493_v46 = vpop.f32.mrb[185].mxu0 }
 0x4d7   : > { %6667 = vmatprep.mubr.bf16.mxu1 %v2614_v43  ;;  %v2494_v47 = vadd.f32 %v7710_v34, %v2493_v46  ;;  %v6594_v48 = vpop.f32.mrb[186].mxu0 }
 0x4d8   : > { %6668 = vmatmul.mubr.bf16.gmra.mrb[180].mxu1 %v2615_v42  ;;  %v2582_v49 = vmax.f32 %v2502_v45, 0.0  ;;  %v2505_v50 = vadd.f32 %v6594_v48, %v7710_v34  ;;  %v2496_v51 = vpop.f32.mrb[187].mxu0 }
 0x4d9   : > { %v2580_v13 = vmax.f32 %v2494_v47, 0.0  ;;  %v2497_v52 = vadd.f32 %v7710_v34, %v2496_v51 }
 0x4da   : > { %v2583_v53 = vmax.f32 %v2505_v50, 0.0 }
 0x4db   : > { %v2581_v54 = vmax.f32 %v2497_v52, 0.0 }
 0x4dc   : > { %v2617_v56 = vpack.c.bf16 %v2583_v53, %v2582_v49 }
 0x4dd   : > { %v2616_v57 = vpack.c.bf16 %v2581_v54, %v2580_v13  ;;  %v6597_v58 = vpop.f32.mrb[188].mxu0 }
 0x4de   : > { %v2518_v60 = vadd.f32 %v6597_v58, %v7710_v34  ;;  %v2509_v61 = vpop.f32.mrb[189].mxu0 }
 0x4df   : > { %6671 = vmatprep.mubr.bf16.mxu1 %v2616_v57  ;;  %v2510_v62 = vadd.f32 %v7710_v34, %v2509_v61  ;;  %v6598_v63 = vpop.f32.mrb[190].mxu0 }
 0x4e0   : > { %6672 = vmatmul.mubr.bf16.gmra.mrb[184].mxu1 %v2617_v56  ;;  %v2586_v0 = vmax.f32 %v2518_v60, 0.0  ;;  %v2521_v1 = vadd.f32 %v6598_v63, %v7710_v34  ;;  %v2512_v2 = vpop.f32.mrb[191].mxu0 }
 0x4e1   : > { %v2584_v3 = vmax.f32 %v2510_v62, 0.0  ;;  %v2513_v4 = vadd.f32 %v7710_v34, %v2512_v2  ;;  %v6968_v34 = vld [vmem:[%s8690_s2 + $0x190] sm:$0xff]  }
 0x4e2   : > { %v2587_v5 = vmax.f32 %v2521_v1, 0.0  ;;  %6763 = vmatprep.subr.bf16.mxu1 %v6968_v34 }
 0x4e3   : > { %v2585_v6 = vmax.f32 %v2513_v4, 0.0  ;;  %6764 = vmatpush3.bf16.msra.mxu1 %v6968_v34 }
 0x4e4   : > { %v2619_v7 = vpack.c.bf16 %v2587_v5, %v2586_v0  ;;  %6765 = vmatprep.subr.bf16.mxu1 %v6969_v10 }
 0x4e5   : > { %v2618_v8 = vpack.c.bf16 %v2585_v6, %v2584_v3 }
 0x4e7   : > { %6675 = vmatprep.mubr.bf16.mxu1 %v2618_v8  ;;  %6766 = vmatpush3.bf16.msra.mxu1 %v6969_v10 }
 0x4e8   : > { %6676 = vmatmul.mubr.bf16.gmra.mrb[188].mxu1 %v2619_v7  ;;  %6767 = vmatprep.subr.bf16.mxu1 %v6970_v11 }
 0x4eb   : > { %6768 = vmatpush3.bf16.msra.mxu1 %v6970_v11 }
 0x4ec   : > { %6769 = vmatprep.subr.bf16.mxu1 %v6971_v12 }
 0x4ef   : > { %6770 = vmatpush3.bf16.msra.mxu1 %v6971_v12 }
 0x4f0   : > { %6771 = vmatprep.subr.bf16.mxu1 %v6972_v14 }
 0x4f3   : > { %6772 = vmatpush3.bf16.msra.mxu1 %v6972_v14 }
 0x4f4   : > { %6773 = vmatprep.subr.bf16.mxu1 %v6973_v15 }
 0x4f7   : > { %6774 = vmatpush3.bf16.msra.mxu1 %v6973_v15 }
 0x543   : > { %v6617_v16 = vpop.f32.mrb[128].mxu1 }
 0x544   : > { %v2724_v18 = vpop.f32.mrb[129].mxu1  ;;  %v2733_v20 = vadd.f32 %v6617_v16, %v7806_v17 }
 0x545   : > { %v6618_v19 = vpop.f32.mrb[130].mxu1  ;;  %v2725_v23 = vadd.f32 %v7806_v17, %v2724_v18 }
 0x546   : > { %v2736_v21 = vadd.f32 %v6618_v19, %v7806_v17  ;;  %v2727_v22 = vpop.f32.mrb[131].mxu1 }
 0x547   : > { %v2728_v24 = vadd.f32 %v7806_v17, %v2727_v22 }
 0x548   : > { %v2980_v25 = vpack.c.bf16 %v2736_v21, %v2733_v20 }
 0x549   : > { %v2979_v26 = vpack.c.bf16 %v2728_v24, %v2725_v23 }
 0x54b   : > { %v6621_v27 = vpop.f32.mrb[132].mxu1  ;;  %6695 = vmatprep.mubr.bf16.mxu0 %v2979_v26 }
 0x54c   : > { %v2740_v28 = vpop.f32.mrb[133].mxu1  ;;  %6696 = vmatmul.mubr.bf16.vlgmr.msra.gmra.mrb[192].mxu0 %v2980_v25  ;;  %v2749_v55 = vadd.f32 %v6621_v27, %v7806_v17 }
 0x54d   : > { %v6622_v29 = vpop.f32.mrb[134].mxu1  ;;  %v2741_v31 = vadd.f32 %v7806_v17, %v2740_v28 }
 0x54e   : > { %v2752_v59 = vadd.f32 %v6622_v29, %v7806_v17  ;;  %v2743_v30 = vpop.f32.mrb[135].mxu1 }
 0x54f   : > { %v2744_v32 = vadd.f32 %v7806_v17, %v2743_v30 }
 0x550   : > { %v2982_v33 = vpack.c.bf16 %v2752_v59, %v2749_v55 }
 0x551   : > { %v2981_v35 = vpack.c.bf16 %v2744_v32, %v2741_v31 }
 0x553   : > { %v6625_v37 = vpop.f32.mrb[136].mxu1  ;;  %6699 = vmatprep.mubr.bf16.mxu0 %v2981_v35 }
 0x554   : > { %v2756_v38 = vpop.f32.mrb[137].mxu1  ;;  %6700 = vmatmul.mubr.bf16.gmra.mrb[196].mxu0 %v2982_v33  ;;  %v2765_v40 = vadd.f32 %v6625_v37, %v7806_v17 }
 0x555   : > { %v6626_v39 = vpop.f32.mrb[138].mxu1  ;;  %v2757_v43 = vadd.f32 %v7806_v17, %v2756_v38 }
 0x556   : > { %v2768_v41 = vadd.f32 %v6626_v39, %v7806_v17  ;;  %v2759_v42 = vpop.f32.mrb[139].mxu1 }
 0x557   : > { %v2760_v44 = vadd.f32 %v7806_v17, %v2759_v42 }
 0x558   : > { %v2984_v45 = vpack.c.bf16 %v2768_v41, %v2765_v40 }
 0x559   : > { %v2983_v46 = vpack.c.bf16 %v2760_v44, %v2757_v43 }
 0x55b   : > { %v6629_v47 = vpop.f32.mrb[140].mxu1  ;;  %6703 = vmatprep.mubr.bf16.mxu0 %v2983_v46 }
 0x55c   : > { %v2781_v48 = vadd.f32 %v6629_v47, %v7806_v17  ;;  %v2772_v49 = vpop.f32.mrb[141].mxu1  ;;  %6704 = vmatmul.mubr.bf16.gmra.mrb[200].mxu0 %v2984_v45 }
 0x55d   : > { %v2773_v50 = vadd.f32 %v7806_v17, %v2772_v49  ;;  %v6630_v51 = vpop.f32.mrb[142].mxu1 }
 0x55e   : > { %v2784_v13 = vadd.f32 %v6630_v51, %v7806_v17  ;;  %v2775_v52 = vpop.f32.mrb[143].mxu1 }
 0x55f   : > { %v2776_v53 = vadd.f32 %v7806_v17, %v2775_v52 }
 0x560   : > { %v2986_v54 = vpack.c.bf16 %v2784_v13, %v2781_v48 }
 0x561   : > { %v2985_v56 = vpack.c.bf16 %v2776_v53, %v2773_v50 }
 0x563   : > { %6707 = vmatprep.mubr.bf16.mxu0 %v2985_v56  ;;  %v6633_v57 = vpop.f32.mrb[144].mxu1 }
 0x564   : > { %v2797_v58 = vadd.f32 %v6633_v57, %v7806_v17  ;;  %6708 = vmatmul.mubr.bf16.gmra.mrb[204].mxu0 %v2986_v54  ;;  %v2788_v60 = vpop.f32.mrb[145].mxu1 }
 0x565   : > { %v2789_v61 = vadd.f32 %v7806_v17, %v2788_v60  ;;  %v6634_v62 = vpop.f32.mrb[146].mxu1 }
 0x566   : > { %v2800_v63 = vadd.f32 %v6634_v62, %v7806_v17  ;;  %v2791_v0 = vpop.f32.mrb[147].mxu1 }
 0x567   : > { %v2792_v1 = vadd.f32 %v7806_v17, %v2791_v0 }
 0x568   : > { %v2988_v2 = vpack.c.bf16 %v2800_v63, %v2797_v58 }
 0x569   : > { %v2987_v3 = vpack.c.bf16 %v2792_v1, %v2789_v61 }
 0x56b   : > { %6711 = vmatprep.mubr.bf16.mxu0 %v2987_v3  ;;  %v6637_v4 = vpop.f32.mrb[148].mxu1 }
 0x56c   : > { %6712 = vmatmul.mubr.bf16.gmra.mrb[208].mxu0 %v2988_v2  ;;  %v2813_v5 = vadd.f32 %v6637_v4, %v7806_v17  ;;  %v2804_v6 = vpop.f32.mrb[149].mxu1 }
 0x56d   : > { %v2805_v7 = vadd.f32 %v7806_v17, %v2804_v6  ;;  %v6638_v8 = vpop.f32.mrb[150].mxu1 }
 0x56e   : > { %v2816_v36 = vadd.f32 %v6638_v8, %v7806_v17  ;;  %v2807_v9 = vpop.f32.mrb[151].mxu1 }
 0x56f   : > { %v2808_v34 = vadd.f32 %v7806_v17, %v2807_v9 }
 0x570   : > { %v2990_v10 = vpack.c.bf16 %v2816_v36, %v2813_v5 }
 0x571   : > { %v2989_v11 = vpack.c.bf16 %v2808_v34, %v2805_v7 }
 0x573   : > { %6715 = vmatprep.mubr.bf16.mxu0 %v2989_v11  ;;  %v6641_v12 = vpop.f32.mrb[152].mxu1 }
 0x574   : > { %6716 = vmatmul.mubr.bf16.gmra.mrb[212].mxu0 %v2990_v10  ;;  %v2829_v14 = vadd.f32 %v6641_v12, %v7806_v17  ;;  %v2820_v15 = vpop.f32.mrb[153].mxu1 }
 0x575   : > { %v2821_v16 = vadd.f32 %v7806_v17, %v2820_v15  ;;  %v6642_v18 = vpop.f32.mrb[154].mxu1 }
 0x576   : > { %v2832_v19 = vadd.f32 %v6642_v18, %v7806_v17  ;;  %v2823_v20 = vpop.f32.mrb[155].mxu1 }
 0x577   : > { %v2824_v21 = vadd.f32 %v7806_v17, %v2823_v20 }
 0x578   : > { %v2992_v22 = vpack.c.bf16 %v2832_v19, %v2829_v14 }
 0x579   : > { %v2991_v23 = vpack.c.bf16 %v2824_v21, %v2821_v16 }
 0x57b   : > { %6719 = vmatprep.mubr.bf16.mxu0 %v2991_v23  ;;  %v6645_v24 = vpop.f32.mrb[156].mxu1 }
 0x57c   : > { %6720 = vmatmul.mubr.bf16.gmra.mrb[216].mxu0 %v2992_v22  ;;  %v2845_v25 = vadd.f32 %v6645_v24, %v7806_v17  ;;  %v2836_v26 = vpop.f32.mrb[157].mxu1 }
 0x57d   : > { %v2837_v27 = vadd.f32 %v7806_v17, %v2836_v26  ;;  %v6646_v28 = vpop.f32.mrb[158].mxu1 }
 0x57e   : > { %v2848_v29 = vadd.f32 %v6646_v28, %v7806_v17  ;;  %v2839_v55 = vpop.f32.mrb[159].mxu1 }
 0x57f   : > { %v2840_v59 = vadd.f32 %v7806_v17, %v2839_v55 }
 0x580   : > { %v2994_v30 = vpack.c.bf16 %v2848_v29, %v2845_v25 }
 0x581   : > { %v2993_v31 = vpack.c.bf16 %v2840_v59, %v2837_v27 }
 0x583   : > { %6723 = vmatprep.mubr.bf16.mxu0 %v2993_v31  ;;  %v6649_v32 = vpop.f32.mrb[160].mxu1 }
 0x584   : > { %6724 = vmatmul.mubr.bf16.gmra.mrb[220].mxu0 %v2994_v30  ;;  %v2861_v33 = vadd.f32 %v6649_v32, %v7806_v17  ;;  %v2852_v35 = vpop.f32.mrb[161].mxu1 }
 0x585   : > { %v2853_v37 = vadd.f32 %v7806_v17, %v2852_v35  ;;  %v6650_v38 = vpop.f32.mrb[162].mxu1 }
 0x586   : > { %v2864_v39 = vadd.f32 %v6650_v38, %v7806_v17  ;;  %v2855_v40 = vpop.f32.mrb[163].mxu1 }
 0x587   : > { %v2856_v41 = vadd.f32 %v7806_v17, %v2855_v40 }
 0x588   : > { %v2996_v42 = vpack.c.bf16 %v2864_v39, %v2861_v33 }
 0x589   : > { %v2995_v43 = vpack.c.bf16 %v2856_v41, %v2853_v37 }
 0x58b   : > { %6727 = vmatprep.mubr.bf16.mxu0 %v2995_v43  ;;  %v6653_v44 = vpop.f32.mrb[164].mxu1 }
 0x58c   : > { %6728 = vmatmul.mubr.bf16.gmra.mrb[224].mxu0 %v2996_v42  ;;  %v2877_v45 = vadd.f32 %v6653_v44, %v7806_v17  ;;  %v2868_v46 = vpop.f32.mrb[165].mxu1 }
 0x58d   : > { %v2869_v47 = vadd.f32 %v7806_v17, %v2868_v46  ;;  %v6654_v48 = vpop.f32.mrb[166].mxu1 }
 0x58e   : > { %v2880_v49 = vadd.f32 %v6654_v48, %v7806_v17  ;;  %v2871_v50 = vpop.f32.mrb[167].mxu1 }
 0x58f   : > { %v2872_v51 = vadd.f32 %v7806_v17, %v2871_v50 }
 0x590   : > { %v2998_v13 = vpack.c.bf16 %v2880_v49, %v2877_v45 }
 0x591   : > { %v2997_v52 = vpack.c.bf16 %v2872_v51, %v2869_v47  ;;  %v6974_v51 = vld [vmem:[%s8692_s4] ss:$8 sps:$4 sm:$0xff]  }
 0x593   : > { %6731 = vmatprep.mubr.bf16.mxu0 %v2997_v52  ;;  %v6657_v53 = vpop.f32.mrb[168].mxu1  ;;  %v6977_v52 = vld [vmem:[%s8692_s4 + $0x10] ss:$8 sps:$4 sm:$0xff]  }
 0x594   : > { %6732 = vmatmul.mubr.bf16.gmra.mrb[228].mxu0 %v2998_v13  ;;  %v2893_v54 = vadd.f32 %v6657_v53, %v7806_v17  ;;  %v2884_v56 = vpop.f32.mrb[169].mxu1  ;;  %v6976_v13 = vld [vmem:[%s8692_s4 + $0x4] ss:$8 sps:$4 sm:$0xff]   ;;  %v6980_v53 = vld [vmem:[%s8692_s4 + $0x20] ss:$8 sps:$4 sm:$0xff]  }
 0x595   : > { %v2885_v57 = vadd.f32 %v7806_v17, %v2884_v56  ;;  %v6658_v58 = vpop.f32.mrb[170].mxu1  ;;  %3965 = vmatprep.subr.bf16.mxu0 %v6976_v13  ;;  %v6983_v56 = vld [vmem:[%s8692_s4 + $0x30] ss:$8 sps:$4 sm:$0xff]  }
 0x596   : > { %v2896_v60 = vadd.f32 %v6658_v58, %v7806_v17  ;;  %v2887_v61 = vpop.f32.mrb[171].mxu1  ;;  %3966 = vmatpush1.bf16.msra.mxu0 %v6974_v51  ;;  %v6986_v58 = vld [vmem:[%s8692_s4 + $0x40] ss:$8 sps:$4 sm:$0xff]  }
 0x597   : > { %v2888_v62 = vadd.f32 %v7806_v17, %v2887_v61  ;;  %v6989_v61 = vld [vmem:[%s8692_s4 + $0x50] ss:$8 sps:$4 sm:$0xff]  }
 0x598   : > { %v3000_v63 = vpack.c.bf16 %v2896_v60, %v2893_v54  ;;  %v6982_v54 = vld [vmem:[%s8692_s4 + $0x24] ss:$8 sps:$4 sm:$0xff]  }
 0x599   : > { %v2999_v0 = vpack.c.bf16 %v2888_v62, %v2885_v57  ;;  %v6985_v57 = vld [vmem:[%s8692_s4 + $0x34] ss:$8 sps:$4 sm:$0xff]   ;;  %v6988_v60 = vld [vmem:[%s8692_s4 + $0x44] ss:$8 sps:$4 sm:$0xff]  }
 0x59a   : > { %v6991_v62 = vld [vmem:[%s8692_s4 + $0x54] ss:$8 sps:$4 sm:$0xff]  }
 0x59b   : > { %6735 = vmatprep.mubr.bf16.mxu0 %v2999_v0  ;;  %v6661_v1 = vpop.f32.mrb[172].mxu1  ;;  %v6994_v0 = vld [vmem:[%s8692_s4 + $0x64] ss:$8 sps:$4 sm:$0xff]  }
 0x59c   : > { %6736 = vmatmul.mubr.bf16.gmra.mrb[232].mxu0 %v3000_v63  ;;  %v2909_v2 = vadd.f32 %v6661_v1, %v7806_v17  ;;  %v2900_v3 = vpop.f32.mrb[173].mxu1  ;;  %v6992_v63 = vld [vmem:[%s8692_s4 + $0x60] ss:$8 sps:$4 sm:$0xff]   ;;  %v7917_v1 = vld [vmem:[%s8691_s3 + $0x6] ss:$0 sm:$0xff] }
 0x59d   : > { %v2901_v4 = vadd.f32 %v7806_v17, %v2900_v3  ;;  %v6662_v5 = vpop.f32.mrb[174].mxu1  ;;  %v6995_v3 = vld [vmem:[%s8692_s4 + $0x70] ss:$8 sps:$4 sm:$0xff]  }
 0x59e   : > { %v2912_v6 = vadd.f32 %v6662_v5, %v7806_v17  ;;  %v2903_v7 = vpop.f32.mrb[175].mxu1 }
 0x59f   : > { %v2904_v8 = vadd.f32 %v7806_v17, %v2903_v7 }
 0x5a0   : > { %v3002_v36 = vpack.c.bf16 %v2912_v6, %v2909_v2 }
 0x5a1   : > { %v3001_v9 = vpack.c.bf16 %v2904_v8, %v2901_v4  ;;  %v6997_v4 = vld [vmem:[%s8692_s4 + $0x74] ss:$8 sps:$4 sm:$0xff]  }
 0x5a3   : > { %6739 = vmatprep.mubr.bf16.mxu0 %v3001_v9  ;;  %v6665_v34 = vpop.f32.mrb[176].mxu1 }
 0x5a4   : > { %6740 = vmatmul.mubr.bf16.gmra.mrb[236].mxu0 %v3002_v36  ;;  %v2925_v10 = vadd.f32 %v6665_v34, %v7806_v17  ;;  %v2916_v11 = vpop.f32.mrb[177].mxu1 }
 0x5a5   : > { %v2917_v12 = vadd.f32 %v7806_v17, %v2916_v11  ;;  %v6666_v14 = vpop.f32.mrb[178].mxu1 }
 0x5a6   : > { %v2928_v15 = vadd.f32 %v6666_v14, %v7806_v17  ;;  %v2919_v16 = vpop.f32.mrb[179].mxu1 }
 0x5a7   : > { %v2920_v18 = vadd.f32 %v7806_v17, %v2919_v16 }
 0x5a8   : > { %v3004_v19 = vpack.c.bf16 %v2928_v15, %v2925_v10 }
 0x5a9   : > { %v3003_v20 = vpack.c.bf16 %v2920_v18, %v2917_v12 }
 0x5ab   : > { %6743 = vmatprep.mubr.bf16.mxu0 %v3003_v20  ;;  %v6669_v21 = vpop.f32.mrb[180].mxu1 }
 0x5ac   : > { %6744 = vmatmul.mubr.bf16.gmra.mrb[240].mxu0 %v3004_v19  ;;  %v2941_v22 = vadd.f32 %v6669_v21, %v7806_v17  ;;  %v2932_v23 = vpop.f32.mrb[181].mxu1 }
 0x5ad   : > { %v2933_v24 = vadd.f32 %v7806_v17, %v2932_v23  ;;  %v6670_v25 = vpop.f32.mrb[182].mxu1 }
 0x5ae   : > { %v2944_v26 = vadd.f32 %v6670_v25, %v7806_v17  ;;  %v2935_v27 = vpop.f32.mrb[183].mxu1 }
 0x5af   : > { %v2936_v28 = vadd.f32 %v7806_v17, %v2935_v27 }
 0x5b0   : > { %v3006_v29 = vpack.c.bf16 %v2944_v26, %v2941_v22 }
 0x5b1   : > { %v3005_v55 = vpack.c.bf16 %v2936_v28, %v2933_v24 }
 0x5b3   : > { %6747 = vmatprep.mubr.bf16.mxu0 %v3005_v55  ;;  %v6673_v59 = vpop.f32.mrb[184].mxu1 }
 0x5b4   : > { %6748 = vmatmul.mubr.bf16.gmra.mrb[244].mxu0 %v3006_v29  ;;  %v2957_v30 = vadd.f32 %v6673_v59, %v7806_v17  ;;  %v2948_v31 = vpop.f32.mrb[185].mxu1 }
 0x5b5   : > { %v2949_v32 = vadd.f32 %v7806_v17, %v2948_v31  ;;  %v6674_v33 = vpop.f32.mrb[186].mxu1 }
 0x5b6   : > { %v2960_v35 = vadd.f32 %v6674_v33, %v7806_v17  ;;  %v2951_v37 = vpop.f32.mrb[187].mxu1 }
 0x5b7   : > { %v2952_v38 = vadd.f32 %v7806_v17, %v2951_v37 }
 0x5b8   : > { %v3008_v39 = vpack.c.bf16 %v2960_v35, %v2957_v30 }
 0x5b9   : > { %v3007_v40 = vpack.c.bf16 %v2952_v38, %v2949_v32 }
 0x5bb   : > { %6751 = vmatprep.mubr.bf16.mxu0 %v3007_v40  ;;  %v6677_v41 = vpop.f32.mrb[188].mxu1 }
 0x5bc   : > { %6752 = vmatmul.mubr.bf16.gmra.mrb[248].mxu0 %v3008_v39  ;;  %v2973_v42 = vadd.f32 %v6677_v41, %v7806_v17  ;;  %v2964_v43 = vpop.f32.mrb[189].mxu1 }
 0x5bd   : > { %v2965_v44 = vadd.f32 %v7806_v17, %v2964_v43  ;;  %v6678_v45 = vpop.f32.mrb[190].mxu1 }
 0x5be   : > { %v2976_v46 = vadd.f32 %v6678_v45, %v7806_v17  ;;  %v2967_v47 = vpop.f32.mrb[191].mxu1 }
 0x5bf   : > { %v2968_v48 = vadd.f32 %v7806_v17, %v2967_v47  ;;  %v6979_v17 = vld [vmem:[%s8692_s4 + $0x14] ss:$8 sps:$4 sm:$0xff]  }
 0x5c0   : > { %v3010_v49 = vpack.c.bf16 %v2976_v46, %v2973_v42  ;;  %3967 = vmatprep.subr.bf16.mxu0 %v6979_v17 }
 0x5c1   : > { %v3009_v50 = vpack.c.bf16 %v2968_v48, %v2965_v44  ;;  %3968 = vmatpush1.bf16.msra.mxu0 %v6977_v52 }
 0x5c2   : > { %3969 = vmatprep.subr.bf16.mxu0 %v6982_v54 }
 0x5c3   : > { %6755 = vmatprep.mubr.bf16.mxu0 %v3009_v50 }
 0x5c4   : > { %6756 = vmatmul.mubr.bf16.gmra.mrb[252].mxu0 %v3010_v49 }
 0x5c5   : > { %3970 = vmatpush1.bf16.msra.mxu0 %v6980_v53 }
 0x5c6   : > { %3971 = vmatprep.subr.bf16.mxu0 %v6985_v57 }
 0x5c9   : > { %3972 = vmatpush1.bf16.msra.mxu0 %v6983_v56 }
 0x5ca   : > { %3973 = vmatprep.subr.bf16.mxu0 %v6988_v60 }
 0x5cd   : > { %3974 = vmatpush1.bf16.msra.mxu0 %v6986_v58 }
 0x5ce   : > { %3975 = vmatprep.subr.bf16.mxu0 %v6991_v62 }
 0x5d1   : > { %3976 = vmatpush1.bf16.msra.mxu0 %v6989_v61 }
 0x5d2   : > { %3977 = vmatprep.subr.bf16.mxu0 %v6994_v0 }
 0x5d5   : > { %3978 = vmatpush1.bf16.msra.mxu0 %v6992_v63 }
 0x5d6   : > { %3979 = vmatprep.subr.bf16.mxu0 %v6997_v4 }
 0x5d9   : > { %3980 = vmatpush1.bf16.msra.mxu0 %v6995_v3 }
 0x61f   : > { %v6697_v2 = vpop.f32.mrb[192].mxu0 }
 0x620   : > { %v3124_v5 = vadd.f32 %v6697_v2, %v7917_v1  ;;  %v3115_v6 = vpop.f32.mrb[193].mxu0 }
 0x621   : > { %v3116_v7 = vadd.f32 %v7917_v1, %v3115_v6  ;;  %v6698_v8 = vpop.f32.mrb[194].mxu0 }
 0x622   : > { %v3127_v36 = vadd.f32 %v6698_v8, %v7917_v1  ;;  %v3118_v9 = vpop.f32.mrb[195].mxu0  ;;  %v3372_v10 = vmax.f32 %v3124_v5, 0.0 }
 0x623   : > { %v3119_v34 = vadd.f32 %v7917_v1, %v3118_v9  ;;  %v3370_v12 = vmax.f32 %v3116_v7, 0.0 }
 0x624   : > { %v3373_v11 = vmax.f32 %v3127_v36, 0.0 }
 0x625   : > { %v3371_v14 = vmax.f32 %v3119_v34, 0.0 }
 0x626   : > { %v3435_v15 = vpack.c.bf16 %v3373_v11, %v3372_v10 }
 0x627   : > { %v3434_v16 = vpack.c.bf16 %v3371_v14, %v3370_v12  ;;  %v6701_v18 = vpop.f32.mrb[196].mxu0 }
 0x628   : > { %v3140_v19 = vadd.f32 %v6701_v18, %v7917_v1  ;;  %v3131_v20 = vpop.f32.mrb[197].mxu0 }
 0x629   : > { %v3132_v21 = vadd.f32 %v7917_v1, %v3131_v20  ;;  %v6702_v22 = vpop.f32.mrb[198].mxu0  ;;  %6775 = vmatprep.mubr.bf16.mxu1 %v3434_v16 }
 0x62a   : > { %v3143_v23 = vadd.f32 %v6702_v22, %v7917_v1  ;;  %v3134_v24 = vpop.f32.mrb[199].mxu0  ;;  %6776 = vmatmul.mubr.bf16.vlgmr.msra.gmra.mrb[192].mxu1 %v3435_v15  ;;  %v3376_v26 = vmax.f32 %v3140_v19, 0.0 }
 0x62b   : > { %v3135_v25 = vadd.f32 %v7917_v1, %v3134_v24  ;;  %v3374_v28 = vmax.f32 %v3132_v21, 0.0 }
 0x62c   : > { %v3377_v27 = vmax.f32 %v3143_v23, 0.0 }
 0x62d   : > { %v3375_v29 = vmax.f32 %v3135_v25, 0.0 }
 0x62e   : > { %v3437_v55 = vpack.c.bf16 %v3377_v27, %v3376_v26 }
 0x62f   : > { %v3436_v59 = vpack.c.bf16 %v3375_v29, %v3374_v28  ;;  %v6705_v30 = vpop.f32.mrb[200].mxu0 }
 0x630   : > { %v3156_v31 = vadd.f32 %v6705_v30, %v7917_v1  ;;  %v3147_v32 = vpop.f32.mrb[201].mxu0 }
 0x631   : > { %v3148_v33 = vadd.f32 %v7917_v1, %v3147_v32  ;;  %v6706_v35 = vpop.f32.mrb[202].mxu0  ;;  %6779 = vmatprep.mubr.bf16.mxu1 %v3436_v59 }
 0x632   : > { %v3159_v37 = vadd.f32 %v6706_v35, %v7917_v1  ;;  %v3150_v38 = vpop.f32.mrb[203].mxu0  ;;  %6780 = vmatmul.mubr.bf16.gmra.mrb[196].mxu1 %v3437_v55  ;;  %v3380_v40 = vmax.f32 %v3156_v31, 0.0 }
 0x633   : > { %v3151_v39 = vadd.f32 %v7917_v1, %v3150_v38  ;;  %v3378_v42 = vmax.f32 %v3148_v33, 0.0 }
 0x634   : > { %v3381_v41 = vmax.f32 %v3159_v37, 0.0 }
 0x635   : > { %v3379_v43 = vmax.f32 %v3151_v39, 0.0 }
 0x636   : > { %v3439_v44 = vpack.c.bf16 %v3381_v41, %v3380_v40 }
 0x637   : > { %v3438_v45 = vpack.c.bf16 %v3379_v43, %v3378_v42  ;;  %v6709_v46 = vpop.f32.mrb[204].mxu0 }
 0x638   : > { %v3172_v47 = vadd.f32 %v6709_v46, %v7917_v1  ;;  %v3163_v48 = vpop.f32.mrb[205].mxu0 }
 0x639   : > { %v3164_v49 = vadd.f32 %v7917_v1, %v3163_v48  ;;  %v6710_v50 = vpop.f32.mrb[206].mxu0  ;;  %6783 = vmatprep.mubr.bf16.mxu1 %v3438_v45 }
 0x63a   : > { %v3175_v51 = vadd.f32 %v6710_v50, %v7917_v1  ;;  %v3166_v13 = vpop.f32.mrb[207].mxu0  ;;  %6784 = vmatmul.mubr.bf16.gmra.mrb[200].mxu1 %v3439_v44  ;;  %v3384_v17 = vmax.f32 %v3172_v47, 0.0 }
 0x63b   : > { %v3167_v52 = vadd.f32 %v7917_v1, %v3166_v13  ;;  %v3382_v54 = vmax.f32 %v3164_v49, 0.0 }
 0x63c   : > { %v3385_v53 = vmax.f32 %v3175_v51, 0.0 }
 0x63d   : > { %v3383_v56 = vmax.f32 %v3167_v52, 0.0 }
 0x63e   : > { %v3441_v57 = vpack.c.bf16 %v3385_v53, %v3384_v17 }
 0x63f   : > { %v3440_v58 = vpack.c.bf16 %v3383_v56, %v3382_v54  ;;  %v6713_v60 = vpop.f32.mrb[208].mxu0 }
 0x640   : > { %v3188_v61 = vadd.f32 %v6713_v60, %v7917_v1  ;;  %v3179_v62 = vpop.f32.mrb[209].mxu0 }
 0x641   : > { %v3180_v63 = vadd.f32 %v7917_v1, %v3179_v62  ;;  %6787 = vmatprep.mubr.bf16.mxu1 %v3440_v58  ;;  %v6714_v0 = vpop.f32.mrb[210].mxu0 }
 0x642   : > { %v3388_v2 = vmax.f32 %v3188_v61, 0.0  ;;  %v3191_v3 = vadd.f32 %v6714_v0, %v7917_v1  ;;  %6788 = vmatmul.mubr.bf16.gmra.mrb[204].mxu1 %v3441_v57  ;;  %v3182_v4 = vpop.f32.mrb[211].mxu0 }
 0x643   : > { %v3386_v5 = vmax.f32 %v3180_v63, 0.0  ;;  %v3183_v6 = vadd.f32 %v7917_v1, %v3182_v4 }
 0x644   : > { %v3389_v7 = vmax.f32 %v3191_v3, 0.0 }
 0x645   : > { %v3387_v8 = vmax.f32 %v3183_v6, 0.0 }
 0x646   : > { %v3443_v36 = vpack.c.bf16 %v3389_v7, %v3388_v2 }
 0x647   : > { %v3442_v9 = vpack.c.bf16 %v3387_v8, %v3386_v5  ;;  %v6717_v34 = vpop.f32.mrb[212].mxu0 }
 0x648   : > { %v3204_v10 = vadd.f32 %v6717_v34, %v7917_v1  ;;  %v3195_v11 = vpop.f32.mrb[213].mxu0 }
 0x649   : > { %6791 = vmatprep.mubr.bf16.mxu1 %v3442_v9  ;;  %v3196_v12 = vadd.f32 %v7917_v1, %v3195_v11  ;;  %v6718_v14 = vpop.f32.mrb[214].mxu0 }
 0x64a   : > { %6792 = vmatmul.mubr.bf16.gmra.mrb[208].mxu1 %v3443_v36  ;;  %v3392_v15 = vmax.f32 %v3204_v10, 0.0  ;;  %v3207_v16 = vadd.f32 %v6718_v14, %v7917_v1  ;;  %v3198_v18 = vpop.f32.mrb[215].mxu0 }
 0x64b   : > { %v3390_v19 = vmax.f32 %v3196_v12, 0.0  ;;  %v3199_v20 = vadd.f32 %v7917_v1, %v3198_v18 }
 0x64c   : > { %v3393_v21 = vmax.f32 %v3207_v16, 0.0 }
 0x64d   : > { %v3391_v22 = vmax.f32 %v3199_v20, 0.0 }
 0x64e   : > { %v3445_v23 = vpack.c.bf16 %v3393_v21, %v3392_v15 }
 0x64f   : > { %v3444_v24 = vpack.c.bf16 %v3391_v22, %v3390_v19  ;;  %v6721_v25 = vpop.f32.mrb[216].mxu0 }
 0x650   : > { %v3220_v26 = vadd.f32 %v6721_v25, %v7917_v1  ;;  %v3211_v27 = vpop.f32.mrb[217].mxu0 }
 0x651   : > { %6795 = vmatprep.mubr.bf16.mxu1 %v3444_v24  ;;  %v3212_v28 = vadd.f32 %v7917_v1, %v3211_v27  ;;  %v6722_v29 = vpop.f32.mrb[218].mxu0 }
 0x652   : > { %6796 = vmatmul.mubr.bf16.gmra.mrb[212].mxu1 %v3445_v23  ;;  %v3396_v55 = vmax.f32 %v3220_v26, 0.0  ;;  %v3223_v59 = vadd.f32 %v6722_v29, %v7917_v1  ;;  %v3214_v30 = vpop.f32.mrb[219].mxu0 }
 0x653   : > { %v3394_v31 = vmax.f32 %v3212_v28, 0.0  ;;  %v3215_v32 = vadd.f32 %v7917_v1, %v3214_v30 }
 0x654   : > { %v3397_v33 = vmax.f32 %v3223_v59, 0.0 }
 0x655   : > { %v3395_v35 = vmax.f32 %v3215_v32, 0.0 }
 0x656   : > { %v3447_v37 = vpack.c.bf16 %v3397_v33, %v3396_v55 }
 0x657   : > { %v3446_v38 = vpack.c.bf16 %v3395_v35, %v3394_v31  ;;  %v6725_v39 = vpop.f32.mrb[220].mxu0 }
 0x658   : > { %v3236_v40 = vadd.f32 %v6725_v39, %v7917_v1  ;;  %v3227_v41 = vpop.f32.mrb[221].mxu0 }
 0x659   : > { %6799 = vmatprep.mubr.bf16.mxu1 %v3446_v38  ;;  %v3228_v42 = vadd.f32 %v7917_v1, %v3227_v41  ;;  %v6726_v43 = vpop.f32.mrb[222].mxu0 }
 0x65a   : > { %6800 = vmatmul.mubr.bf16.gmra.mrb[216].mxu1 %v3447_v37  ;;  %v3400_v44 = vmax.f32 %v3236_v40, 0.0  ;;  %v3239_v45 = vadd.f32 %v6726_v43, %v7917_v1  ;;  %v3230_v46 = vpop.f32.mrb[223].mxu0 }
 0x65b   : > { %v3398_v47 = vmax.f32 %v3228_v42, 0.0  ;;  %v3231_v48 = vadd.f32 %v7917_v1, %v3230_v46 }
 0x65c   : > { %v3401_v49 = vmax.f32 %v3239_v45, 0.0 }
 0x65d   : > { %v3399_v50 = vmax.f32 %v3231_v48, 0.0 }
 0x65e   : > { %v3449_v51 = vpack.c.bf16 %v3401_v49, %v3400_v44 }
 0x65f   : > { %v3448_v13 = vpack.c.bf16 %v3399_v50, %v3398_v47  ;;  %v6729_v52 = vpop.f32.mrb[224].mxu0 }
 0x660   : > { %v3252_v17 = vadd.f32 %v6729_v52, %v7917_v1  ;;  %v3243_v53 = vpop.f32.mrb[225].mxu0 }
 0x661   : > { %6803 = vmatprep.mubr.bf16.mxu1 %v3448_v13  ;;  %v3244_v54 = vadd.f32 %v7917_v1, %v3243_v53  ;;  %v6730_v56 = vpop.f32.mrb[226].mxu0 }
 0x662   : > { %6804 = vmatmul.mubr.bf16.gmra.mrb[220].mxu1 %v3449_v51  ;;  %v3404_v57 = vmax.f32 %v3252_v17, 0.0  ;;  %v3255_v58 = vadd.f32 %v6730_v56, %v7917_v1  ;;  %v3246_v60 = vpop.f32.mrb[227].mxu0  ;;  %v7079_v56 = vmov 0  }
 0x663   : > { %v3402_v61 = vmax.f32 %v3244_v54, 0.0  ;;  %v3247_v62 = vadd.f32 %v7917_v1, %v3246_v60  ;;  %3997 = vmatprep.mubr.bf16.mxu0 %v7079_v56  ;;  %6839 = vmatprep.subr.bf16.mxu1 %v7079_v56 }
 0x664   : > { %v3405_v63 = vmax.f32 %v3255_v58, 0.0  ;;  %4645 = vmatprep.subr.bf16.mxu0 %v7079_v56 }
 0x665   : > { %v3403_v0 = vmax.f32 %v3247_v62, 0.0 }
 0x666   : > { %v3451_v2 = vpack.c.bf16 %v3405_v63, %v3404_v57 }
 0x667   : > { %v3450_v3 = vpack.c.bf16 %v3403_v0, %v3402_v61  ;;  %v6733_v4 = vpop.f32.mrb[228].mxu0 }
 0x668   : > { %v3268_v5 = vadd.f32 %v6733_v4, %v7917_v1  ;;  %v3259_v6 = vpop.f32.mrb[229].mxu0 }
 0x669   : > { %6807 = vmatprep.mubr.bf16.mxu1 %v3450_v3  ;;  %v3260_v7 = vadd.f32 %v7917_v1, %v3259_v6  ;;  %v6734_v8 = vpop.f32.mrb[230].mxu0 }
 0x66a   : > { %6808 = vmatmul.mubr.bf16.gmra.mrb[224].mxu1 %v3451_v2  ;;  %v3408_v36 = vmax.f32 %v3268_v5, 0.0  ;;  %v3271_v9 = vadd.f32 %v6734_v8, %v7917_v1  ;;  %v3262_v34 = vpop.f32.mrb[231].mxu0 }
 0x66b   : > { %v3406_v10 = vmax.f32 %v3260_v7, 0.0  ;;  %v3263_v11 = vadd.f32 %v7917_v1, %v3262_v34 }
 0x66c   : > { %v3409_v12 = vmax.f32 %v3271_v9, 0.0 }
 0x66d   : > { %v3407_v14 = vmax.f32 %v3263_v11, 0.0 }
 0x66e   : > { %v3453_v15 = vpack.c.bf16 %v3409_v12, %v3408_v36 }
 0x66f   : > { %v3452_v16 = vpack.c.bf16 %v3407_v14, %v3406_v10  ;;  %v6737_v18 = vpop.f32.mrb[232].mxu0 }
 0x670   : > { %v3284_v19 = vadd.f32 %v6737_v18, %v7917_v1  ;;  %v3275_v20 = vpop.f32.mrb[233].mxu0 }
 0x671   : > { %6811 = vmatprep.mubr.bf16.mxu1 %v3452_v16  ;;  %v3276_v21 = vadd.f32 %v7917_v1, %v3275_v20  ;;  %v6738_v22 = vpop.f32.mrb[234].mxu0 }
 0x672   : > { %6812 = vmatmul.mubr.bf16.gmra.mrb[228].mxu1 %v3453_v15  ;;  %v3412_v23 = vmax.f32 %v3284_v19, 0.0  ;;  %v3287_v24 = vadd.f32 %v6738_v22, %v7917_v1  ;;  %v3278_v25 = vpop.f32.mrb[235].mxu0 }
 0x673   : > { %v3410_v26 = vmax.f32 %v3276_v21, 0.0  ;;  %v3279_v27 = vadd.f32 %v7917_v1, %v3278_v25 }
 0x674   : > { %v3413_v28 = vmax.f32 %v3287_v24, 0.0 }
 0x675   : > { %v3411_v29 = vmax.f32 %v3279_v27, 0.0 }
 0x676   : > { %v3455_v55 = vpack.c.bf16 %v3413_v28, %v3412_v23 }
 0x677   : > { %v3454_v59 = vpack.c.bf16 %v3411_v29, %v3410_v26  ;;  %v6741_v30 = vpop.f32.mrb[236].mxu0 }
 0x678   : > { %v3300_v31 = vadd.f32 %v6741_v30, %v7917_v1  ;;  %v3291_v32 = vpop.f32.mrb[237].mxu0 }
 0x679   : > { %6815 = vmatprep.mubr.bf16.mxu1 %v3454_v59  ;;  %v3292_v33 = vadd.f32 %v7917_v1, %v3291_v32  ;;  %v6742_v35 = vpop.f32.mrb[238].mxu0 }
 0x67a   : > { %6816 = vmatmul.mubr.bf16.gmra.mrb[232].mxu1 %v3455_v55  ;;  %v3416_v37 = vmax.f32 %v3300_v31, 0.0  ;;  %v3303_v38 = vadd.f32 %v6742_v35, %v7917_v1  ;;  %v3294_v39 = vpop.f32.mrb[239].mxu0 }
 0x67b   : > { %v3414_v40 = vmax.f32 %v3292_v33, 0.0  ;;  %v3295_v41 = vadd.f32 %v7917_v1, %v3294_v39 }
 0x67c   : > { %v3417_v42 = vmax.f32 %v3303_v38, 0.0 }
 0x67d   : > { %v3415_v43 = vmax.f32 %v3295_v41, 0.0  ;;  %v6999_v41 = vld [vmem:[%s8694_s6 + $0x8] sm:$0xff]  }
 0x67e   : > { %v3457_v44 = vpack.c.bf16 %v3417_v42, %v3416_v37 }
 0x67f   : > { %v3456_v45 = vpack.c.bf16 %v3415_v43, %v3414_v40  ;;  %v6745_v46 = vpop.f32.mrb[240].mxu0  ;;  %v6998_v40 = vld [vmem:[%s8694_s6] sm:$0xff]  }
 0x680   : > { %v3316_v47 = vadd.f32 %v6745_v46, %v7917_v1  ;;  %v3307_v48 = vpop.f32.mrb[241].mxu0  ;;  %6855 = vmatpush1.bf16.msra.mxu1 %v6998_v40  ;;  %v8007_v43 = vld [vmem:[%s8691_s3 + $0x7] ss:$0 sm:$0xff] }
 0x681   : > { %6819 = vmatprep.mubr.bf16.mxu1 %v3456_v45  ;;  %v3308_v49 = vadd.f32 %v7917_v1, %v3307_v48  ;;  %v6746_v50 = vpop.f32.mrb[242].mxu0  ;;  %6840 = vmatprep.subr.bf16.mxu1 %v7079_v56 }
 0x682   : > { %6820 = vmatmul.mubr.bf16.gmra.mrb[236].mxu1 %v3457_v44  ;;  %v3420_v51 = vmax.f32 %v3316_v47, 0.0  ;;  %v3319_v13 = vadd.f32 %v6746_v50, %v7917_v1  ;;  %v3310_v52 = vpop.f32.mrb[243].mxu0  ;;  %v7001_v44 = vld [vmem:[%s8694_s6 + $0x18] sm:$0xff]  }
 0x683   : > { %v3418_v17 = vmax.f32 %v3308_v49, 0.0  ;;  %v3311_v53 = vadd.f32 %v7917_v1, %v3310_v52 }
 0x684   : > { %v3421_v54 = vmax.f32 %v3319_v13, 0.0  ;;  %6856 = vmatpush1.bf16.msra.mxu1 %v6999_v41 }
 0x685   : > { %v3419_v57 = vmax.f32 %v3311_v53, 0.0  ;;  %6841 = vmatprep.subr.bf16.mxu1 %v7079_v56  ;;  %v7002_v53 = vld [vmem:[%s8694_s6 + $0x20] sm:$0xff]  }
 0x686   : > { %v3459_v58 = vpack.c.bf16 %v3421_v54, %v3420_v51 }
 0x687   : > { %v3458_v60 = vpack.c.bf16 %v3419_v57, %v3418_v17  ;;  %v6749_v61 = vpop.f32.mrb[244].mxu0 }
 0x688   : > { %v3332_v62 = vadd.f32 %v6749_v61, %v7917_v1  ;;  %v3323_v63 = vpop.f32.mrb[245].mxu0 }
 0x689   : > { %6823 = vmatprep.mubr.bf16.mxu1 %v3458_v60  ;;  %v3324_v0 = vadd.f32 %v7917_v1, %v3323_v63  ;;  %v6750_v2 = vpop.f32.mrb[246].mxu0 }
 0x68a   : > { %6824 = vmatmul.mubr.bf16.gmra.mrb[240].mxu1 %v3459_v58  ;;  %v3424_v3 = vmax.f32 %v3332_v62, 0.0  ;;  %v3335_v4 = vadd.f32 %v6750_v2, %v7917_v1  ;;  %v3326_v5 = vpop.f32.mrb[247].mxu0 }
 0x68b   : > { %v3422_v6 = vmax.f32 %v3324_v0, 0.0  ;;  %v3327_v7 = vadd.f32 %v7917_v1, %v3326_v5 }
 0x68c   : > { %v3425_v8 = vmax.f32 %v3335_v4, 0.0  ;;  %v7003_v4 = vld [vmem:[%s8694_s6 + $0x28] sm:$0xff]  }
 0x68d   : > { %v3423_v36 = vmax.f32 %v3327_v7, 0.0 }
 0x68e   : > { %v3461_v9 = vpack.c.bf16 %v3425_v8, %v3424_v3 }
 0x68f   : > { %v3460_v34 = vpack.c.bf16 %v3423_v36, %v3422_v6  ;;  %v6753_v10 = vpop.f32.mrb[248].mxu0 }
 0x690   : > { %v3348_v11 = vadd.f32 %v6753_v10, %v7917_v1  ;;  %v3339_v12 = vpop.f32.mrb[249].mxu0 }
 0x691   : > { %6827 = vmatprep.mubr.bf16.mxu1 %v3460_v34  ;;  %v3340_v14 = vadd.f32 %v7917_v1, %v3339_v12  ;;  %v6754_v15 = vpop.f32.mrb[250].mxu0 }
 0x692   : > { %6828 = vmatmul.mubr.bf16.gmra.mrb[244].mxu1 %v3461_v9  ;;  %v3428_v16 = vmax.f32 %v3348_v11, 0.0  ;;  %v3351_v18 = vadd.f32 %v6754_v15, %v7917_v1  ;;  %v3342_v19 = vpop.f32.mrb[251].mxu0 }
 0x693   : > { %v3426_v20 = vmax.f32 %v3340_v14, 0.0  ;;  %v3343_v21 = vadd.f32 %v7917_v1, %v3342_v19  ;;  %v7004_v14 = vld [vmem:[%s8694_s6 + $0x30] sm:$0xff]  }
 0x694   : > { %v3429_v22 = vmax.f32 %v3351_v18, 0.0 }
 0x695   : > { %v3427_v23 = vmax.f32 %v3343_v21, 0.0 }
 0x696   : > { %v3463_v24 = vpack.c.bf16 %v3429_v22, %v3428_v16 }
 0x697   : > { %v3462_v25 = vpack.c.bf16 %v3427_v23, %v3426_v20  ;;  %v6757_v26 = vpop.f32.mrb[252].mxu0 }
 0x698   : > { %v3364_v27 = vadd.f32 %v6757_v26, %v7917_v1  ;;  %v3355_v28 = vpop.f32.mrb[253].mxu0  ;;  %v7005_v26 = vld [vmem:[%s8694_s6 + $0x38] sm:$0xff]  }
 0x699   : > { %6831 = vmatprep.mubr.bf16.mxu1 %v3462_v25  ;;  %v3356_v29 = vadd.f32 %v7917_v1, %v3355_v28  ;;  %v6758_v55 = vpop.f32.mrb[254].mxu0 }
 0x69a   : > { %6832 = vmatmul.mubr.bf16.gmra.mrb[248].mxu1 %v3463_v24  ;;  %v3432_v59 = vmax.f32 %v3364_v27, 0.0  ;;  %v3367_v30 = vadd.f32 %v6758_v55, %v7917_v1  ;;  %v3358_v31 = vpop.f32.mrb[255].mxu0 }
 0x69b   : > { %v3430_v32 = vmax.f32 %v3356_v29, 0.0  ;;  %v3359_v33 = vadd.f32 %v7917_v1, %v3358_v31  ;;  %v7000_v1 = vld [vmem:[%s8694_s6 + $0x10] sm:$0xff]  }
 0x69c   : > { %v3433_v35 = vmax.f32 %v3367_v30, 0.0  ;;  %6857 = vmatpush1.bf16.msra.mxu1 %v7000_v1 }
 0x69d   : > { %v3431_v37 = vmax.f32 %v3359_v33, 0.0  ;;  %6842 = vmatprep.subr.bf16.mxu1 %v7079_v56 }
 0x69e   : > { %v3465_v38 = vpack.c.bf16 %v3433_v35, %v3432_v59 }
 0x69f   : > { %v3464_v39 = vpack.c.bf16 %v3431_v37, %v3430_v32  ;;  %v7006_v37 = vld [vmem:[%s8694_s6 + $0x40] sm:$0xff]  }
 0x6a0   : > { %6858 = vmatpush1.bf16.msra.mxu1 %v7001_v44 }
 0x6a1   : > { %6835 = vmatprep.mubr.bf16.mxu1 %v3464_v39  ;;  %6843 = vmatprep.subr.bf16.mxu1 %v7079_v56 }
 0x6a2   : > { %6836 = vmatmul.mubr.bf16.gmra.mrb[252].mxu1 %v3465_v38 }
 0x6a4   : > { %6859 = vmatpush1.bf16.msra.mxu1 %v7002_v53 }
 0x6a5   : > { %6844 = vmatprep.subr.bf16.mxu1 %v7079_v56 }
 0x6a8   : > { %6860 = vmatpush1.bf16.msra.mxu1 %v7003_v4 }
 0x6a9   : > { %6845 = vmatprep.subr.bf16.mxu1 %v7079_v56 }
 0x6ac   : > { %6861 = vmatpush1.bf16.msra.mxu1 %v7004_v14 }
 0x6ad   : > { %6846 = vmatprep.subr.bf16.mxu1 %v7079_v56 }
 0x6b0   : > { %6862 = vmatpush1.bf16.msra.mxu1 %v7005_v26 }
 0x6b1   : > { %6847 = vmatprep.subr.bf16.mxu1 %v7079_v56 }
 0x6b4   : > { %6863 = vmatpush1.bf16.msra.mxu1 %v7006_v37 }
 0x6b5   : > { %6848 = vmatprep.subr.bf16.mxu1 %v7079_v56 }
 0x6fd   : > { %v6777_v42 = vpop.f32.mrb[192].mxu1 }
 0x6fe   : > { %v3570_v45 = vpop.f32.mrb[193].mxu1  ;;  %v3579_v47 = vadd.f32 %v6777_v42, %v8007_v43 }
 0x6ff   : > { %v6778_v46 = vpop.f32.mrb[194].mxu1  ;;  %v3571_v50 = vadd.f32 %v8007_v43, %v3570_v45 }
 0x700   : > { %v3582_v48 = vadd.f32 %v6778_v46, %v8007_v43  ;;  %v3573_v49 = vpop.f32.mrb[195].mxu1 }
 0x701   : > { %v3574_v51 = vadd.f32 %v8007_v43, %v3573_v49 }
 0x702   : > { %v3826_v13 = vpack.c.bf16 %v3582_v48, %v3579_v47  ;;  %v7007_v48 = vld [vmem:[%s8694_s6 + $0x48] sm:$0xff]  }
 0x703   : > { %v3825_v52 = vpack.c.bf16 %v3574_v51, %v3571_v50  ;;  %6864 = vmatpush1.bf16.msra.mxu1 %v7007_v48 }
 0x704   : > { %6849 = vmatprep.subr.bf16.mxu1 %v7079_v56 }
 0x705   : > { %v6781_v17 = vpop.f32.mrb[196].mxu1  ;;  %3998 = vmatmul.mubr.bf16.vlgmr.msra.gmra.mrb[0].mxu0 %v3825_v52 }
 0x706   : > { %v3586_v54 = vpop.f32.mrb[197].mxu1  ;;  %4007 = vmatprep.mubr.bf16.mxu0 %v7079_v56  ;;  %4646 = vmatpush1.bf16.msra.mxu0 %v6998_v40  ;;  %v3595_v58 = vadd.f32 %v6781_v17, %v8007_v43 }
 0x707   : > { %v6782_v57 = vpop.f32.mrb[198].mxu1  ;;  %4647 = vmatprep.subr.bf16.mxu0 %v7079_v56  ;;  %v3587_v62 = vadd.f32 %v8007_v43, %v3586_v54 }
 0x708   : > { %v3598_v60 = vadd.f32 %v6782_v57, %v8007_v43  ;;  %v3589_v61 = vpop.f32.mrb[199].mxu1 }
 0x709   : > { %v3590_v63 = vadd.f32 %v8007_v43, %v3589_v61 }
 0x70a   : > { %v3828_v0 = vpack.c.bf16 %v3598_v60, %v3595_v58  ;;  %4648 = vmatpush1.bf16.msra.mxu0 %v6999_v41  ;;  %v7008_v60 = vld [vmem:[%s8694_s6 + $0x50] sm:$0xff]  }
 0x70b   : > { %v3827_v2 = vpack.c.bf16 %v3590_v63, %v3587_v62  ;;  %4649 = vmatprep.subr.bf16.mxu0 %v7079_v56  ;;  %6865 = vmatpush1.bf16.msra.mxu1 %v7008_v60 }
 0x70c   : > { %6850 = vmatprep.subr.bf16.mxu1 %v7079_v56 }
 0x70d   : > { %v6785_v3 = vpop.f32.mrb[200].mxu1  ;;  %4008 = vmatmul.mubr.bf16.gmra.mrb[4].mxu0 %v3826_v13 }
 0x70e   : > { %v3602_v5 = vpop.f32.mrb[201].mxu1  ;;  %4017 = vmatprep.mubr.bf16.mxu0 %v7079_v56  ;;  %4650 = vmatpush1.bf16.msra.mxu0 %v7000_v1  ;;  %v8034_v7 = vadd.f32 %v6785_v3, %v8007_v43 }
 0x70f   : > { %v6786_v6 = vpop.f32.mrb[202].mxu1  ;;  %4651 = vmatprep.subr.bf16.mxu0 %v7079_v56  ;;  %v3603_v9 = vadd.f32 %v8007_v43, %v3602_v5 }
 0x710   : > { %v8037_v8 = vadd.f32 %v6786_v6, %v8007_v43  ;;  %v3605_v36 = vpop.f32.mrb[203].mxu1 }
 0x711   : > { %v3606_v34 = vadd.f32 %v8007_v43, %v3605_v36 }
 0x712   : > { %v3830_v10 = vpack.c.bf16 %v8037_v8, %v8034_v7  ;;  %4652 = vmatpush1.bf16.msra.mxu0 %v7001_v44  ;;  %v7009_v8 = vld [vmem:[%s8694_s6 + $0x58] sm:$0xff]  }
 0x713   : > { %v3829_v11 = vpack.c.bf16 %v3606_v34, %v3603_v9  ;;  %4653 = vmatprep.subr.bf16.mxu0 %v7079_v56  ;;  %6866 = vmatpush1.bf16.msra.mxu1 %v7009_v8 }
 0x714   : > { %6851 = vmatprep.subr.bf16.mxu1 %v7079_v56 }
 0x715   : > { %v6789_v12 = vpop.f32.mrb[204].mxu1  ;;  %4018 = vmatmul.mubr.bf16.gmra.mrb[8].mxu0 %v3827_v2 }
 0x716   : > { %v3618_v15 = vpop.f32.mrb[205].mxu1  ;;  %4027 = vmatprep.mubr.bf16.mxu0 %v7079_v56  ;;  %4654 = vmatpush1.bf16.msra.mxu0 %v7002_v53  ;;  %v8051_v18 = vadd.f32 %v6789_v12, %v8007_v43 }
 0x717   : > { %v6790_v16 = vpop.f32.mrb[206].mxu1  ;;  %4655 = vmatprep.subr.bf16.mxu0 %v7079_v56  ;;  %v3619_v21 = vadd.f32 %v8007_v43, %v3618_v15 }
 0x718   : > { %v8054_v19 = vadd.f32 %v6790_v16, %v8007_v43  ;;  %v3621_v20 = vpop.f32.mrb[207].mxu1 }
 0x719   : > { %v3622_v22 = vadd.f32 %v8007_v43, %v3621_v20 }
 0x71a   : > { %v3832_v23 = vpack.c.bf16 %v8054_v19, %v8051_v18  ;;  %4656 = vmatpush1.bf16.msra.mxu0 %v7003_v4  ;;  %v7010_v19 = vld [vmem:[%s8694_s6 + $0x60] sm:$0xff]  }
 0x71b   : > { %v3831_v24 = vpack.c.bf16 %v3622_v22, %v3619_v21  ;;  %4657 = vmatprep.subr.bf16.mxu0 %v7079_v56  ;;  %6867 = vmatpush1.bf16.msra.mxu1 %v7010_v19 }
 0x71c   : > { %6852 = vmatprep.subr.bf16.mxu1 %v7079_v56 }
 0x71d   : > { %4028 = vmatmul.mubr.bf16.gmra.mrb[12].mxu0 %v3828_v0  ;;  %v6793_v25 = vpop.f32.mrb[208].mxu1 }
 0x71e   : > { %v8066_v27 = vadd.f32 %v6793_v25, %v8007_v43  ;;  %v3634_v28 = vpop.f32.mrb[209].mxu1  ;;  %4037 = vmatprep.mubr.bf16.mxu0 %v7079_v56  ;;  %4658 = vmatpush1.bf16.msra.mxu0 %v7004_v14 }
 0x71f   : > { %v8070_v29 = vadd.f32 %v8007_v43, %v3634_v28  ;;  %v6794_v55 = vpop.f32.mrb[210].mxu1  ;;  %4659 = vmatprep.subr.bf16.mxu0 %v7079_v56 }
 0x720   : > { %v8074_v59 = vadd.f32 %v6794_v55, %v8007_v43  ;;  %v3637_v30 = vpop.f32.mrb[211].mxu1 }
 0x721   : > { %v8078_v31 = vadd.f32 %v8007_v43, %v3637_v30  ;;  %v7011_v30 = vld [vmem:[%s8694_s6 + $0x68] sm:$0xff]  }
 0x722   : > { %v3834_v32 = vpack.c.bf16 %v8074_v59, %v8066_v27  ;;  %4660 = vmatpush1.bf16.msra.mxu0 %v7005_v26  ;;  %6868 = vmatpush1.bf16.msra.mxu1 %v7011_v30 }
 0x723   : > { %v3833_v33 = vpack.c.bf16 %v8078_v31, %v8070_v29  ;;  %4661 = vmatprep.subr.bf16.mxu0 %v7079_v56  ;;  %6853 = vmatprep.subr.bf16.mxu1 %v7079_v56 }
 0x725   : > { %4038 = vmatmul.mubr.bf16.gmra.mrb[16].mxu0 %v3829_v11  ;;  %v6797_v35 = vpop.f32.mrb[212].mxu1 }
 0x726   : > { %4047 = vmatprep.mubr.bf16.mxu0 %v7079_v56  ;;  %v8090_v38 = vadd.f32 %v6797_v35, %v8007_v43  ;;  %v3650_v39 = vpop.f32.mrb[213].mxu1  ;;  %4662 = vmatpush1.bf16.msra.mxu0 %v7006_v37 }
 0x727   : > { %v8093_v40 = vadd.f32 %v8007_v43, %v3650_v39  ;;  %v6798_v41 = vpop.f32.mrb[214].mxu1  ;;  %4663 = vmatprep.subr.bf16.mxu0 %v7079_v56 }
 0x728   : > { %v8096_v1 = vadd.f32 %v6798_v41, %v8007_v43  ;;  %v3653_v42 = vpop.f32.mrb[215].mxu1 }
 0x729   : > { %v8101_v44 = vadd.f32 %v8007_v43, %v3653_v42 }
 0x72a   : > { %v3836_v45 = vpack.c.bf16 %v8096_v1, %v8090_v38  ;;  %4664 = vmatpush1.bf16.msra.mxu0 %v7007_v48  ;;  %v7012_v38 = vld [vmem:[%s8694_s6 + $0x70] sm:$0xff]  }
 0x72b   : > { %v3835_v46 = vpack.c.bf16 %v8101_v44, %v8093_v40  ;;  %4665 = vmatprep.subr.bf16.mxu0 %v7079_v56  ;;  %6869 = vmatpush1.bf16.msra.mxu1 %v7012_v38 }
 0x72c   : > { %6854 = vmatprep.subr.bf16.mxu1 %v7079_v56 }
 0x72d   : > { %4048 = vmatmul.mubr.bf16.gmra.mrb[20].mxu0 %v3830_v10  ;;  %v6801_v47 = vpop.f32.mrb[216].mxu1 }
 0x72e   : > { %4057 = vmatprep.mubr.bf16.mxu0 %v7079_v56  ;;  %v8112_v49 = vadd.f32 %v6801_v47, %v8007_v43  ;;  %v3666_v50 = vpop.f32.mrb[217].mxu1  ;;  %4666 = vmatpush1.bf16.msra.mxu0 %v7008_v60 }
 0x72f   : > { %v8115_v51 = vadd.f32 %v8007_v43, %v3666_v50  ;;  %v6802_v13 = vpop.f32.mrb[218].mxu1  ;;  %4667 = vmatprep.subr.bf16.mxu0 %v7079_v56 }
 0x730   : > { %v8118_v52 = vadd.f32 %v6802_v13, %v8007_v43  ;;  %v3669_v17 = vpop.f32.mrb[219].mxu1 }
 0x731   : > { %v8123_v53 = vadd.f32 %v8007_v43, %v3669_v17 }
 0x732   : > { %v3838_v54 = vpack.c.bf16 %v8118_v52, %v8112_v49  ;;  %4668 = vmatpush1.bf16.msra.mxu0 %v7009_v8 }
 0x733   : > { %v3837_v57 = vpack.c.bf16 %v8123_v53, %v8115_v51  ;;  %4669 = vmatprep.subr.bf16.mxu0 %v7079_v56 }
 0x735   : > { %4058 = vmatmul.mubr.bf16.gmra.mrb[24].mxu0 %v3831_v24  ;;  %v6805_v58 = vpop.f32.mrb[220].mxu1 }
 0x736   : > { %4067 = vmatprep.mubr.bf16.mxu0 %v7079_v56  ;;  %v8134_v61 = vadd.f32 %v6805_v58, %v8007_v43  ;;  %v3682_v62 = vpop.f32.mrb[221].mxu1  ;;  %4670 = vmatpush1.bf16.msra.mxu0 %v7010_v19 }
 0x737   : > { %v8137_v63 = vadd.f32 %v8007_v43, %v3682_v62  ;;  %v6806_v0 = vpop.f32.mrb[222].mxu1  ;;  %4671 = vmatprep.subr.bf16.mxu0 %v7079_v56 }
 0x738   : > { %v8140_v2 = vadd.f32 %v6806_v0, %v8007_v43  ;;  %v3685_v3 = vpop.f32.mrb[223].mxu1 }
 0x739   : > { %v8145_v4 = vadd.f32 %v8007_v43, %v3685_v3 }
 0x73a   : > { %v3840_v5 = vpack.c.bf16 %v8140_v2, %v8134_v61  ;;  %4672 = vmatpush1.bf16.msra.mxu0 %v7011_v30 }
 0x73b   : > { %v3839_v6 = vpack.c.bf16 %v8145_v4, %v8137_v63  ;;  %4673 = vmatprep.subr.bf16.mxu0 %v7079_v56 }
 0x73d   : > { %4068 = vmatmul.mubr.bf16.gmra.mrb[28].mxu0 %v3832_v23  ;;  %v6809_v7 = vpop.f32.mrb[224].mxu1 }
 0x73e   : > { %4077 = vmatprep.mubr.bf16.mxu0 %v7079_v56  ;;  %v8159_v36 = vadd.f32 %v6809_v7, %v8007_v43  ;;  %v3698_v9 = vpop.f32.mrb[225].mxu1  ;;  %4674 = vmatpush1.bf16.msra.mxu0 %v7012_v38 }
 0x73f   : > { %v8162_v34 = vadd.f32 %v8007_v43, %v3698_v9  ;;  %v6810_v10 = vpop.f32.mrb[226].mxu1  ;;  %4675 = vmatprep.subr.bf16.mxu0 %v7079_v56 }
 0x740   : > { %v8165_v11 = vadd.f32 %v6810_v10, %v8007_v43  ;;  %v3701_v12 = vpop.f32.mrb[227].mxu1 }
 0x741   : > { %v8170_v14 = vadd.f32 %v8007_v43, %v3701_v12 }
 0x742   : > { %v3842_v15 = vpack.c.bf16 %v8165_v11, %v8159_v36 }
 0x743   : > { %v3841_v16 = vpack.c.bf16 %v8170_v14, %v8162_v34 }
 0x745   : > { %4078 = vmatmul.mubr.bf16.gmra.mrb[32].mxu0 %v3833_v33  ;;  %v6813_v18 = vpop.f32.mrb[228].mxu1 }
 0x746   : > { %4087 = vmatprep.mubr.bf16.mxu0 %v7079_v56  ;;  %v8184_v20 = vadd.f32 %v6813_v18, %v8007_v43  ;;  %v3714_v21 = vpop.f32.mrb[229].mxu1 }
 0x747   : > { %v8187_v22 = vadd.f32 %v8007_v43, %v3714_v21  ;;  %v6814_v23 = vpop.f32.mrb[230].mxu1  ;;  %v7013_v21 = vld [vmem:[%s8694_s6 + $0x78] sm:$0xff]  }
 0x748   : > { %v8190_v24 = vadd.f32 %v6814_v23, %v8007_v43  ;;  %v3717_v25 = vpop.f32.mrb[231].mxu1  ;;  %6870 = vmatpush1.bf16.msra.mxu1 %v7013_v21  ;;  %4676 = vmatpush1.bf16.msra.mxu0 %v7013_v21 }
 0x749   : > { %v8195_v26 = vadd.f32 %v8007_v43, %v3717_v25 }
 0x74a   : > { %v3844_v28 = vpack.c.bf16 %v8190_v24, %v8184_v20 }
 0x74b   : > { %v3843_v29 = vpack.c.bf16 %v8195_v26, %v8187_v22 }
 0x74d   : > { %4088 = vmatmul.mubr.bf16.gmra.mrb[36].mxu0 %v3834_v32  ;;  %v6817_v55 = vpop.f32.mrb[232].mxu1 }
 0x74e   : > { %4097 = vmatprep.mubr.bf16.mxu0 %v7079_v56  ;;  %v8209_v31 = vadd.f32 %v6817_v55, %v8007_v43  ;;  %v3730_v33 = vpop.f32.mrb[233].mxu1 }
 0x74f   : > { %v8212_v35 = vadd.f32 %v8007_v43, %v3730_v33  ;;  %v6818_v37 = vpop.f32.mrb[234].mxu1 }
 0x750   : > { %v8215_v27 = vadd.f32 %v6818_v37, %v8007_v43  ;;  %v3733_v59 = vpop.f32.mrb[235].mxu1 }
 0x751   : > { %v8220_v32 = vadd.f32 %v8007_v43, %v3733_v59 }
 0x752   : > { %v3846_v39 = vpack.c.bf16 %v8215_v27, %v8209_v31 }
 0x753   : > { %v3845_v41 = vpack.c.bf16 %v8220_v32, %v8212_v35 }
 0x755   : > { %4098 = vmatmul.mubr.bf16.gmra.mrb[40].mxu0 %v3835_v46  ;;  %v6821_v42 = vpop.f32.mrb[236].mxu1 }
 0x756   : > { %4107 = vmatprep.mubr.bf16.mxu0 %v7079_v56  ;;  %v8231_v47 = vadd.f32 %v6821_v42, %v8007_v43  ;;  %v3746_v48 = vpop.f32.mrb[237].mxu1 }
 0x757   : > { %v8234_v50 = vadd.f32 %v8007_v43, %v3746_v48  ;;  %v6822_v13 = vpop.f32.mrb[238].mxu1 }
 0x758   : > { %v8237_v17 = vadd.f32 %v6822_v13, %v8007_v43  ;;  %v3749_v58 = vpop.f32.mrb[239].mxu1 }
 0x759   : > { %v8240_v60 = vadd.f32 %v8007_v43, %v3749_v58 }
 0x75a   : > { %v3848_v40 = vpack.c.bf16 %v8237_v17, %v8231_v47 }
 0x75b   : > { %v3847_v44 = vpack.c.bf16 %v8240_v60, %v8234_v50 }
 0x75d   : > { %4108 = vmatmul.mubr.bf16.gmra.mrb[44].mxu0 %v3836_v45  ;;  %v6825_v46 = vpop.f32.mrb[240].mxu1 }
 0x75e   : > { %4117 = vmatprep.mubr.bf16.mxu0 %v7079_v56  ;;  %v8251_v62 = vadd.f32 %v6825_v46, %v8007_v43  ;;  %v3762_v0 = vpop.f32.mrb[241].mxu1 }
 0x75f   : > { %v8254_v3 = vadd.f32 %v8007_v43, %v3762_v0  ;;  %v6826_v7 = vpop.f32.mrb[242].mxu1 }
 0x760   : > { %v8257_v8 = vadd.f32 %v6826_v7, %v8007_v43  ;;  %v3765_v9 = vpop.f32.mrb[243].mxu1 }
 0x761   : > { %v8263_v1 = vadd.f32 %v8007_v43, %v3765_v9 }
 0x762   : > { %v3850_v45 = vpack.c.bf16 %v8257_v8, %v8251_v62 }
 0x763   : > { %v3849_v10 = vpack.c.bf16 %v8263_v1, %v8254_v3 }
 0x765   : > { %4118 = vmatmul.mubr.bf16.gmra.mrb[48].mxu0 %v3837_v57  ;;  %v6829_v12 = vpop.f32.mrb[244].mxu1 }
 0x766   : > { %4127 = vmatprep.mubr.bf16.mxu0 %v7079_v56  ;;  %v8276_v18 = vadd.f32 %v6829_v12, %v8007_v43  ;;  %v3778_v19 = vpop.f32.mrb[245].mxu1 }
 0x767   : > { %v3779_v23 = vadd.f32 %v8007_v43, %v3778_v19  ;;  %v6830_v25 = vpop.f32.mrb[246].mxu1 }
 0x768   : > { %v8283_v55 = vadd.f32 %v6830_v25, %v8007_v43  ;;  %v3781_v30 = vpop.f32.mrb[247].mxu1 }
 0x769   : > { %v3782_v51 = vadd.f32 %v8007_v43, %v3781_v30 }
 0x76a   : > { %v3852_v53 = vpack.c.bf16 %v8283_v55, %v8276_v18 }
 0x76b   : > { %v3851_v57 = vpack.c.bf16 %v3782_v51, %v3779_v23 }
 0x76d   : > { %4128 = vmatmul.mubr.bf16.gmra.mrb[52].mxu0 %v3838_v54  ;;  %v6833_v33 = vpop.f32.mrb[248].mxu1 }
 0x76e   : > { %4137 = vmatprep.mubr.bf16.mxu0 %v7079_v56  ;;  %v8293_v37 = vadd.f32 %v6833_v33, %v8007_v43  ;;  %v3794_v59 = vpop.f32.mrb[249].mxu1 }
 0x76f   : > { %v8296_v42 = vadd.f32 %v8007_v43, %v3794_v59  ;;  %v6834_v48 = vpop.f32.mrb[250].mxu1 }
 0x770   : > { %v8299_v13 = vadd.f32 %v6834_v48, %v8007_v43  ;;  %v3797_v58 = vpop.f32.mrb[251].mxu1 }
 0x771   : > { %v8302_v46 = vadd.f32 %v8007_v43, %v3797_v58 }
 0x772   : > { %v3854_v49 = vpack.c.bf16 %v8299_v13, %v8293_v37 }
 0x773   : > { %v3853_v52 = vpack.c.bf16 %v8302_v46, %v8296_v42 }
 0x775   : > { %4138 = vmatmul.mubr.bf16.gmra.mrb[56].mxu0 %v3839_v6  ;;  %v6837_v54 = vpop.f32.mrb[252].mxu1 }
 0x776   : > { %4147 = vmatprep.mubr.bf16.mxu0 %v7079_v56  ;;  %v8313_v0 = vadd.f32 %v6837_v54, %v8007_v43  ;;  %v3810_v3 = vpop.f32.mrb[253].mxu1 }
 0x777   : > { %v8316_v7 = vadd.f32 %v8007_v43, %v3810_v3  ;;  %v6838_v9 = vpop.f32.mrb[254].mxu1 }
 0x778   : > { %v8319_v38 = vadd.f32 %v6838_v9, %v8007_v43  ;;  %v3813_v1 = vpop.f32.mrb[255].mxu1 }
 0x779   : > { %v8322_v12 = vadd.f32 %v8007_v43, %v3813_v1  ;;  %v3875_v43 = vlaneseq }
 0x77a   : > { %v3856_v63 = vpack.c.bf16 %v8319_v38, %v8313_v0 }
 0x77b   : > { %v3855_v4 = vpack.c.bf16 %v8322_v12, %v8316_v7  ;;  %v3876_v61 = vshrl.u32 %v3875_v43, 7 }
 0x77d   : > { %4148 = vmatmul.mubr.bf16.gmra.mrb[60].mxu0 %v3840_v5  ;;  %v3877_v2 = vsub.s32 0, %v3876_v61  ;;  %v3873_v5 = vld [vmem:[%s8693_s5] sm:$0x3]  ;;  %v3881_v6 = vsub.s32 1, %v3876_v61 }
 0x77e   : > { %4157 = vmatprep.mubr.bf16.mxu0 %v7079_v56 }
 0x77f   : > { %v8372_v36 = vrot.slane %v3873_v5, %v3877_v2  ;;  %v8374_v34 = vrot.slane %v3873_v5, %v3881_v6 }
 0x785   : > { %4158 = vmatmul.mubr.bf16.gmra.mrb[64].mxu0 %v3841_v16 }
 0x786   : > { %4167 = vmatprep.mubr.bf16.mxu0 %v7079_v56 }
 0x78d   : > { %4168 = vmatmul.mubr.bf16.gmra.mrb[68].mxu0 %v3842_v15 }
 0x78e   : > { %4177 = vmatprep.mubr.bf16.mxu0 %v7079_v56 }
 0x795   : > { %4178 = vmatmul.mubr.bf16.gmra.mrb[72].mxu0 %v3843_v29 }
 0x796   : > { %4187 = vmatprep.mubr.bf16.mxu0 %v7079_v56 }
 0x79d   : > { %4188 = vmatmul.mubr.bf16.gmra.mrb[76].mxu0 %v3844_v28 }
 0x79e   : > { %4197 = vmatprep.mubr.bf16.mxu0 %v7079_v56 }
 0x7a5   : > { %4198 = vmatmul.mubr.bf16.gmra.mrb[80].mxu0 %v3845_v41 }
 0x7a6   : > { %4207 = vmatprep.mubr.bf16.mxu0 %v7079_v56 }
 0x7ad   : > { %4208 = vmatmul.mubr.bf16.gmra.mrb[84].mxu0 %v3846_v39 }
 0x7ae   : > { %4217 = vmatprep.mubr.bf16.mxu0 %v7079_v56 }
 0x7b5   : > { %4218 = vmatmul.mubr.bf16.gmra.mrb[88].mxu0 %v3847_v44 }
 0x7b6   : > { %4227 = vmatprep.mubr.bf16.mxu0 %v7079_v56 }
 0x7bd   : > { %4228 = vmatmul.mubr.bf16.gmra.mrb[92].mxu0 %v3848_v40 }
 0x7be   : > { %4237 = vmatprep.mubr.bf16.mxu0 %v7079_v56 }
 0x7c5   : > { %4238 = vmatmul.mubr.bf16.gmra.mrb[96].mxu0 %v3849_v10 }
 0x7c6   : > { %4247 = vmatprep.mubr.bf16.mxu0 %v7079_v56 }
 0x7cd   : > { %4248 = vmatmul.mubr.bf16.gmra.mrb[100].mxu0 %v3850_v45 }
 0x7ce   : > { %4257 = vmatprep.mubr.bf16.mxu0 %v7079_v56 }
 0x7d5   : > { %4258 = vmatmul.mubr.bf16.gmra.mrb[104].mxu0 %v3851_v57 }
 0x7d6   : > { %4267 = vmatprep.mubr.bf16.mxu0 %v7079_v56 }
 0x7d8   : > { %v3999_v11 = vpop.f32.mrb[0].mxu0 }
 0x7d9   : > { %v4000_v14 = vadd.f32 %v3999_v11, %v8372_v36  ;;  %v4001_v15 = vpop.f32.mrb[1].mxu0 }
 0x7da   : > { %v4002_v16 = vadd.f32 %v4001_v15, %v8374_v34  ;;  %v4003_v20 = vpop.f32.mrb[2].mxu0 }
 0x7db   : > { %v4004_v22 = vadd.f32 %v4003_v20, %v8372_v36  ;;  %v4005_v24 = vpop.f32.mrb[3].mxu0  ;;  %v4318_v28 = vmax.f32 %v4000_v14, 0.0 }
 0x7dc   : > { %v4006_v26 = vadd.f32 %v4005_v24, %v8374_v34  ;;  %v4319_v31 = vmax.f32 %v4002_v16, 0.0 }
 0x7dd   : > { %v4320_v29 = vmax.f32 %v4004_v22, 0.0  ;;  %4268 = vmatmul.mubr.bf16.gmra.mrb[108].mxu0 %v3852_v53 }
 0x7de   : > { %v4321_v35 = vmax.f32 %v4006_v26, 0.0  ;;  %4277 = vmatprep.mubr.bf16.mxu0 %v7079_v56 }
 0x7df   : > { %v8385_v27 = vpack.c.bf16 %v4320_v29, %v4318_v28 }
 0x7e0   : > { %v8387_v32 = vpack.c.bf16 %v4321_v35, %v4319_v31  ;;  %v4009_v39 = vpop.f32.mrb[4].mxu0 }
 0x7e1   : > { %v4010_v41 = vadd.f32 %v4009_v39, %v8372_v36  ;;  %v4011_v47 = vpop.f32.mrb[5].mxu0 }
 0x7e2   : > { %v4012_v50 = vadd.f32 %v4011_v47, %v8374_v34  ;;  %v4013_v17 = vpop.f32.mrb[6].mxu0 }
 0x7e3   : > { %v4014_v60 = vadd.f32 %v4013_v17, %v8372_v36  ;;  %v4015_v40 = vpop.f32.mrb[7].mxu0  ;;  %v4322_v62 = vmax.f32 %v4010_v41, 0.0 }
 0x7e4   : > { %v4016_v44 = vadd.f32 %v4015_v40, %v8374_v34  ;;  %v4323_v45 = vmax.f32 %v4012_v50, 0.0 }
 0x7e5   : > { %v4324_v8 = vmax.f32 %v4014_v60, 0.0  ;;  %4278 = vmatmul.mubr.bf16.gmra.mrb[112].mxu0 %v3853_v52 }
 0x7e6   : > { %v4325_v10 = vmax.f32 %v4016_v44, 0.0  ;;  %4287 = vmatprep.mubr.bf16.mxu0 %v7079_v56 }
 0x7e7   : > { %v4448_v18 = vpack.c.bf16 %v4324_v8, %v4322_v62 }
 0x7e8   : > { %v4449_v19 = vpack.c.bf16 %v4325_v10, %v4323_v45  ;;  %v4019_v21 = vpop.f32.mrb[8].mxu0 }
 0x7e9   : > { %v4020_v23 = vadd.f32 %v4019_v21, %v8372_v36  ;;  %v4021_v25 = vpop.f32.mrb[9].mxu0 }
 0x7ea   : > { %v4022_v55 = vadd.f32 %v4021_v25, %v8374_v34  ;;  %v4023_v30 = vpop.f32.mrb[10].mxu0  ;;  %4685 = vmatprep.mubr.bf16.mxu1 %v4449_v19 }
 0x7eb   : > { %v4024_v51 = vadd.f32 %v4023_v30, %v8372_v36  ;;  %v4025_v53 = vpop.f32.mrb[11].mxu0  ;;  %4686 = vmatmul.mubr.bf16.vlgmr.msra.gmra.mrb[0].mxu1 %v4448_v18  ;;  %v4326_v33 = vmax.f32 %v4020_v23, 0.0 }
 0x7ec   : > { %v4026_v57 = vadd.f32 %v4025_v53, %v8374_v34  ;;  %v4327_v42 = vmax.f32 %v4022_v55, 0.0 }
 0x7ed   : > { %v4328_v59 = vmax.f32 %v4024_v51, 0.0  ;;  %4288 = vmatmul.mubr.bf16.gmra.mrb[116].mxu0 %v3854_v49 }
 0x7ee   : > { %v4329_v48 = vmax.f32 %v4026_v57, 0.0  ;;  %4297 = vmatprep.mubr.bf16.mxu0 %v7079_v56 }
 0x7ef   : > { %v4450_v58 = vpack.c.bf16 %v4328_v59, %v4326_v33 }
 0x7f0   : > { %v4451_v46 = vpack.c.bf16 %v4329_v48, %v4327_v42  ;;  %v4029_v52 = vpop.f32.mrb[12].mxu0 }
 0x7f1   : > { %v4030_v54 = vadd.f32 %v4029_v52, %v8372_v36  ;;  %v4031_v3 = vpop.f32.mrb[13].mxu0 }
 0x7f2   : > { %v4032_v9 = vadd.f32 %v4031_v3, %v8374_v34  ;;  %v4033_v1 = vpop.f32.mrb[14].mxu0  ;;  %4693 = vmatprep.mubr.bf16.mxu1 %v4451_v46 }
 0x7f3   : > { %v4034_v43 = vadd.f32 %v4033_v1, %v8372_v36  ;;  %v4035_v61 = vpop.f32.mrb[15].mxu0  ;;  %4694 = vmatmul.mubr.bf16.gmra.mrb[4].mxu1 %v4450_v58  ;;  %v4330_v13 = vmax.f32 %v4030_v54, 0.0 }
 0x7f4   : > { %v4036_v37 = vadd.f32 %v4035_v61, %v8374_v34  ;;  %v4331_v2 = vmax.f32 %v4032_v9, 0.0 }
 0x7f5   : > { %v4332_v49 = vmax.f32 %v4034_v43, 0.0  ;;  %4298 = vmatmul.mubr.bf16.gmra.mrb[120].mxu0 %v3855_v4 }
 0x7f6   : > { %v4333_v5 = vmax.f32 %v4036_v37, 0.0  ;;  %4307 = vmatprep.mubr.bf16.mxu0 %v7079_v56 }
 0x7f7   : > { %v4452_v6 = vpack.c.bf16 %v4332_v49, %v4330_v13 }
 0x7f8   : > { %v4453_v11 = vpack.c.bf16 %v4333_v5, %v4331_v2  ;;  %v4039_v14 = vpop.f32.mrb[16].mxu0 }
 0x7f9   : > { %v4040_v15 = vadd.f32 %v4039_v14, %v8372_v36  ;;  %v4041_v16 = vpop.f32.mrb[17].mxu0 }
 0x7fa   : > { %v4042_v20 = vadd.f32 %v4041_v16, %v8374_v34  ;;  %v4043_v22 = vpop.f32.mrb[18].mxu0  ;;  %4701 = vmatprep.mubr.bf16.mxu1 %v4453_v11 }
 0x7fb   : > { %v4044_v24 = vadd.f32 %v4043_v22, %v8372_v36  ;;  %v4045_v26 = vpop.f32.mrb[19].mxu0  ;;  %4702 = vmatmul.mubr.bf16.gmra.mrb[8].mxu1 %v4452_v6  ;;  %v4334_v12 = vmax.f32 %v4040_v15, 0.0 }
 0x7fc   : > { %v4046_v7 = vadd.f32 %v4045_v26, %v8374_v34  ;;  %v4335_v56 = vmax.f32 %v4042_v20, 0.0 }
 0x7fd   : > { %v4336_v4 = vmax.f32 %v4044_v24, 0.0  ;;  %4308 = vmatmul.mubr.bf16.gmra.mrb[124].mxu0 %v3856_v63 }
 0x7fe   : > { %v4337_v28 = vmax.f32 %v4046_v7, 0.0  ;;  %4677 = vmatprep.mubr.bf16.mxu0 %v8387_v32 }
 0x7ff   : > { %v4454_v29 = vpack.c.bf16 %v4336_v4, %v4334_v12 }
 0x800   : > { %v4455_v31 = vpack.c.bf16 %v4337_v28, %v4335_v56  ;;  %v4049_v35 = vpop.f32.mrb[20].mxu0 }
 0x801   : > { %v4050_v39 = vadd.f32 %v4049_v35, %v8372_v36  ;;  %v4051_v41 = vpop.f32.mrb[21].mxu0 }
 0x802   : > { %v4052_v47 = vadd.f32 %v4051_v41, %v8374_v34  ;;  %v4053_v50 = vpop.f32.mrb[22].mxu0  ;;  %4709 = vmatprep.mubr.bf16.mxu1 %v4455_v31 }
 0x803   : > { %v4054_v17 = vadd.f32 %v4053_v50, %v8372_v36  ;;  %v4055_v60 = vpop.f32.mrb[23].mxu0  ;;  %4710 = vmatmul.mubr.bf16.gmra.mrb[12].mxu1 %v4454_v29  ;;  %v4338_v38 = vmax.f32 %v4050_v39, 0.0 }
 0x804   : > { %v4056_v0 = vadd.f32 %v4055_v60, %v8374_v34  ;;  %v4339_v32 = vmax.f32 %v4052_v47, 0.0 }
 0x805   : > { %v4340_v63 = vmax.f32 %v4054_v17, 0.0  ;;  %4678 = vmatmul.mubr.bf16.vlgmr.msra.gmra.mrb[128].mxu0 %v8385_v27 }
 0x806   : > { %v4341_v40 = vmax.f32 %v4056_v0, 0.0 }
 0x807   : > { %v4456_v44 = vpack.c.bf16 %v4340_v63, %v4338_v38 }
 0x808   : > { %v4457_v62 = vpack.c.bf16 %v4341_v40, %v4339_v32  ;;  %v4059_v8 = vpop.f32.mrb[24].mxu0 }
 0x809   : > { %v4060_v45 = vadd.f32 %v4059_v8, %v8372_v36  ;;  %v4061_v10 = vpop.f32.mrb[25].mxu0 }
 0x80a   : > { %v4062_v18 = vadd.f32 %v4061_v10, %v8374_v34  ;;  %v4063_v19 = vpop.f32.mrb[26].mxu0  ;;  %4717 = vmatprep.mubr.bf16.mxu1 %v4457_v62 }
 0x80b   : > { %v4064_v21 = vadd.f32 %v4063_v19, %v8372_v36  ;;  %v4065_v23 = vpop.f32.mrb[27].mxu0  ;;  %4718 = vmatmul.mubr.bf16.gmra.mrb[16].mxu1 %v4456_v44  ;;  %v4342_v55 = vmax.f32 %v4060_v45, 0.0 }
 0x80c   : > { %v4066_v25 = vadd.f32 %v4065_v23, %v8374_v34  ;;  %v4343_v30 = vmax.f32 %v4062_v18, 0.0 }
 0x80d   : > { %v4344_v27 = vmax.f32 %v4064_v21, 0.0 }
 0x80e   : > { %v4345_v51 = vmax.f32 %v4066_v25, 0.0 }
 0x80f   : > { %v4458_v53 = vpack.c.bf16 %v4344_v27, %v4342_v55 }
 0x810   : > { %v4459_v57 = vpack.c.bf16 %v4345_v51, %v4343_v30  ;;  %v4069_v33 = vpop.f32.mrb[28].mxu0 }
 0x811   : > { %v4070_v59 = vadd.f32 %v4069_v33, %v8372_v36  ;;  %v4071_v42 = vpop.f32.mrb[29].mxu0 }
 0x812   : > { %v4072_v48 = vadd.f32 %v4071_v42, %v8374_v34  ;;  %v4073_v58 = vpop.f32.mrb[30].mxu0  ;;  %4725 = vmatprep.mubr.bf16.mxu1 %v4459_v57 }
 0x813   : > { %v4074_v46 = vadd.f32 %v4073_v58, %v8372_v36  ;;  %v4075_v52 = vpop.f32.mrb[31].mxu0  ;;  %4726 = vmatmul.mubr.bf16.gmra.mrb[20].mxu1 %v4458_v53  ;;  %v4346_v3 = vmax.f32 %v4070_v59, 0.0 }
 0x814   : > { %v4076_v54 = vadd.f32 %v4075_v52, %v8374_v34  ;;  %v4347_v1 = vmax.f32 %v4072_v48, 0.0 }
 0x815   : > { %v4348_v9 = vmax.f32 %v4074_v46, 0.0 }
 0x816   : > { %v4349_v43 = vmax.f32 %v4076_v54, 0.0 }
 0x817   : > { %v4460_v61 = vpack.c.bf16 %v4348_v9, %v4346_v3 }
 0x818   : > { %v4461_v37 = vpack.c.bf16 %v4349_v43, %v4347_v1  ;;  %v4079_v13 = vpop.f32.mrb[32].mxu0 }
 0x819   : > { %v4080_v49 = vadd.f32 %v4079_v13, %v8372_v36  ;;  %v4081_v2 = vpop.f32.mrb[33].mxu0 }
 0x81a   : > { %v4082_v5 = vadd.f32 %v4081_v2, %v8374_v34  ;;  %v4083_v6 = vpop.f32.mrb[34].mxu0  ;;  %4733 = vmatprep.mubr.bf16.mxu1 %v4461_v37 }
 0x81b   : > { %v4084_v11 = vadd.f32 %v4083_v6, %v8372_v36  ;;  %v4085_v14 = vpop.f32.mrb[35].mxu0  ;;  %4734 = vmatmul.mubr.bf16.gmra.mrb[24].mxu1 %v4460_v61  ;;  %v4350_v16 = vmax.f32 %v4080_v49, 0.0 }
 0x81c   : > { %v4086_v15 = vadd.f32 %v4085_v14, %v8374_v34  ;;  %v4351_v22 = vmax.f32 %v4082_v5, 0.0 }
 0x81d   : > { %v4352_v20 = vmax.f32 %v4084_v11, 0.0 }
 0x81e   : > { %v4353_v24 = vmax.f32 %v4086_v15, 0.0 }
 0x81f   : > { %v4462_v26 = vpack.c.bf16 %v4352_v20, %v4350_v16 }
 0x820   : > { %v4463_v7 = vpack.c.bf16 %v4353_v24, %v4351_v22  ;;  %v4089_v12 = vpop.f32.mrb[36].mxu0 }
 0x821   : > { %v4090_v4 = vadd.f32 %v4089_v12, %v8372_v36  ;;  %v4091_v56 = vpop.f32.mrb[37].mxu0 }
 0x822   : > { %v4092_v28 = vadd.f32 %v4091_v56, %v8374_v34  ;;  %v4093_v29 = vpop.f32.mrb[38].mxu0  ;;  %4741 = vmatprep.mubr.bf16.mxu1 %v4463_v7 }
 0x823   : > { %v4094_v31 = vadd.f32 %v4093_v29, %v8372_v36  ;;  %v4095_v35 = vpop.f32.mrb[39].mxu0  ;;  %4742 = vmatmul.mubr.bf16.gmra.mrb[28].mxu1 %v4462_v26  ;;  %v4354_v41 = vmax.f32 %v4090_v4, 0.0 }
 0x824   : > { %v4096_v39 = vadd.f32 %v4095_v35, %v8374_v34  ;;  %v4355_v50 = vmax.f32 %v4092_v28, 0.0 }
 0x825   : > { %v4356_v47 = vmax.f32 %v4094_v31, 0.0 }
 0x826   : > { %v4357_v17 = vmax.f32 %v4096_v39, 0.0 }
 0x827   : > { %v4464_v60 = vpack.c.bf16 %v4356_v47, %v4354_v41 }
 0x828   : > { %v4465_v0 = vpack.c.bf16 %v4357_v17, %v4355_v50  ;;  %v4099_v38 = vpop.f32.mrb[40].mxu0 }
 0x829   : > { %v4100_v63 = vadd.f32 %v4099_v38, %v8372_v36  ;;  %v4101_v32 = vpop.f32.mrb[41].mxu0 }
 0x82a   : > { %v4102_v40 = vadd.f32 %v4101_v32, %v8374_v34  ;;  %v4103_v44 = vpop.f32.mrb[42].mxu0  ;;  %4749 = vmatprep.mubr.bf16.mxu1 %v4465_v0 }
 0x82b   : > { %v4104_v62 = vadd.f32 %v4103_v44, %v8372_v36  ;;  %v4105_v8 = vpop.f32.mrb[43].mxu0  ;;  %4750 = vmatmul.mubr.bf16.gmra.mrb[32].mxu1 %v4464_v60  ;;  %v4358_v10 = vmax.f32 %v4100_v63, 0.0 }
 0x82c   : > { %v4106_v45 = vadd.f32 %v4105_v8, %v8374_v34  ;;  %v4359_v19 = vmax.f32 %v4102_v40, 0.0 }
 0x82d   : > { %v4360_v18 = vmax.f32 %v4104_v62, 0.0 }
 0x82e   : > { %v4361_v21 = vmax.f32 %v4106_v45, 0.0 }
 0x82f   : > { %v4466_v23 = vpack.c.bf16 %v4360_v18, %v4358_v10 }
 0x830   : > { %v4467_v25 = vpack.c.bf16 %v4361_v21, %v4359_v19  ;;  %v4109_v55 = vpop.f32.mrb[44].mxu0 }
 0x831   : > { %v4110_v27 = vadd.f32 %v4109_v55, %v8372_v36  ;;  %v4111_v30 = vpop.f32.mrb[45].mxu0 }
 0x832   : > { %v4112_v51 = vadd.f32 %v4111_v30, %v8374_v34  ;;  %v4113_v53 = vpop.f32.mrb[46].mxu0  ;;  %4757 = vmatprep.mubr.bf16.mxu1 %v4467_v25 }
 0x833   : > { %v4114_v57 = vadd.f32 %v4113_v53, %v8372_v36  ;;  %v4115_v33 = vpop.f32.mrb[47].mxu0  ;;  %4758 = vmatmul.mubr.bf16.gmra.mrb[36].mxu1 %v4466_v23  ;;  %v4362_v42 = vmax.f32 %v4110_v27, 0.0 }
 0x834   : > { %v4116_v59 = vadd.f32 %v4115_v33, %v8374_v34  ;;  %v4363_v58 = vmax.f32 %v4112_v51, 0.0 }
 0x835   : > { %v4364_v48 = vmax.f32 %v4114_v57, 0.0 }
 0x836   : > { %v4365_v46 = vmax.f32 %v4116_v59, 0.0 }
 0x837   : > { %v4468_v52 = vpack.c.bf16 %v4364_v48, %v4362_v42 }
 0x838   : > { %v4469_v54 = vpack.c.bf16 %v4365_v46, %v4363_v58  ;;  %v4119_v3 = vpop.f32.mrb[48].mxu0 }
 0x839   : > { %v4120_v9 = vadd.f32 %v4119_v3, %v8372_v36  ;;  %v4121_v1 = vpop.f32.mrb[49].mxu0 }
 0x83a   : > { %v4122_v43 = vadd.f32 %v4121_v1, %v8374_v34  ;;  %v4123_v61 = vpop.f32.mrb[50].mxu0  ;;  %4765 = vmatprep.mubr.bf16.mxu1 %v4469_v54 }
 0x83b   : > { %v4124_v37 = vadd.f32 %v4123_v61, %v8372_v36  ;;  %v4125_v13 = vpop.f32.mrb[51].mxu0  ;;  %4766 = vmatmul.mubr.bf16.gmra.mrb[40].mxu1 %v4468_v52  ;;  %v4366_v2 = vmax.f32 %v4120_v9, 0.0 }
 0x83c   : > { %v4126_v49 = vadd.f32 %v4125_v13, %v8374_v34  ;;  %v4367_v6 = vmax.f32 %v4122_v43, 0.0 }
 0x83d   : > { %v4368_v5 = vmax.f32 %v4124_v37, 0.0 }
 0x83e   : > { %v4369_v11 = vmax.f32 %v4126_v49, 0.0 }
 0x83f   : > { %v4470_v14 = vpack.c.bf16 %v4368_v5, %v4366_v2 }
 0x840   : > { %v4471_v15 = vpack.c.bf16 %v4369_v11, %v4367_v6  ;;  %v4129_v16 = vpop.f32.mrb[52].mxu0 }
 0x841   : > { %v4130_v20 = vadd.f32 %v4129_v16, %v8372_v36  ;;  %v4131_v22 = vpop.f32.mrb[53].mxu0 }
 0x842   : > { %v4132_v24 = vadd.f32 %v4131_v22, %v8374_v34  ;;  %v4133_v26 = vpop.f32.mrb[54].mxu0  ;;  %4773 = vmatprep.mubr.bf16.mxu1 %v4471_v15 }
 0x843   : > { %v4134_v7 = vadd.f32 %v4133_v26, %v8372_v36  ;;  %v4135_v12 = vpop.f32.mrb[55].mxu0  ;;  %4774 = vmatmul.mubr.bf16.gmra.mrb[44].mxu1 %v4470_v14  ;;  %v4370_v56 = vmax.f32 %v4130_v20, 0.0 }
 0x844   : > { %v4136_v4 = vadd.f32 %v4135_v12, %v8374_v34  ;;  %v4371_v29 = vmax.f32 %v4132_v24, 0.0 }
 0x845   : > { %v4372_v28 = vmax.f32 %v4134_v7, 0.0 }
 0x846   : > { %v4373_v31 = vmax.f32 %v4136_v4, 0.0 }
 0x847   : > { %v4472_v35 = vpack.c.bf16 %v4372_v28, %v4370_v56 }
 0x848   : > { %v4473_v39 = vpack.c.bf16 %v4373_v31, %v4371_v29  ;;  %v4139_v41 = vpop.f32.mrb[56].mxu0 }
 0x849   : > { %v4140_v47 = vadd.f32 %v4139_v41, %v8372_v36  ;;  %v4141_v50 = vpop.f32.mrb[57].mxu0 }
 0x84a   : > { %v4142_v17 = vadd.f32 %v4141_v50, %v8374_v34  ;;  %v4143_v60 = vpop.f32.mrb[58].mxu0  ;;  %4781 = vmatprep.mubr.bf16.mxu1 %v4473_v39 }
 0x84b   : > { %v4144_v0 = vadd.f32 %v4143_v60, %v8372_v36  ;;  %v4145_v38 = vpop.f32.mrb[59].mxu0  ;;  %4782 = vmatmul.mubr.bf16.gmra.mrb[48].mxu1 %v4472_v35  ;;  %v4374_v32 = vmax.f32 %v4140_v47, 0.0 }
 0x84c   : > { %v4146_v63 = vadd.f32 %v4145_v38, %v8374_v34  ;;  %v4375_v44 = vmax.f32 %v4142_v17, 0.0 }
 0x84d   : > { %v4376_v40 = vmax.f32 %v4144_v0, 0.0 }
 0x84e   : > { %v4377_v62 = vmax.f32 %v4146_v63, 0.0 }
 0x84f   : > { %v4474_v8 = vpack.c.bf16 %v4376_v40, %v4374_v32 }
 0x850   : > { %v4475_v45 = vpack.c.bf16 %v4377_v62, %v4375_v44  ;;  %v4149_v10 = vpop.f32.mrb[60].mxu0 }
 0x851   : > { %v4150_v18 = vadd.f32 %v4149_v10, %v8372_v36  ;;  %v4151_v19 = vpop.f32.mrb[61].mxu0 }
 0x852   : > { %v4152_v21 = vadd.f32 %v4151_v19, %v8374_v34  ;;  %v4153_v23 = vpop.f32.mrb[62].mxu0  ;;  %4789 = vmatprep.mubr.bf16.mxu1 %v4475_v45 }
 0x853   : > { %v4154_v25 = vadd.f32 %v4153_v23, %v8372_v36  ;;  %v4155_v55 = vpop.f32.mrb[63].mxu0  ;;  %4790 = vmatmul.mubr.bf16.gmra.mrb[52].mxu1 %v4474_v8  ;;  %v4378_v30 = vmax.f32 %v4150_v18, 0.0 }
 0x854   : > { %v4156_v27 = vadd.f32 %v4155_v55, %v8374_v34  ;;  %v4379_v53 = vmax.f32 %v4152_v21, 0.0 }
 0x855   : > { %v4380_v51 = vmax.f32 %v4154_v25, 0.0 }
 0x856   : > { %v4381_v57 = vmax.f32 %v4156_v27, 0.0 }
 0x857   : > { %v4476_v33 = vpack.c.bf16 %v4380_v51, %v4378_v30 }
 0x858   : > { %v4477_v59 = vpack.c.bf16 %v4381_v57, %v4379_v53  ;;  %v4159_v42 = vpop.f32.mrb[64].mxu0 }
 0x859   : > { %v4160_v48 = vadd.f32 %v4159_v42, %v8372_v36  ;;  %v4161_v58 = vpop.f32.mrb[65].mxu0 }
 0x85a   : > { %v4162_v46 = vadd.f32 %v4161_v58, %v8374_v34  ;;  %v4163_v52 = vpop.f32.mrb[66].mxu0  ;;  %4797 = vmatprep.mubr.bf16.mxu1 %v4477_v59 }
 0x85b   : > { %v4164_v54 = vadd.f32 %v4163_v52, %v8372_v36  ;;  %v4165_v3 = vpop.f32.mrb[67].mxu0  ;;  %4798 = vmatmul.mubr.bf16.gmra.mrb[56].mxu1 %v4476_v33  ;;  %v4382_v1 = vmax.f32 %v4160_v48, 0.0 }
 0x85c   : > { %v4166_v9 = vadd.f32 %v4165_v3, %v8374_v34  ;;  %v4383_v61 = vmax.f32 %v4162_v46, 0.0 }
 0x85d   : > { %v4384_v43 = vmax.f32 %v4164_v54, 0.0 }
 0x85e   : > { %v4385_v37 = vmax.f32 %v4166_v9, 0.0 }
 0x85f   : > { %v4478_v13 = vpack.c.bf16 %v4384_v43, %v4382_v1 }
 0x860   : > { %v4479_v49 = vpack.c.bf16 %v4385_v37, %v4383_v61  ;;  %v4169_v2 = vpop.f32.mrb[68].mxu0 }
 0x861   : > { %v4170_v5 = vadd.f32 %v4169_v2, %v8372_v36  ;;  %v4171_v6 = vpop.f32.mrb[69].mxu0 }
 0x862   : > { %v4172_v11 = vadd.f32 %v4171_v6, %v8374_v34  ;;  %v4173_v14 = vpop.f32.mrb[70].mxu0  ;;  %4805 = vmatprep.mubr.bf16.mxu1 %v4479_v49 }
 0x863   : > { %v4174_v15 = vadd.f32 %v4173_v14, %v8372_v36  ;;  %v4175_v16 = vpop.f32.mrb[71].mxu0  ;;  %4806 = vmatmul.mubr.bf16.gmra.mrb[60].mxu1 %v4478_v13  ;;  %v4386_v22 = vmax.f32 %v4170_v5, 0.0 }
 0x864   : > { %v4176_v20 = vadd.f32 %v4175_v16, %v8374_v34  ;;  %v4387_v26 = vmax.f32 %v4172_v11, 0.0 }
 0x865   : > { %v4388_v24 = vmax.f32 %v4174_v15, 0.0 }
 0x866   : > { %v4389_v7 = vmax.f32 %v4176_v20, 0.0 }
 0x867   : > { %v4480_v12 = vpack.c.bf16 %v4388_v24, %v4386_v22 }
 0x868   : > { %v4481_v4 = vpack.c.bf16 %v4389_v7, %v4387_v26  ;;  %v4179_v56 = vpop.f32.mrb[72].mxu0 }
 0x869   : > { %v4180_v28 = vadd.f32 %v4179_v56, %v8372_v36  ;;  %v4181_v29 = vpop.f32.mrb[73].mxu0 }
 0x86a   : > { %v4182_v31 = vadd.f32 %v4181_v29, %v8374_v34  ;;  %v4183_v35 = vpop.f32.mrb[74].mxu0  ;;  %4813 = vmatprep.mubr.bf16.mxu1 %v4481_v4 }
 0x86b   : > { %v4184_v39 = vadd.f32 %v4183_v35, %v8372_v36  ;;  %v4185_v41 = vpop.f32.mrb[75].mxu0  ;;  %4814 = vmatmul.mubr.bf16.gmra.mrb[64].mxu1 %v4480_v12  ;;  %v4390_v50 = vmax.f32 %v4180_v28, 0.0 }
 0x86c   : > { %v4186_v47 = vadd.f32 %v4185_v41, %v8374_v34  ;;  %v4391_v60 = vmax.f32 %v4182_v31, 0.0 }
 0x86d   : > { %v4392_v17 = vmax.f32 %v4184_v39, 0.0 }
 0x86e   : > { %v4393_v0 = vmax.f32 %v4186_v47, 0.0 }
 0x86f   : > { %v4482_v38 = vpack.c.bf16 %v4392_v17, %v4390_v50 }
 0x870   : > { %v4483_v63 = vpack.c.bf16 %v4393_v0, %v4391_v60  ;;  %v4189_v32 = vpop.f32.mrb[76].mxu0 }
 0x871   : > { %v4190_v40 = vadd.f32 %v4189_v32, %v8372_v36  ;;  %v4191_v44 = vpop.f32.mrb[77].mxu0 }
 0x872   : > { %v4192_v62 = vadd.f32 %v4191_v44, %v8374_v34  ;;  %v4193_v8 = vpop.f32.mrb[78].mxu0  ;;  %4821 = vmatprep.mubr.bf16.mxu1 %v4483_v63 }
 0x873   : > { %v4194_v45 = vadd.f32 %v4193_v8, %v8372_v36  ;;  %v4195_v10 = vpop.f32.mrb[79].mxu0  ;;  %4822 = vmatmul.mubr.bf16.gmra.mrb[68].mxu1 %v4482_v38  ;;  %v4394_v19 = vmax.f32 %v4190_v40, 0.0 }
 0x874   : > { %v4196_v18 = vadd.f32 %v4195_v10, %v8374_v34  ;;  %v4395_v23 = vmax.f32 %v4192_v62, 0.0 }
 0x875   : > { %v4396_v21 = vmax.f32 %v4194_v45, 0.0 }
 0x876   : > { %v4397_v25 = vmax.f32 %v4196_v18, 0.0 }
 0x877   : > { %v4484_v55 = vpack.c.bf16 %v4396_v21, %v4394_v19 }
 0x878   : > { %v4485_v27 = vpack.c.bf16 %v4397_v25, %v4395_v23  ;;  %v4199_v30 = vpop.f32.mrb[80].mxu0 }
 0x879   : > { %v4200_v51 = vadd.f32 %v4199_v30, %v8372_v36  ;;  %v4201_v53 = vpop.f32.mrb[81].mxu0 }
 0x87a   : > { %v4202_v57 = vadd.f32 %v4201_v53, %v8374_v34  ;;  %v4203_v33 = vpop.f32.mrb[82].mxu0  ;;  %4829 = vmatprep.mubr.bf16.mxu1 %v4485_v27 }
 0x87b   : > { %v4204_v59 = vadd.f32 %v4203_v33, %v8372_v36  ;;  %v4205_v42 = vpop.f32.mrb[83].mxu0  ;;  %4830 = vmatmul.mubr.bf16.gmra.mrb[72].mxu1 %v4484_v55  ;;  %v4398_v58 = vmax.f32 %v4200_v51, 0.0 }
 0x87c   : > { %v4206_v48 = vadd.f32 %v4205_v42, %v8374_v34  ;;  %v4399_v52 = vmax.f32 %v4202_v57, 0.0 }
 0x87d   : > { %v4400_v46 = vmax.f32 %v4204_v59, 0.0 }
 0x87e   : > { %v4401_v54 = vmax.f32 %v4206_v48, 0.0 }
 0x87f   : > { %v4486_v3 = vpack.c.bf16 %v4400_v46, %v4398_v58 }
 0x880   : > { %v4487_v9 = vpack.c.bf16 %v4401_v54, %v4399_v52  ;;  %v4209_v1 = vpop.f32.mrb[84].mxu0 }
 0x881   : > { %v4210_v43 = vadd.f32 %v4209_v1, %v8372_v36  ;;  %v4211_v61 = vpop.f32.mrb[85].mxu0 }
 0x882   : > { %v4212_v37 = vadd.f32 %v4211_v61, %v8374_v34  ;;  %v4213_v13 = vpop.f32.mrb[86].mxu0  ;;  %4837 = vmatprep.mubr.bf16.mxu1 %v4487_v9 }
 0x883   : > { %v4214_v49 = vadd.f32 %v4213_v13, %v8372_v36  ;;  %v4215_v2 = vpop.f32.mrb[87].mxu0  ;;  %4838 = vmatmul.mubr.bf16.gmra.mrb[76].mxu1 %v4486_v3  ;;  %v4402_v6 = vmax.f32 %v4210_v43, 0.0 }
 0x884   : > { %v4216_v5 = vadd.f32 %v4215_v2, %v8374_v34  ;;  %v4403_v14 = vmax.f32 %v4212_v37, 0.0 }
 0x885   : > { %v4404_v11 = vmax.f32 %v4214_v49, 0.0 }
 0x886   : > { %v4405_v15 = vmax.f32 %v4216_v5, 0.0 }
 0x887   : > { %v4488_v16 = vpack.c.bf16 %v4404_v11, %v4402_v6 }
 0x888   : > { %v4489_v20 = vpack.c.bf16 %v4405_v15, %v4403_v14  ;;  %v4219_v22 = vpop.f32.mrb[88].mxu0 }
 0x889   : > { %v4220_v24 = vadd.f32 %v4219_v22, %v8372_v36  ;;  %v4221_v26 = vpop.f32.mrb[89].mxu0 }
 0x88a   : > { %v4222_v7 = vadd.f32 %v4221_v26, %v8374_v34  ;;  %v4223_v12 = vpop.f32.mrb[90].mxu0  ;;  %4845 = vmatprep.mubr.bf16.mxu1 %v4489_v20 }
 0x88b   : > { %v4224_v4 = vadd.f32 %v4223_v12, %v8372_v36  ;;  %v4225_v56 = vpop.f32.mrb[91].mxu0  ;;  %4846 = vmatmul.mubr.bf16.gmra.mrb[80].mxu1 %v4488_v16  ;;  %v4406_v29 = vmax.f32 %v4220_v24, 0.0 }
 0x88c   : > { %v4226_v28 = vadd.f32 %v4225_v56, %v8374_v34  ;;  %v4407_v35 = vmax.f32 %v4222_v7, 0.0 }
 0x88d   : > { %v4408_v31 = vmax.f32 %v4224_v4, 0.0 }
 0x88e   : > { %v4409_v39 = vmax.f32 %v4226_v28, 0.0 }
 0x88f   : > { %v4490_v41 = vpack.c.bf16 %v4408_v31, %v4406_v29 }
 0x890   : > { %v4491_v47 = vpack.c.bf16 %v4409_v39, %v4407_v35  ;;  %v4229_v50 = vpop.f32.mrb[92].mxu0 }
 0x891   : > { %v4230_v17 = vadd.f32 %v4229_v50, %v8372_v36  ;;  %v4231_v60 = vpop.f32.mrb[93].mxu0 }
 0x892   : > { %v4232_v0 = vadd.f32 %v4231_v60, %v8374_v34  ;;  %v4233_v38 = vpop.f32.mrb[94].mxu0  ;;  %4853 = vmatprep.mubr.bf16.mxu1 %v4491_v47 }
 0x893   : > { %v4234_v63 = vadd.f32 %v4233_v38, %v8372_v36  ;;  %v4235_v32 = vpop.f32.mrb[95].mxu0  ;;  %4854 = vmatmul.mubr.bf16.gmra.mrb[84].mxu1 %v4490_v41  ;;  %v4410_v44 = vmax.f32 %v4230_v17, 0.0 }
 0x894   : > { %v4236_v40 = vadd.f32 %v4235_v32, %v8374_v34  ;;  %v4411_v8 = vmax.f32 %v4232_v0, 0.0 }
 0x895   : > { %v4412_v62 = vmax.f32 %v4234_v63, 0.0 }
 0x896   : > { %v4413_v45 = vmax.f32 %v4236_v40, 0.0 }
 0x897   : > { %v4492_v10 = vpack.c.bf16 %v4412_v62, %v4410_v44 }
 0x898   : > { %v4493_v18 = vpack.c.bf16 %v4413_v45, %v4411_v8  ;;  %v4239_v19 = vpop.f32.mrb[96].mxu0 }
 0x899   : > { %v4240_v21 = vadd.f32 %v4239_v19, %v8372_v36  ;;  %v4241_v23 = vpop.f32.mrb[97].mxu0 }
 0x89a   : > { %v4242_v25 = vadd.f32 %v4241_v23, %v8374_v34  ;;  %v4243_v55 = vpop.f32.mrb[98].mxu0  ;;  %4861 = vmatprep.mubr.bf16.mxu1 %v4493_v18 }
 0x89b   : > { %v4244_v27 = vadd.f32 %v4243_v55, %v8372_v36  ;;  %v4245_v30 = vpop.f32.mrb[99].mxu0  ;;  %4862 = vmatmul.mubr.bf16.gmra.mrb[88].mxu1 %v4492_v10  ;;  %v4414_v53 = vmax.f32 %v4240_v21, 0.0 }
 0x89c   : > { %v4246_v51 = vadd.f32 %v4245_v30, %v8374_v34  ;;  %v4415_v33 = vmax.f32 %v4242_v25, 0.0  ;;  %v8522_v30 = vld [vmem:[%s8695_s7] ss:$0 sm:$0xff] }
 0x89d   : > { %v4416_v57 = vmax.f32 %v4244_v27, 0.0 }
 0x89e   : > { %v4417_v59 = vmax.f32 %v4246_v51, 0.0 }
 0x89f   : > { %v4494_v42 = vpack.c.bf16 %v4416_v57, %v4414_v53 }
 0x8a0   : > { %v4495_v48 = vpack.c.bf16 %v4417_v59, %v4415_v33  ;;  %v4249_v58 = vpop.f32.mrb[100].mxu0 }
 0x8a1   : > { %v4250_v46 = vadd.f32 %v4249_v58, %v8372_v36  ;;  %v4251_v52 = vpop.f32.mrb[101].mxu0 }
 0x8a2   : > { %v4252_v54 = vadd.f32 %v4251_v52, %v8374_v34  ;;  %v4253_v3 = vpop.f32.mrb[102].mxu0  ;;  %4869 = vmatprep.mubr.bf16.mxu1 %v4495_v48 }
 0x8a3   : > { %v4254_v9 = vadd.f32 %v4253_v3, %v8372_v36  ;;  %v4255_v1 = vpop.f32.mrb[103].mxu0  ;;  %4870 = vmatmul.mubr.bf16.gmra.mrb[92].mxu1 %v4494_v42  ;;  %v4418_v61 = vmax.f32 %v4250_v46, 0.0 }
 0x8a4   : > { %v4256_v43 = vadd.f32 %v4255_v1, %v8374_v34  ;;  %v4419_v13 = vmax.f32 %v4252_v54, 0.0 }
 0x8a5   : > { %v4420_v37 = vmax.f32 %v4254_v9, 0.0 }
 0x8a6   : > { %v4421_v49 = vmax.f32 %v4256_v43, 0.0 }
 0x8a7   : > { %v4496_v2 = vpack.c.bf16 %v4420_v37, %v4418_v61 }
 0x8a8   : > { %v4497_v5 = vpack.c.bf16 %v4421_v49, %v4419_v13  ;;  %v4259_v6 = vpop.f32.mrb[104].mxu0 }
 0x8a9   : > { %v4260_v11 = vadd.f32 %v4259_v6, %v8372_v36  ;;  %v4261_v14 = vpop.f32.mrb[105].mxu0 }
 0x8aa   : > { %v4262_v15 = vadd.f32 %v4261_v14, %v8374_v34  ;;  %v4263_v16 = vpop.f32.mrb[106].mxu0  ;;  %4877 = vmatprep.mubr.bf16.mxu1 %v4497_v5 }
 0x8ab   : > { %v4264_v20 = vadd.f32 %v4263_v16, %v8372_v36  ;;  %v4265_v22 = vpop.f32.mrb[107].mxu0  ;;  %4878 = vmatmul.mubr.bf16.gmra.mrb[96].mxu1 %v4496_v2  ;;  %v4422_v26 = vmax.f32 %v4260_v11, 0.0 }
 0x8ac   : > { %v4266_v24 = vadd.f32 %v4265_v22, %v8374_v34  ;;  %v4423_v12 = vmax.f32 %v4262_v15, 0.0 }
 0x8ad   : > { %v4424_v7 = vmax.f32 %v4264_v20, 0.0 }
 0x8ae   : > { %v4425_v4 = vmax.f32 %v4266_v24, 0.0 }
 0x8af   : > { %v4498_v56 = vpack.c.bf16 %v4424_v7, %v4422_v26 }
 0x8b0   : > { %v4499_v28 = vpack.c.bf16 %v4425_v4, %v4423_v12  ;;  %v4269_v29 = vpop.f32.mrb[108].mxu0 }
 0x8b1   : > { %v4270_v31 = vadd.f32 %v4269_v29, %v8372_v36  ;;  %v4271_v35 = vpop.f32.mrb[109].mxu0 }
 0x8b2   : > { %v4272_v39 = vadd.f32 %v4271_v35, %v8374_v34  ;;  %v4273_v41 = vpop.f32.mrb[110].mxu0  ;;  %4885 = vmatprep.mubr.bf16.mxu1 %v4499_v28 }
 0x8b3   : > { %v4274_v47 = vadd.f32 %v4273_v41, %v8372_v36  ;;  %v4275_v50 = vpop.f32.mrb[111].mxu0  ;;  %4886 = vmatmul.mubr.bf16.gmra.mrb[100].mxu1 %v4498_v56  ;;  %v4426_v60 = vmax.f32 %v4270_v31, 0.0 }
 0x8b4   : > { %v4276_v17 = vadd.f32 %v4275_v50, %v8374_v34  ;;  %v4427_v38 = vmax.f32 %v4272_v39, 0.0 }
 0x8b5   : > { %v4428_v0 = vmax.f32 %v4274_v47, 0.0 }
 0x8b6   : > { %v4429_v63 = vmax.f32 %v4276_v17, 0.0 }
 0x8b7   : > { %v4500_v32 = vpack.c.bf16 %v4428_v0, %v4426_v60 }
 0x8b8   : > { %v4501_v40 = vpack.c.bf16 %v4429_v63, %v4427_v38  ;;  %v4279_v44 = vpop.f32.mrb[112].mxu0 }
 0x8b9   : > { %v4280_v62 = vadd.f32 %v4279_v44, %v8372_v36  ;;  %v4281_v8 = vpop.f32.mrb[113].mxu0 }
 0x8ba   : > { %v4282_v45 = vadd.f32 %v4281_v8, %v8374_v34  ;;  %v4283_v10 = vpop.f32.mrb[114].mxu0  ;;  %4893 = vmatprep.mubr.bf16.mxu1 %v4501_v40 }
 0x8bb   : > { %v4284_v18 = vadd.f32 %v4283_v10, %v8372_v36  ;;  %v4285_v19 = vpop.f32.mrb[115].mxu0  ;;  %4894 = vmatmul.mubr.bf16.gmra.mrb[104].mxu1 %v4500_v32  ;;  %v4430_v23 = vmax.f32 %v4280_v62, 0.0 }
 0x8bc   : > { %v4286_v21 = vadd.f32 %v4285_v19, %v8374_v34  ;;  %v4431_v55 = vmax.f32 %v4282_v45, 0.0 }
 0x8bd   : > { %v4432_v25 = vmax.f32 %v4284_v18, 0.0 }
 0x8be   : > { %v4433_v27 = vmax.f32 %v4286_v21, 0.0  ;;  %v4687_v51 = vpop.f32.mrb[0].mxu1 }
 0x8bf   : > { %v4502_v53 = vpack.c.bf16 %v4432_v25, %v4430_v23  ;;  %v4689_v57 = vpop.f32.mrb[1].mxu1  ;;  %v4688_v48 = vadd.f32 %v8522_v30, %v4687_v51 }
 0x8c0   : > { %v4503_v33 = vpack.c.bf16 %v4433_v27, %v4431_v55  ;;  %v4289_v59 = vpop.f32.mrb[116].mxu0  ;;  %v4690_v42 = vpop.f32.mrb[2].mxu1 }
 0x8c1   : > { %v4290_v58 = vadd.f32 %v4289_v59, %v8372_v36  ;;  %v4691_v46 = vadd.f32 %v8522_v30, %v4690_v42  ;;  %v4291_v52 = vpop.f32.mrb[117].mxu0  ;;  %v4692_v54 = vpop.f32.mrb[3].mxu1 }
 0x8c2   : > { %v4292_v3 = vadd.f32 %v4291_v52, %v8374_v34  ;;  %v4293_v9 = vpop.f32.mrb[118].mxu0  ;;  %4901 = vmatprep.mubr.bf16.mxu1 %v4503_v33 }
 0x8c3   : > { %v5708_v1 = vpack.c.bf16 %v4691_v46, %v4688_v48  ;;  %v4294_v43 = vadd.f32 %v4293_v9, %v8372_v36  ;;  %v4295_v61 = vpop.f32.mrb[119].mxu0  ;;  %4902 = vmatmul.mubr.bf16.gmra.mrb[108].mxu1 %v4502_v53  ;;  %v4434_v13 = vmax.f32 %v4290_v58, 0.0 }
 0x8c4   : > { %v4296_v37 = vadd.f32 %v4295_v61, %v8374_v34  ;;  %v4435_v2 = vmax.f32 %v4292_v3, 0.0 }
 0x8c5   : > { %5860 = vst [vmem:[%s8532_s20 + $0x8] sm:$0xff] %v5708_v1   ;;  %v4436_v49 = vmax.f32 %v4294_v43, 0.0 }
 0x8c6   : > { %v4437_v5 = vmax.f32 %v4296_v37, 0.0  ;;  %v4695_v6 = vpop.f32.mrb[4].mxu1 }
 0x8c7   : > { %v4504_v11 = vpack.c.bf16 %v4436_v49, %v4434_v13  ;;  %v4697_v14 = vpop.f32.mrb[5].mxu1  ;;  %v4696_v22 = vadd.f32 %v8522_v30, %v4695_v6 }
 0x8c8   : > { %v4505_v15 = vpack.c.bf16 %v4437_v5, %v4435_v2  ;;  %v4299_v16 = vpop.f32.mrb[120].mxu0  ;;  %v4698_v20 = vpop.f32.mrb[6].mxu1 }
 0x8c9   : > { %v4300_v24 = vadd.f32 %v4299_v16, %v8372_v36  ;;  %v4699_v26 = vadd.f32 %v8522_v30, %v4698_v20  ;;  %v4301_v7 = vpop.f32.mrb[121].mxu0  ;;  %v4700_v12 = vpop.f32.mrb[7].mxu1 }
 0x8ca   : > { %v4302_v4 = vadd.f32 %v4301_v7, %v8374_v34  ;;  %v4303_v56 = vpop.f32.mrb[122].mxu0  ;;  %4909 = vmatprep.mubr.bf16.mxu1 %v4505_v15 }
 0x8cb   : > { %v5713_v28 = vpack.c.bf16 %v4699_v26, %v4696_v22  ;;  %v4304_v29 = vadd.f32 %v4303_v56, %v8372_v36  ;;  %v4305_v31 = vpop.f32.mrb[123].mxu0  ;;  %4910 = vmatmul.mubr.bf16.gmra.mrb[112].mxu1 %v4504_v11  ;;  %v4438_v39 = vmax.f32 %v4300_v24, 0.0 }
 0x8cc   : > { %v4306_v35 = vadd.f32 %v4305_v31, %v8374_v34  ;;  %v4439_v47 = vmax.f32 %v4302_v4, 0.0 }
 0x8cd   : > { %5861 = vst [vmem:[%s8532_s20 + $0x10] sm:$0xff] %v5713_v28   ;;  %v4440_v41 = vmax.f32 %v4304_v29, 0.0 }
 0x8ce   : > { %v4441_v50 = vmax.f32 %v4306_v35, 0.0  ;;  %v4703_v17 = vpop.f32.mrb[8].mxu1 }
 0x8cf   : > { %v4506_v60 = vpack.c.bf16 %v4440_v41, %v4438_v39  ;;  %v4705_v0 = vpop.f32.mrb[9].mxu1  ;;  %v4704_v40 = vadd.f32 %v8522_v30, %v4703_v17 }
 0x8d0   : > { %v4507_v38 = vpack.c.bf16 %v4441_v50, %v4439_v47  ;;  %v4309_v63 = vpop.f32.mrb[124].mxu0  ;;  %v4706_v32 = vpop.f32.mrb[10].mxu1 }
 0x8d1   : > { %v4310_v44 = vadd.f32 %v4309_v63, %v8372_v36  ;;  %v4707_v62 = vadd.f32 %v8522_v30, %v4706_v32  ;;  %v4311_v8 = vpop.f32.mrb[125].mxu0  ;;  %v4708_v45 = vpop.f32.mrb[11].mxu1 }
 0x8d2   : > { %v4312_v10 = vadd.f32 %v4311_v8, %v8374_v34  ;;  %v4313_v18 = vpop.f32.mrb[126].mxu0  ;;  %4917 = vmatprep.mubr.bf16.mxu1 %v4507_v38 }
 0x8d3   : > { %v5718_v19 = vpack.c.bf16 %v4707_v62, %v4704_v40  ;;  %v4314_v21 = vadd.f32 %v4313_v18, %v8372_v36  ;;  %v4315_v23 = vpop.f32.mrb[127].mxu0  ;;  %4918 = vmatmul.mubr.bf16.gmra.mrb[116].mxu1 %v4506_v60  ;;  %v4442_v55 = vmax.f32 %v4310_v44, 0.0 }
 0x8d4   : > { %v4316_v25 = vadd.f32 %v4315_v23, %v8374_v34  ;;  %v4443_v51 = vmax.f32 %v4312_v10, 0.0 }
 0x8d5   : > { %5862 = vst [vmem:[%s8532_s20 + $0x18] sm:$0xff] %v5718_v19   ;;  %v4444_v27 = vmax.f32 %v4314_v21, 0.0 }
 0x8d6   : > { %v4445_v53 = vmax.f32 %v4316_v25, 0.0  ;;  %v4711_v57 = vpop.f32.mrb[12].mxu1 }
 0x8d7   : > { %v4508_v33 = vpack.c.bf16 %v4444_v27, %v4442_v55  ;;  %v4713_v59 = vpop.f32.mrb[13].mxu1  ;;  %v4712_v46 = vadd.f32 %v8522_v30, %v4711_v57 }
 0x8d8   : > { %v4509_v42 = vpack.c.bf16 %v4445_v53, %v4443_v51  ;;  %v4679_v48 = vpop.f32.mrb[128].mxu0  ;;  %v4714_v58 = vpop.f32.mrb[14].mxu1 }
 0x8d9   : > { %v4715_v36 = vadd.f32 %v8522_v30, %v4714_v58  ;;  %v4681_v52 = vpop.f32.mrb[129].mxu0  ;;  %v4716_v54 = vpop.f32.mrb[15].mxu1  ;;  %v4680_v3 = vadd.f32 %v8522_v30, %v4679_v48 }
 0x8da   : > { %v4682_v34 = vpop.f32.mrb[130].mxu0  ;;  %4925 = vmatprep.mubr.bf16.mxu1 %v4509_v42 }
 0x8db   : > { %v5723_v9 = vpack.c.bf16 %v4715_v36, %v4712_v46  ;;  %v4683_v1 = vadd.f32 %v8522_v30, %v4682_v34  ;;  %v4684_v43 = vpop.f32.mrb[131].mxu0  ;;  %4926 = vmatmul.mubr.bf16.gmra.mrb[120].mxu1 %v4508_v33 }
 0x8dd   : > { %5863 = vst [vmem:[%s8532_s20 + $0x20] sm:$0xff] %v5723_v9   ;;  %v5703_v61 = vpack.c.bf16 %v4683_v1, %v4680_v3 }
 0x8de   : > { %v4719_v37 = vpop.f32.mrb[16].mxu1 }
 0x8df   : > { %5704 = vst [vmem:[%s8532_s20] sm:$0xff] %v5703_v61   ;;  %v4721_v13 = vpop.f32.mrb[17].mxu1  ;;  %v4720_v2 = vadd.f32 %v8522_v30, %v4719_v37 }
 0x8e0   : > { %v4722_v49 = vpop.f32.mrb[18].mxu1 }
 0x8e1   : > { %v4723_v5 = vadd.f32 %v8522_v30, %v4722_v49  ;;  %v4724_v6 = vpop.f32.mrb[19].mxu1 }
 0x8e3   : > { %v5728_v11 = vpack.c.bf16 %v4723_v5, %v4720_v2 }
 0x8e5   : > { %5864 = vst [vmem:[%s8532_s20 + $0x28] sm:$0xff] %v5728_v11  }
 0x8e6   : > { %v4727_v14 = vpop.f32.mrb[20].mxu1 }
 0x8e7   : > { %v4729_v15 = vpop.f32.mrb[21].mxu1  ;;  %v4728_v20 = vadd.f32 %v8522_v30, %v4727_v14 }
 0x8e8   : > { %v4730_v16 = vpop.f32.mrb[22].mxu1 }
 0x8e9   : > { %v4731_v22 = vadd.f32 %v8522_v30, %v4730_v16  ;;  %v4732_v24 = vpop.f32.mrb[23].mxu1 }
 0x8eb   : > { %v5733_v26 = vpack.c.bf16 %v4731_v22, %v4728_v20 }
 0x8ed   : > { %5865 = vst [vmem:[%s8532_s20 + $0x30] sm:$0xff] %v5733_v26  }
 0x8ee   : > { %v4735_v7 = vpop.f32.mrb[24].mxu1 }
 0x8ef   : > { %v4737_v12 = vpop.f32.mrb[25].mxu1  ;;  %v4736_v56 = vadd.f32 %v8522_v30, %v4735_v7 }
 0x8f0   : > { %v4738_v4 = vpop.f32.mrb[26].mxu1 }
 0x8f1   : > { %v4739_v28 = vadd.f32 %v8522_v30, %v4738_v4  ;;  %v4740_v29 = vpop.f32.mrb[27].mxu1 }
 0x8f3   : > { %v5738_v31 = vpack.c.bf16 %v4739_v28, %v4736_v56 }
 0x8f5   : > { %5866 = vst [vmem:[%s8532_s20 + $0x38] sm:$0xff] %v5738_v31  }
 0x8f6   : > { %v4743_v35 = vpop.f32.mrb[28].mxu1 }
 0x8f7   : > { %v4745_v39 = vpop.f32.mrb[29].mxu1  ;;  %v4744_v47 = vadd.f32 %v8522_v30, %v4743_v35 }
 0x8f8   : > { %v4746_v41 = vpop.f32.mrb[30].mxu1 }
 0x8f9   : > { %v4747_v50 = vadd.f32 %v8522_v30, %v4746_v41  ;;  %v4748_v17 = vpop.f32.mrb[31].mxu1 }
 0x8fb   : > { %v5743_v60 = vpack.c.bf16 %v4747_v50, %v4744_v47 }
 0x8fd   : > { %5867 = vst [vmem:[%s8532_s20 + $0x40] sm:$0xff] %v5743_v60  }
 0x8fe   : > { %v4751_v0 = vpop.f32.mrb[32].mxu1 }
 0x8ff   : > { %v4753_v38 = vpop.f32.mrb[33].mxu1  ;;  %v4752_v32 = vadd.f32 %v8522_v30, %v4751_v0 }
 0x900   : > { %v4754_v63 = vpop.f32.mrb[34].mxu1 }
 0x901   : > { %v4755_v40 = vadd.f32 %v8522_v30, %v4754_v63  ;;  %v4756_v44 = vpop.f32.mrb[35].mxu1 }
 0x903   : > { %v5748_v62 = vpack.c.bf16 %v4755_v40, %v4752_v32 }
 0x905   : > { %5868 = vst [vmem:[%s8532_s20 + $0x48] sm:$0xff] %v5748_v62  }
 0x906   : > { %v4759_v8 = vpop.f32.mrb[36].mxu1 }
 0x907   : > { %v4761_v45 = vpop.f32.mrb[37].mxu1  ;;  %v4760_v18 = vadd.f32 %v8522_v30, %v4759_v8 }
 0x908   : > { %v4762_v10 = vpop.f32.mrb[38].mxu1 }
 0x909   : > { %v4763_v19 = vadd.f32 %v8522_v30, %v4762_v10  ;;  %v4764_v21 = vpop.f32.mrb[39].mxu1 }
 0x90b   : > { %v5753_v23 = vpack.c.bf16 %v4763_v19, %v4760_v18 }
 0x90d   : > { %5869 = vst [vmem:[%s8532_s20 + $0x50] sm:$0xff] %v5753_v23  }
 0x90e   : > { %v4767_v25 = vpop.f32.mrb[40].mxu1 }
 0x90f   : > { %v4769_v55 = vpop.f32.mrb[41].mxu1  ;;  %v4768_v51 = vadd.f32 %v8522_v30, %v4767_v25 }
 0x910   : > { %v4770_v27 = vpop.f32.mrb[42].mxu1 }
 0x911   : > { %v4771_v53 = vadd.f32 %v8522_v30, %v4770_v27  ;;  %v4772_v57 = vpop.f32.mrb[43].mxu1 }
 0x913   : > { %v5758_v33 = vpack.c.bf16 %v4771_v53, %v4768_v51 }
 0x915   : > { %5870 = vst [vmem:[%s8532_s20 + $0x58] sm:$0xff] %v5758_v33  }
 0x916   : > { %v4775_v59 = vpop.f32.mrb[44].mxu1 }
 0x917   : > { %v4777_v42 = vpop.f32.mrb[45].mxu1  ;;  %v4776_v58 = vadd.f32 %v8522_v30, %v4775_v59 }
 0x918   : > { %v4778_v48 = vpop.f32.mrb[46].mxu1 }
 0x919   : > { %v4779_v46 = vadd.f32 %v8522_v30, %v4778_v48  ;;  %v4780_v36 = vpop.f32.mrb[47].mxu1 }
 0x91b   : > { %v5763_v52 = vpack.c.bf16 %v4779_v46, %v4776_v58 }
 0x91d   : > { %5871 = vst [vmem:[%s8532_s20 + $0x60] sm:$0xff] %v5763_v52  }
 0x91e   : > { %v4783_v54 = vpop.f32.mrb[48].mxu1 }
 0x91f   : > { %v4785_v34 = vpop.f32.mrb[49].mxu1  ;;  %v4784_v9 = vadd.f32 %v8522_v30, %v4783_v54 }
 0x920   : > { %v4786_v3 = vpop.f32.mrb[50].mxu1 }
 0x921   : > { %v4787_v1 = vadd.f32 %v8522_v30, %v4786_v3  ;;  %v4788_v43 = vpop.f32.mrb[51].mxu1 }
 0x923   : > { %v5768_v61 = vpack.c.bf16 %v4787_v1, %v4784_v9 }
 0x925   : > { %5872 = vst [vmem:[%s8532_s20 + $0x68] sm:$0xff] %v5768_v61  }
 0x926   : > { %v4791_v37 = vpop.f32.mrb[52].mxu1 }
 0x927   : > { %v4793_v13 = vpop.f32.mrb[53].mxu1  ;;  %v4792_v2 = vadd.f32 %v8522_v30, %v4791_v37 }
 0x928   : > { %v4794_v49 = vpop.f32.mrb[54].mxu1 }
 0x929   : > { %v4795_v5 = vadd.f32 %v8522_v30, %v4794_v49  ;;  %v4796_v6 = vpop.f32.mrb[55].mxu1 }
 0x92b   : > { %v5773_v11 = vpack.c.bf16 %v4795_v5, %v4792_v2 }
 0x92d   : > { %5873 = vst [vmem:[%s8532_s20 + $0x70] sm:$0xff] %v5773_v11  }
 0x92e   : > { %v4799_v14 = vpop.f32.mrb[56].mxu1 }
 0x92f   : > { %v4801_v15 = vpop.f32.mrb[57].mxu1  ;;  %v4800_v20 = vadd.f32 %v8522_v30, %v4799_v14 }
 0x930   : > { %v4802_v16 = vpop.f32.mrb[58].mxu1 }
 0x931   : > { %v4803_v22 = vadd.f32 %v8522_v30, %v4802_v16  ;;  %v4804_v24 = vpop.f32.mrb[59].mxu1 }
 0x933   : > { %v5778_v26 = vpack.c.bf16 %v4803_v22, %v4800_v20 }
 0x935   : > { %5874 = vst [vmem:[%s8532_s20 + $0x78] sm:$0xff] %v5778_v26  }
 0x936   : > { %v4807_v7 = vpop.f32.mrb[60].mxu1 }
 0x937   : > { %v4809_v12 = vpop.f32.mrb[61].mxu1  ;;  %v4808_v56 = vadd.f32 %v8522_v30, %v4807_v7 }
 0x938   : > { %v4810_v4 = vpop.f32.mrb[62].mxu1 }
 0x939   : > { %v4811_v28 = vadd.f32 %v8522_v30, %v4810_v4  ;;  %v4812_v29 = vpop.f32.mrb[63].mxu1 }
 0x93b   : > { %v5783_v31 = vpack.c.bf16 %v4811_v28, %v4808_v56 }
 0x93d   : > { %5875 = vst [vmem:[%s8532_s20 + $0x80] sm:$0xff] %v5783_v31  }
 0x93e   : > { %v4815_v35 = vpop.f32.mrb[64].mxu1 }
 0x93f   : > { %v4817_v39 = vpop.f32.mrb[65].mxu1  ;;  %v4816_v47 = vadd.f32 %v8522_v30, %v4815_v35 }
 0x940   : > { %v4818_v41 = vpop.f32.mrb[66].mxu1 }
 0x941   : > { %v4819_v50 = vadd.f32 %v8522_v30, %v4818_v41  ;;  %v4820_v17 = vpop.f32.mrb[67].mxu1 }
 0x943   : > { %v5788_v60 = vpack.c.bf16 %v4819_v50, %v4816_v47 }
 0x945   : > { %5876 = vst [vmem:[%s8532_s20 + $0x88] sm:$0xff] %v5788_v60  }
 0x946   : > { %v4823_v0 = vpop.f32.mrb[68].mxu1 }
 0x947   : > { %v4825_v38 = vpop.f32.mrb[69].mxu1  ;;  %v4824_v32 = vadd.f32 %v8522_v30, %v4823_v0 }
 0x948   : > { %v4826_v63 = vpop.f32.mrb[70].mxu1 }
 0x949   : > { %v4827_v40 = vadd.f32 %v8522_v30, %v4826_v63  ;;  %v4828_v44 = vpop.f32.mrb[71].mxu1 }
 0x94b   : > { %v5793_v62 = vpack.c.bf16 %v4827_v40, %v4824_v32 }
 0x94d   : > { %5877 = vst [vmem:[%s8532_s20 + $0x90] sm:$0xff] %v5793_v62  }
 0x94e   : > { %v4831_v8 = vpop.f32.mrb[72].mxu1 }
 0x94f   : > { %v4833_v45 = vpop.f32.mrb[73].mxu1  ;;  %v4832_v18 = vadd.f32 %v8522_v30, %v4831_v8 }
 0x950   : > { %v4834_v10 = vpop.f32.mrb[74].mxu1 }
 0x951   : > { %v4835_v19 = vadd.f32 %v8522_v30, %v4834_v10  ;;  %v4836_v21 = vpop.f32.mrb[75].mxu1 }
 0x953   : > { %v5798_v23 = vpack.c.bf16 %v4835_v19, %v4832_v18 }
 0x955   : > { %5878 = vst [vmem:[%s8532_s20 + $0x98] sm:$0xff] %v5798_v23  }
 0x956   : > { %v4839_v25 = vpop.f32.mrb[76].mxu1 }
 0x957   : > { %v4841_v55 = vpop.f32.mrb[77].mxu1  ;;  %v4840_v51 = vadd.f32 %v8522_v30, %v4839_v25 }
 0x958   : > { %v4842_v27 = vpop.f32.mrb[78].mxu1 }
 0x959   : > { %v4843_v53 = vadd.f32 %v8522_v30, %v4842_v27  ;;  %v4844_v57 = vpop.f32.mrb[79].mxu1 }
 0x95b   : > { %v5803_v33 = vpack.c.bf16 %v4843_v53, %v4840_v51 }
 0x95d   : > { %5879 = vst [vmem:[%s8532_s20 + $0xa0] sm:$0xff] %v5803_v33  }
 0x95e   : > { %v4847_v59 = vpop.f32.mrb[80].mxu1 }
 0x95f   : > { %v4849_v42 = vpop.f32.mrb[81].mxu1  ;;  %v4848_v58 = vadd.f32 %v8522_v30, %v4847_v59 }
 0x960   : > { %v4850_v48 = vpop.f32.mrb[82].mxu1 }
 0x961   : > { %v4851_v46 = vadd.f32 %v8522_v30, %v4850_v48  ;;  %v4852_v36 = vpop.f32.mrb[83].mxu1 }
 0x963   : > { %v5808_v52 = vpack.c.bf16 %v4851_v46, %v4848_v58 }
 0x965   : > { %5880 = vst [vmem:[%s8532_s20 + $0xa8] sm:$0xff] %v5808_v52  }
 0x966   : > { %v4855_v54 = vpop.f32.mrb[84].mxu1 }
 0x967   : > { %v4857_v34 = vpop.f32.mrb[85].mxu1  ;;  %v4856_v9 = vadd.f32 %v8522_v30, %v4855_v54 }
 0x968   : > { %v4858_v3 = vpop.f32.mrb[86].mxu1 }
 0x969   : > { %v4859_v1 = vadd.f32 %v8522_v30, %v4858_v3  ;;  %v4860_v43 = vpop.f32.mrb[87].mxu1 }
 0x96b   : > { %v5813_v61 = vpack.c.bf16 %v4859_v1, %v4856_v9 }
 0x96d   : > { %5881 = vst [vmem:[%s8532_s20 + $0xb0] sm:$0xff] %v5813_v61  }
 0x96e   : > { %v4863_v37 = vpop.f32.mrb[88].mxu1 }
 0x96f   : > { %v4865_v13 = vpop.f32.mrb[89].mxu1  ;;  %v4864_v2 = vadd.f32 %v8522_v30, %v4863_v37 }
 0x970   : > { %v4866_v49 = vpop.f32.mrb[90].mxu1 }
 0x971   : > { %v4867_v5 = vadd.f32 %v8522_v30, %v4866_v49  ;;  %v4868_v6 = vpop.f32.mrb[91].mxu1 }
 0x973   : > { %v5818_v11 = vpack.c.bf16 %v4867_v5, %v4864_v2 }
 0x975   : > { %5882 = vst [vmem:[%s8532_s20 + $0xb8] sm:$0xff] %v5818_v11  }
 0x976   : > { %v4871_v14 = vpop.f32.mrb[92].mxu1 }
 0x977   : > { %v4873_v15 = vpop.f32.mrb[93].mxu1  ;;  %v4872_v20 = vadd.f32 %v8522_v30, %v4871_v14 }
 0x978   : > { %v4874_v16 = vpop.f32.mrb[94].mxu1 }
 0x979   : > { %v4875_v22 = vadd.f32 %v8522_v30, %v4874_v16  ;;  %v4876_v24 = vpop.f32.mrb[95].mxu1 }
 0x97b   : > { %v5823_v26 = vpack.c.bf16 %v4875_v22, %v4872_v20 }
 0x97d   : > { %5883 = vst [vmem:[%s8532_s20 + $0xc0] sm:$0xff] %v5823_v26  }
 0x97e   : > { %v4879_v7 = vpop.f32.mrb[96].mxu1 }
 0x97f   : > { %v4881_v12 = vpop.f32.mrb[97].mxu1  ;;  %v4880_v56 = vadd.f32 %v8522_v30, %v4879_v7 }
 0x980   : > { %v4882_v4 = vpop.f32.mrb[98].mxu1 }
 0x981   : > { %v4883_v28 = vadd.f32 %v8522_v30, %v4882_v4  ;;  %v4884_v29 = vpop.f32.mrb[99].mxu1 }
 0x983   : > { %v5828_v31 = vpack.c.bf16 %v4883_v28, %v4880_v56 }
 0x985   : > { %5884 = vst [vmem:[%s8532_s20 + $0xc8] sm:$0xff] %v5828_v31  }
 0x986   : > { %v4887_v35 = vpop.f32.mrb[100].mxu1 }
 0x987   : > { %v4889_v39 = vpop.f32.mrb[101].mxu1  ;;  %v4888_v47 = vadd.f32 %v8522_v30, %v4887_v35 }
 0x988   : > { %v4890_v41 = vpop.f32.mrb[102].mxu1 }
 0x989   : > { %v4891_v50 = vadd.f32 %v8522_v30, %v4890_v41  ;;  %v4892_v17 = vpop.f32.mrb[103].mxu1 }
 0x98b   : > { %v5833_v60 = vpack.c.bf16 %v4891_v50, %v4888_v47 }
 0x98d   : > { %5885 = vst [vmem:[%s8532_s20 + $0xd0] sm:$0xff] %v5833_v60  }
 0x98e   : > { %v4895_v0 = vpop.f32.mrb[104].mxu1 }
 0x98f   : > { %v4897_v38 = vpop.f32.mrb[105].mxu1  ;;  %v4896_v32 = vadd.f32 %v8522_v30, %v4895_v0 }
 0x990   : > { %v4898_v63 = vpop.f32.mrb[106].mxu1 }
 0x991   : > { %v4899_v40 = vadd.f32 %v8522_v30, %v4898_v63  ;;  %v4900_v44 = vpop.f32.mrb[107].mxu1 }
 0x993   : > { %v5838_v62 = vpack.c.bf16 %v4899_v40, %v4896_v32 }
 0x995   : > { %5886 = vst [vmem:[%s8532_s20 + $0xd8] sm:$0xff] %v5838_v62  }
 0x996   : > { %v4903_v8 = vpop.f32.mrb[108].mxu1 }
 0x997   : > { %v4905_v45 = vpop.f32.mrb[109].mxu1  ;;  %v4904_v18 = vadd.f32 %v8522_v30, %v4903_v8 }
 0x998   : > { %v4906_v10 = vpop.f32.mrb[110].mxu1 }
 0x999   : > { %v4907_v19 = vadd.f32 %v8522_v30, %v4906_v10  ;;  %v4908_v21 = vpop.f32.mrb[111].mxu1 }
 0x99b   : > { %v5843_v23 = vpack.c.bf16 %v4907_v19, %v4904_v18 }
 0x99d   : > { %5887 = vst [vmem:[%s8532_s20 + $0xe0] sm:$0xff] %v5843_v23  }
 0x99e   : > { %v4911_v25 = vpop.f32.mrb[112].mxu1 }
 0x99f   : > { %v4913_v55 = vpop.f32.mrb[113].mxu1  ;;  %v4912_v51 = vadd.f32 %v8522_v30, %v4911_v25 }
 0x9a0   : > { %v4914_v27 = vpop.f32.mrb[114].mxu1 }
 0x9a1   : > { %v4915_v53 = vadd.f32 %v8522_v30, %v4914_v27  ;;  %v4916_v57 = vpop.f32.mrb[115].mxu1 }
 0x9a3   : > { %v5848_v33 = vpack.c.bf16 %v4915_v53, %v4912_v51 }
 0x9a5   : > { %5888 = vst [vmem:[%s8532_s20 + $0xe8] sm:$0xff] %v5848_v33  }
 0x9a6   : > { %v4919_v59 = vpop.f32.mrb[116].mxu1 }
 0x9a7   : > { %v4921_v42 = vpop.f32.mrb[117].mxu1  ;;  %v4920_v58 = vadd.f32 %v8522_v30, %v4919_v59 }
 0x9a8   : > { %v4922_v48 = vpop.f32.mrb[118].mxu1 }
 0x9a9   : > { %v4923_v46 = vadd.f32 %v8522_v30, %v4922_v48  ;;  %v4924_v36 = vpop.f32.mrb[119].mxu1 }
 0x9ab   : > { %v5853_v52 = vpack.c.bf16 %v4923_v46, %v4920_v58 }
 0x9ad   : > { %5889 = vst [vmem:[%s8532_s20 + $0xf0] sm:$0xff] %v5853_v52  }
 0x9ae   : > { %v4927_v54 = vpop.f32.mrb[120].mxu1 }
 0x9af   : > { %v4929_v34 = vpop.f32.mrb[121].mxu1  ;;  %v4928_v9 = vadd.f32 %v8522_v30, %v4927_v54 }
 0x9b0   : > { %v4930_v3 = vpop.f32.mrb[122].mxu1 }
 0x9b1   : > { %v4931_v1 = vadd.f32 %v8522_v30, %v4930_v3  ;;  %v4932_v43 = vpop.f32.mrb[123].mxu1 }
 0x9b3   : > { %v5858_v61 = vpack.c.bf16 %v4931_v1, %v4928_v9 }
 0x9b5   : > { %5890 = vst [vmem:[%s8532_s20 + $0xf8] sm:$0xff] %v5858_v61  }
 0x9b6   : > { %7027 = shalt.err (!%p7024_p3)
}
 0x9b7   : > { %s7028_s13 = scalar_lea.hbm %s8640_s26, 4096  ;;  %s7032_s20 = scalar_lea.hbm %s8696_s8, 16384 }
 0x9b8   : > { %p7029_p4 = scmp.ne.s32.totalorder %s8640_s26, %s7028_s13  ;;  %p7033_p9 = scmp.lt.u32.totalorder %s8640_s26, %s8696_s8 }
 0x9b9   : > { %p7034_p10 = scmp.lt.u32.totalorder %s7032_s20, %s7028_s13  ;;  %p7036_p12 = scmp.lt.u32.totalorder %s7028_s13, %s8640_s26 }
 0x9ba   : > { %p7030_p7 = pnand %p7029_p4, %p7166_p5 }
 0x9bb   : > { %p7035_p11 = por %p7034_p10, %p7033_p9 }
 0x9bc   : > { %p7031_p8 = pneg %p7030_p7 }
 0x9bd   : > { %p7037_p13 = por %p7036_p12, %p7035_p11 }
 0x9bf   : > { %p7038_p0 = pnand %p7037_p13, %p7031_p8 }
 0x9c1   : > { %7041 = shalt.err (!%p7038_p0)
}
 0x9c2   : > { %s7081_s25 = smov 64   ;;  %s7082_s22 = smov 4  }
 0x9c3   : > { %6871 = dma.vmem_to_hbm [thread:$0]  (%p7166_p5), %s8642_s23, 4096, %s8640_s26, %s8647_s9, %s7081_s25, %s7081_s25, %s7082_s22  }
 0x9c4 PF: > { %p6877_p1 = scmp.ge.s32.totalorder %s7076_s30, 2  ;;  %s5283_s10 = sand.u32 1, %s7064_s27  }
 0x9c5   : > { %s5284_s12 = scalar_lea.sflag [#allocation3], %s5283_s10 }
 0x9c6   : > { %p6874_p2 = pnand %p6877_p1, %p7170_p6 }
 0x9c8   : > { %7059 = dma.done.wait (!%p6874_p2), %s5284_s12, 4096  }
 0x9c9   : > { %7061 = vsyncadd (!%p6874_p2), %s5284_s12, 4294963200  ;;  %p18_p3 = scmp.ge.s32.totalorder %s7153_s11, 6   ;;  %s8699_s27 = smov %s7068_s28 }
 0x9ca   : > { %s8700_s28 = smov %s7072_s29  ;;  %s8701_s29 = smov %s7164_s14 }
 0x9cb   : > { %s8702_s30 = smov %s7153_s11  ;;  %20 = sbr.rel (!%p18_p3) target bundleno = 3 (0x3), region = 93 }
 0x9d2   :  { %5289 = vsyncpa [#allocation3], 1 }
 0x9d3   :  { %5291 = vsyncpa [#allocation3 + $0x1], 1 }

</bundles_post_ra>
